<compile_context>
chip_gen: v7x
topology: tpu7x:2x2x1
jax: 0.10.0
libtpu: 0.0.40
codegen_flags: <defaults>
</compile_context>

<pallas_src>
import jax
import jax.numpy as jnp
from jax import lax
from jax.experimental import pallas as pl
from jax.experimental.pallas import tpu as pltpu


# Time-block cap is tiny here so the test exercises the multi-block streaming
# path (reversed index_map + scratch-persisted state).  At real sizes raise it
# (e.g. 64-128) and budget double-buffered (xp, out) blocks plus resident
# weights against v7x's 64 MiB VMEM (and ~32 MiB default scoped limit).
T_BLOCK_CAP = 4
ROW_BLOCK_CAP = 1024


def _time_block(T, cap=T_BLOCK_CAP):
    for blk in range(min(T, cap), 0, -1):
        if T % blk == 0:
            return blk
    return T


def _row_block(rows, cap=ROW_BLOCK_CAP):
    if rows <= cap:
        return rows
    for blk in range(cap - cap % 8, 0, -8):
        if blk and rows % blk == 0:
            return blk
    return rows


# ----------------------------------------------------------------------------
# Pallas kernels
# ----------------------------------------------------------------------------
def proj1_kernel(x_ref, w_ref, b_ref, o_ref):
    """Hoisted input projection, layer 0: (Rblk, Din) @ (Din, 4H) + bias.

    Output is stored per gate (gate order i, f, g, o) so the recurrent kernel
    never has to slice lanes per timestep.
    TODO(synk): optionally cast dot inputs to bf16 on v6e/v7x (keep f32 accum).
    """
    H = o_ref.shape[-1]
    xp = jnp.dot(x_ref[...], w_ref[0], preferred_element_type=jnp.float32) + b_ref[0]
    for g in range(4):                      # once per block, not per timestep
        o_ref[0, g] = xp[:, g * H:(g + 1) * H]


def proj2_kernel(xf_ref, xb_ref, wf_ref, wb_ref, b_ref, o_ref):
    """Hoisted input projection for layers >= 1.

    The previous layer's fwd/bwd halves stay separate (no (T,B,2H) concat in
    HBM): xp = x_fwd @ W_top + x_bwd @ W_bot + bias.
    """
    H = o_ref.shape[-1]
    xp = (jnp.dot(xf_ref[...], wf_ref[0], preferred_element_type=jnp.float32)
          + jnp.dot(xb_ref[...], wb_ref[0], preferred_element_type=jnp.float32)
          + b_ref[0])
    for g in range(4):
        o_ref[0, g] = xp[:, g * H:(g + 1) * H]


def lstm_kernel(len_ref, xp_ref, whh_ref, out_ref, h_scr, c_scr):
    """One BiLSTM layer, both directions fused via grid axis 0.

    grid     = (2 directions ["parallel"], nT time blocks ["arbitrary"])
    len_ref  : (B, 1) int32   per-sequence valid lengths
    xp_ref   : (1, 4, Tblk, B, H)  hoisted input projection (+bias), per gate
    whh_ref  : (1, 4, H, H)        hidden->gate weights, per gate (transposed)
    out_ref  : (1, Tblk, B, H)     hidden states (zero where t >= length[b])
    h_scr/c_scr : (B, H) f32       state persisted across time blocks
    """
    d = pl.program_id(0)
    k = pl.program_id(1)
    nT = pl.num_programs(1)
    Tblk = xp_ref.shape[2]

    @pl.when(k == 0)                      # fresh state at the start of each direction
    def _():
        h_scr[...] = jnp.zeros_like(h_scr)
        c_scr[...] = jnp.zeros_like(c_scr)

    lens = len_ref[...]                                  # (B, 1) int32
    blk = (1 - d) * k + d * (nT - 1 - k)                 # reversed block order for d == 1
    t_base = blk * Tblk

    def step(i, carry):
        h_prev, c_prev = carry
        lt = (1 - d) * i + d * (Tblk - 1 - i)            # local time inside the block
        t = t_base + lt                                  # global time
        # PyTorch gate order: input, forget, cell(g), output.
        gi = xp_ref[0, 0, lt] + jnp.dot(h_prev, whh_ref[0, 0], preferred_element_type=jnp.float32)
        gf = xp_ref[0, 1, lt] + jnp.dot(h_prev, whh_ref[0, 1], preferred_element_type=jnp.float32)
        gg = xp_ref[0, 2, lt] + jnp.dot(h_prev, whh_ref[0, 2], preferred_element_type=jnp.float32)
        go = xp_ref[0, 3, lt] + jnp.dot(h_prev, whh_ref[0, 3], preferred_element_type=jnp.float32)
        i_g = jax.nn.sigmoid(gi)
        f_g = jax.nn.sigmoid(gf)
        g_g = jnp.tanh(gg)
        o_g = jax.nn.sigmoid(go)
        c_new = f_g * c_prev + i_g * g_g
        h_new = o_g * jnp.tanh(c_new)
        # packed-sequence emulation: freeze state / zero output past the length.
        valid = t < lens                                 # (B, 1) bool
        h_nxt = jnp.where(valid, h_new, h_prev)
        c_nxt = jnp.where(valid, c_new, c_prev)
        out_ref[0, lt] = jnp.where(valid, h_new, 0.0).astype(out_ref.dtype)
        return h_nxt, c_nxt

    # h/c carried in vregs inside the block; scratch touched once per block.
    h_fin, c_fin = lax.fori_loop(0, Tblk, step,
                                 (h_scr[...], c_scr[...]), unroll=True)
    h_scr[...] = h_fin
    c_scr[...] = c_fin


def fc_ln_kernel(hf_ref, hb_ref, wf_ref, wb_ref, b_ref, g_ref, beta_ref, o_ref):
    """Linear(2H -> O) on the split fwd/bwd halves (no concat), then LayerNorm.

    nn.Dropout is identity in eval/inference mode.  Note: LayerNorm over
    output_size == 1 is degenerate (output -> beta), matching PyTorch.
    """
    y = (jnp.dot(hf_ref[...], wf_ref[...], preferred_element_type=jnp.float32)
         + jnp.dot(hb_ref[...], wb_ref[...], preferred_element_type=jnp.float32)
         + b_ref[...])
    mu = jnp.mean(y, axis=-1, keepdims=True)
    var = jnp.mean((y - mu) ** 2, axis=-1, keepdims=True)
    o_ref[...] = ((y - mu) * lax.rsqrt(var + 1e-5) * g_ref[...]
                  + beta_ref[...]).astype(o_ref.dtype)


# ----------------------------------------------------------------------------
# Wrappers around pallas_call
# ----------------------------------------------------------------------------
def run_proj_layer0(x2d, wih_s, b_s):
    rows, din = x2d.shape
    H = wih_s.shape[-1] // 4
    rblk = _row_block(rows)
    nr = rows // rblk
    return pl.pallas_call(
        proj1_kernel,
        out_shape=jax.ShapeDtypeStruct((2, 4, rows, H), jnp.float32),
        grid=(2, nr),
        in_specs=[
            pl.BlockSpec((rblk, din), lambda d, r: (r, 0)),
            pl.BlockSpec((1, din, 4 * H), lambda d, r: (d, 0, 0)),
            pl.BlockSpec((1, 1, 4 * H), lambda d, r: (d, 0, 0)),
        ],
        out_specs=pl.BlockSpec((1, 4, rblk, H), lambda d, r: (d, 0, r, 0)),
        compiler_params=pltpu.CompilerParams(
            dimension_semantics=("parallel", "parallel")),
    )(x2d, wih_s, b_s)


def run_proj_layer(hf2d, hb2d, wf_s, wb_s, b_s):
    rows, H = hf2d.shape
    rblk = _row_block(rows)
    nr = rows // rblk
    return pl.pallas_call(
        proj2_kernel,
        out_shape=jax.ShapeDtypeStruct((2, 4, rows, H), jnp.float32),
        grid=(2, nr),
        in_specs=[
            pl.BlockSpec((rblk, H), lambda d, r: (r, 0)),
            pl.BlockSpec((rblk, H), lambda d, r: (r, 0)),
            pl.BlockSpec((1, H, 4 * H), lambda d, r: (d, 0, 0)),
            pl.BlockSpec((1, H, 4 * H), lambda d, r: (d, 0, 0)),
            pl.BlockSpec((1, 1, 4 * H), lambda d, r: (d, 0, 0)),
        ],
        out_specs=pl.BlockSpec((1, 4, rblk, H), lambda d, r: (d, 0, r, 0)),
        compiler_params=pltpu.CompilerParams(
            dimension_semantics=("parallel", "parallel")),
    )(hf2d, hb2d, wf_s, wb_s, b_s)


def run_lstm_layer(lens2, xp4, whh_s, t_blk):
    _, _, T, B, H = xp4.shape
    nT = T // t_blk
    return pl.pallas_call(
        lstm_kernel,
        out_shape=jax.ShapeDtypeStruct((2, T, B, H), jnp.float32),
        grid=(2, nT),
        in_specs=[
            pl.BlockSpec((B, 1), lambda d, k: (0, 0)),
            pl.BlockSpec((1, 4, t_blk, B, H),
                         lambda d, k: (d, 0, (1 - d) * k + d * (nT - 1 - k), 0, 0)),
            pl.BlockSpec((1, 4, H, H), lambda d, k: (d, 0, 0, 0)),
        ],
        out_specs=pl.BlockSpec((1, t_blk, B, H),
                               lambda d, k: (d, (1 - d) * k + d * (nT - 1 - k), 0, 0)),
        scratch_shapes=[pltpu.VMEM((B, H), jnp.float32),
                        pltpu.VMEM((B, H), jnp.float32)],
        compiler_params=pltpu.CompilerParams(
            dimension_semantics=("parallel", "arbitrary")),
    )(lens2, xp4, whh_s)


def run_fc_layernorm(hf2d, hb2d, fc):
    rows, H = hf2d.shape
    O = fc["wf"].shape[1]
    nblk = _row_block(rows)
    nb = rows // nblk
    return pl.pallas_call(
        fc_ln_kernel,
        out_shape=jax.ShapeDtypeStruct((rows, O), jnp.float32),
        grid=(nb,),
        in_specs=[
            pl.BlockSpec((nblk, H), lambda n: (n, 0)),
            pl.BlockSpec((nblk, H), lambda n: (n, 0)),
            pl.BlockSpec((H, O), lambda n: (0, 0)),
            pl.BlockSpec((H, O), lambda n: (0, 0)),
            pl.BlockSpec((1, O), lambda n: (0, 0)),
            pl.BlockSpec((1, O), lambda n: (0, 0)),
            pl.BlockSpec((1, O), lambda n: (0, 0)),
        ],
        out_specs=pl.BlockSpec((nblk, O), lambda n: (n, 0)),
        compiler_params=pltpu.CompilerParams(dimension_semantics=("parallel",)),
    )(hf2d, hb2d, fc["wf"], fc["wb"], fc["b"], fc["gamma"], fc["beta"])


def bilstm_forward(params, x, lengths):
    """x: (B, T, input_size) f32, lengths: (B,) int -> (B, T, output_size).

    Static-length output; the pad_packed_sequence truncation to max(lengths)
    is done by the caller (host-known lengths), so there is no device->host
    sync inside the jitted program.
    """
    B, T, din = x.shape
    t_blk = _time_block(T)
    lens2 = lengths.reshape(B, 1).astype(jnp.int32)

    x_tm = jnp.transpose(x, (1, 0, 2))                  # (T, B, Din) time-major
    hf2d = x_tm.reshape(T * B, din)
    hb2d = None

    for li, layer in enumerate(params["layers"]):
        if li == 0:
            xp = run_proj_layer0(hf2d, layer["wih"], layer["b"])
        else:
            xp = run_proj_layer(hf2d, hb2d, layer["wih_f"], layer["wih_b"], layer["b"])
        H = xp.shape[-1]
        xp4 = xp.reshape(2, 4, T, B, H)                 # free leading-dim split
        out = run_lstm_layer(lens2, xp4, layer["whh"], t_blk)   # (2, T, B, H)
        hf2d = out[0].reshape(T * B, H)
        hb2d = out[1].reshape(T * B, H)

    y = run_fc_layernorm(hf2d, hb2d, params["fc"])      # (T*B, O)
    y = y.reshape(T, B, -1)
    return jnp.transpose(y, (1, 0, 2))                  # (B, T, O) batch-first


# ----------------------------------------------------------------------------
# Deterministic parameter construction (mirrors nn.LSTM / nn.Linear / LayerNorm)
# ----------------------------------------------------------------------------
def make_params(key, input_size, hidden_size, num_layers, output_size):
    H = hidden_size
    k = 1.0 / jnp.sqrt(H)
    layers = []
    for layer in range(num_layers):
        d_in = input_size if layer == 0 else 2 * H
        wih_l, whh_l, b_l = [], [], []
        for _d in range(2):  # forward, backward
            key, k1, k2, k3, k4 = jax.random.split(key, 5)
            w_ih = jax.random.uniform(k1, (4 * H, d_in), jnp.float32, -k, k)
            w_hh = jax.random.uniform(k2, (4 * H, H), jnp.float32, -k, k)
            b_ih = jax.random.uniform(k3, (4 * H,), jnp.float32, -k, k)
            b_hh = jax.random.uniform(k4, (4 * H,), jnp.float32, -k, k)
            wih_l.append(w_ih.T)                                     # (d_in, 4H)
            whh_l.append(w_hh.reshape(4, H, H).transpose(0, 2, 1))   # (4, H, H)
            b_l.append((b_ih + b_hh).reshape(1, 4 * H))
        wih_s = jnp.stack(wih_l)       # (2, d_in, 4H)
        whh_s = jnp.stack(whh_l)       # (2, 4, H, H)
        b_s = jnp.stack(b_l)           # (2, 1, 4H)
        if layer == 0:
            layers.append({"wih": wih_s, "whh": whh_s, "b": b_s})
        else:
            layers.append({"wih_f": wih_s[:, :H, :],   # multiplies fwd half
                           "wih_b": wih_s[:, H:, :],   # multiplies bwd half
                           "whh": whh_s, "b": b_s})
    key, k1, k2 = jax.random.split(key, 3)
    kf = 1.0 / jnp.sqrt(2 * H)
    fc_w = jax.random.uniform(k1, (output_size, 2 * H), jnp.float32, -kf, kf)
    fc_b = jax.random.uniform(k2, (output_size,), jnp.float32, -kf, kf)
    fc = {"wf": fc_w[:, :H].T,                          # (H, O)
          "wb": fc_w[:, H:].T,                          # (H, O)
          "b": fc_b.reshape(1, output_size),
          "gamma": jnp.ones((1, output_size), jnp.float32),
          "beta": jnp.zeros((1, output_size), jnp.float32)}
    return {"layers": layers, "fc": fc}


# ----------------------------------------------------------------------------
if __name__ == "__main__":
    batch = 2
    seq_len = 8
    input_size = 16
    hidden_size = 64     # matches the module spec
    num_layers = 2
    output_size = 1      # features = ['KneeMoment_Y']

    key = jax.random.PRNGKey(0)
    key, kx = jax.random.split(key)
    x = jax.random.normal(kx, (batch, seq_len, input_size), jnp.float32)
    lengths = jnp.array([seq_len, 5], dtype=jnp.int32)   # variable-length batch

    params = make_params(key, input_size, hidden_size, num_layers, output_size)

    fwd = jax.jit(bilstm_forward)
    out_full = jax.block_until_ready(fwd(params, x, lengths))   # (B, T, O)

    # pad_packed_sequence(batch_first=True) truncates to max(lengths); done
    # here on host-known lengths, after the jitted program completes.
    t_out = int(lengths.max())
    out = out_full[:, :t_out]

    assert out.shape == (batch, t_out, output_size), out.shape
    assert bool(jnp.all(jnp.isfinite(out)))
    print("KERNEL_OK")
</pallas_src>

<mosaic_0001>
module attributes {stable_mosaic.version = 11 : i64} {
  func.func @proj1_kernel(%arg0: i32, %arg1: i32, %arg2: memref<16x16xf32, #tpu.memory_space<vmem>>, %arg3: memref<1x16x256xf32, #tpu.memory_space<vmem>>, %arg4: memref<1x1x256xf32, #tpu.memory_space<vmem>>, %arg5: memref<1x4x16x64xf32, #tpu.memory_space<vmem>>) attributes {dimension_semantics = [#tpu.dimension_semantics<parallel>, #tpu.dimension_semantics<parallel>], iteration_bounds = array<i64: 2, 1>, scalar_prefetch = 0 : i64, scratch_operands = 0 : i64, tpu.core_type = #tpu.core_type<tc>, window_params = [{transform_indices = @transform_0, window_bounds = array<i64: 16, 16>}, {transform_indices = @transform_1, window_bounds = array<i64: 1, 16, 256>}, {transform_indices = @transform_2, window_bounds = array<i64: 1, 1, 256>}, {transform_indices = @transform_3, window_bounds = array<i64: 1, 4, 16, 64>}]} {
    %c0 = arith.constant 0 : index
    %c0_0 = arith.constant 0 : index
    %0 = vector.load %arg2[%c0, %c0_0] : memref<16x16xf32, #tpu.memory_space<vmem>>, vector<16x16xf32>
    %c0_1 = arith.constant 0 : index
    %c0_2 = arith.constant 0 : index
    %c0_3 = arith.constant 0 : index
    %1 = vector.load %arg3[%c0_1, %c0_2, %c0_3] : memref<1x16x256xf32, #tpu.memory_space<vmem>>, vector<1x16x256xf32>
    %2 = vector.shape_cast %1 : vector<1x16x256xf32> to vector<16x256xf32>
    %cst = arith.constant dense<0.000000e+00> : vector<16x256xf32>
    %3 = tpu.matmul %0, %2, %cst {dimension_numbers = #tpu.dot_dimension_numbers<[1], [0], [0], [1], [0, 0, 1, 1], [], []>} : vector<16x16xf32>, vector<16x256xf32>, vector<16x256xf32> -> vector<16x256xf32>
    %c0_4 = arith.constant 0 : index
    %c0_5 = arith.constant 0 : index
    %c0_6 = arith.constant 0 : index
    %4 = vector.load %arg4[%c0_4, %c0_5, %c0_6] : memref<1x1x256xf32, #tpu.memory_space<vmem>>, vector<1x1x256xf32>
    %5 = vector.shape_cast %4 : vector<1x1x256xf32> to vector<1x256xf32>
    %6 = vector.broadcast %5 : vector<1x256xf32> to vector<16x256xf32>
    %7 = arith.addf %3, %6 : vector<16x256xf32>
    %8 = vector.extract_strided_slice %7 {offsets = [0, 0], sizes = [16, 64], strides = [1, 1]} : vector<16x256xf32> to vector<16x64xf32>
    %c0_7 = arith.constant 0 : index
    %c0_8 = arith.constant 0 : index
    %c0_9 = arith.constant 0 : index
    %c0_10 = arith.constant 0 : index
    %9 = vector.load %arg5[%c0_7, %c0_8, %c0_9, %c0_10] : memref<1x4x16x64xf32, #tpu.memory_space<vmem>>, vector<1x1x16x64xf32>
    %10 = vector.shape_cast %9 : vector<1x1x16x64xf32> to vector<16x64xf32>
    %11 = vector.shape_cast %8 : vector<16x64xf32> to vector<1x1x16x64xf32>
    tpu.vector_store %arg5[%c0_7, %c0_8, %c0_9, %c0_10], %11 {strides = array<i32>} : memref<1x4x16x64xf32, #tpu.memory_space<vmem>>, vector<1x1x16x64xf32>,
    %12 = vector.extract_strided_slice %7 {offsets = [0, 64], sizes = [16, 64], strides = [1, 1]} : vector<16x256xf32> to vector<16x64xf32>
    %c0_11 = arith.constant 0 : index
    %c1 = arith.constant 1 : index
    %c0_12 = arith.constant 0 : index
    %c0_13 = arith.constant 0 : index
    %13 = vector.load %arg5[%c0_11, %c1, %c0_12, %c0_13] : memref<1x4x16x64xf32, #tpu.memory_space<vmem>>, vector<1x1x16x64xf32>
    %14 = vector.shape_cast %13 : vector<1x1x16x64xf32> to vector<16x64xf32>
    %15 = vector.shape_cast %12 : vector<16x64xf32> to vector<1x1x16x64xf32>
    tpu.vector_store %arg5[%c0_11, %c1, %c0_12, %c0_13], %15 {strides = array<i32>} : memref<1x4x16x64xf32, #tpu.memory_space<vmem>>, vector<1x1x16x64xf32>,
    %16 = vector.extract_strided_slice %7 {offsets = [0, 128], sizes = [16, 64], strides = [1, 1]} : vector<16x256xf32> to vector<16x64xf32>
    %c0_14 = arith.constant 0 : index
    %c2 = arith.constant 2 : index
    %c0_15 = arith.constant 0 : index
    %c0_16 = arith.constant 0 : index
    %17 = vector.load %arg5[%c0_14, %c2, %c0_15, %c0_16] : memref<1x4x16x64xf32, #tpu.memory_space<vmem>>, vector<1x1x16x64xf32>
    %18 = vector.shape_cast %17 : vector<1x1x16x64xf32> to vector<16x64xf32>
    %19 = vector.shape_cast %16 : vector<16x64xf32> to vector<1x1x16x64xf32>
    tpu.vector_store %arg5[%c0_14, %c2, %c0_15, %c0_16], %19 {strides = array<i32>} : memref<1x4x16x64xf32, #tpu.memory_space<vmem>>, vector<1x1x16x64xf32>,
    %20 = vector.extract_strided_slice %7 {offsets = [0, 192], sizes = [16, 64], strides = [1, 1]} : vector<16x256xf32> to vector<16x64xf32>
    %c0_17 = arith.constant 0 : index
    %c3 = arith.constant 3 : index
    %c0_18 = arith.constant 0 : index
    %c0_19 = arith.constant 0 : index
    %21 = vector.load %arg5[%c0_17, %c3, %c0_18, %c0_19] : memref<1x4x16x64xf32, #tpu.memory_space<vmem>>, vector<1x1x16x64xf32>
    %22 = vector.shape_cast %21 : vector<1x1x16x64xf32> to vector<16x64xf32>
    %23 = vector.shape_cast %20 : vector<16x64xf32> to vector<1x1x16x64xf32>
    tpu.vector_store %arg5[%c0_17, %c3, %c0_18, %c0_19], %23 {strides = array<i32>} : memref<1x4x16x64xf32, #tpu.memory_space<vmem>>, vector<1x1x16x64xf32>,
    return
  }
  func.func @transform_0(%arg0: i32, %arg1: i32) -> (i32, i32) {
    %c0_i32 = arith.constant 0 : i32
    %c0_i32_0 = arith.constant 0 : i32
    return %arg1, %c0_i32 : i32, i32
  }
  func.func @transform_1(%arg0: i32, %arg1: i32) -> (i32, i32, i32) {
    %c0_i32 = arith.constant 0 : i32
    %c0_i32_0 = arith.constant 0 : i32
    %c0_i32_1 = arith.constant 0 : i32
    return %arg0, %c0_i32, %c0_i32_0 : i32, i32, i32
  }
  func.func @transform_2(%arg0: i32, %arg1: i32) -> (i32, i32, i32) {
    %c0_i32 = arith.constant 0 : i32
    %c0_i32_0 = arith.constant 0 : i32
    %c0_i32_1 = arith.constant 0 : i32
    return %arg0, %c0_i32, %c0_i32_0 : i32, i32, i32
  }
  func.func @transform_3(%arg0: i32, %arg1: i32) -> (i32, i32, i32, i32) {
    %c0_i32 = arith.constant 0 : i32
    %c0_i32_0 = arith.constant 0 : i32
    %c0_i32_1 = arith.constant 0 : i32
    return %arg0, %c0_i32, %arg1, %c0_i32_0 : i32, i32, i32, i32
  }
}

module attributes {stable_mosaic.version = 11 : i64} {
  func.func @lstm_kernel(%arg0: i32, %arg1: i32, %arg2: memref<2x1xi32, #tpu.memory_space<vmem>>, %arg3: memref<1x4x4x2x64xf32, #tpu.memory_space<vmem>>, %arg4: memref<1x4x64x64xf32, #tpu.memory_space<vmem>>, %arg5: memref<1x4x2x64xf32, #tpu.memory_space<vmem>>, %arg6: memref<2x64xf32, #tpu.memory_space<vmem>>, %arg7: memref<2x64xf32, #tpu.memory_space<vmem>>) attributes {dimension_semantics = [#tpu.dimension_semantics<parallel>, #tpu.dimension_semantics<arbitrary>], iteration_bounds = array<i64: 2, 2>, scalar_prefetch = 0 : i64, scratch_operands = 2 : i64, tpu.core_type = #tpu.core_type<tc>, window_params = [{pipeline_mode = #tpu.pipeline_mode<synchronous>, transform_indices = @transform_0, window_bounds = array<i64: 2, 1>}, {transform_indices = @transform_1, window_bounds = array<i64: 1, 4, 4, 2, 64>}, {transform_indices = @transform_2, window_bounds = array<i64: 1, 4, 64, 64>}, {transform_indices = @transform_3, window_bounds = array<i64: 1, 4, 2, 64>}]} {
    %c0_i32 = arith.constant 0 : i32
    %0 = arith.cmpi eq, %arg1, %c0_i32 : i32
    %1 = arith.extui %0 : i1 to i32
    %c0_i32_0 = arith.constant 0 : i32
    %2 = arith.cmpi ne, %1, %c0_i32_0 : i32
    scf.if %2 {
      %cst_190 = arith.constant 0.000000e+00 : f32
      %298 = vector.broadcast %cst_190 : f32 to vector<2x64xf32>
      %c0_191 = arith.constant 0 : index
      %c0_192 = arith.constant 0 : index
      %299 = vector.load %arg6[%c0_191, %c0_192] : memref<2x64xf32, #tpu.memory_space<vmem>>, vector<2x64xf32>
      tpu.vector_store %arg6[%c0_191, %c0_192], %298 {strides = array<i32>} : memref<2x64xf32, #tpu.memory_space<vmem>>, vector<2x64xf32>,
      %cst_193 = arith.constant 0.000000e+00 : f32
      %300 = vector.broadcast %cst_193 : f32 to vector<2x64xf32>
      %c0_194 = arith.constant 0 : index
      %c0_195 = arith.constant 0 : index
      %301 = vector.load %arg7[%c0_194, %c0_195] : memref<2x64xf32, #tpu.memory_space<vmem>>, vector<2x64xf32>
      tpu.vector_store %arg7[%c0_194, %c0_195], %300 {strides = array<i32>} : memref<2x64xf32, #tpu.memory_space<vmem>>, vector<2x64xf32>,
    } else {
    }
    %c0 = arith.constant 0 : index
    %c0_1 = arith.constant 0 : index
    %3 = vector.load %arg2[%c0, %c0_1] : memref<2x1xi32, #tpu.memory_space<vmem>>, vector<2x1xi32>
    %c1_i32 = arith.constant 1 : i32
    %4 = arith.subi %c1_i32, %arg0 : i32
    %5 = arith.muli %4, %arg1 : i32
    %c1_i32_2 = arith.constant 1 : i32
    %6 = arith.subi %c1_i32_2, %arg1 : i32
    %7 = arith.muli %arg0, %6 : i32
    %8 = arith.addi %5, %7 : i32
    %c4_i32 = arith.constant 4 : i32
    %9 = arith.muli %8, %c4_i32 : i32
    %c0_3 = arith.constant 0 : index
    %c0_4 = arith.constant 0 : index
    %10 = vector.load %arg6[%c0_3, %c0_4] : memref<2x64xf32, #tpu.memory_space<vmem>>, vector<2x64xf32>
    %c0_5 = arith.constant 0 : index
    %c0_6 = arith.constant 0 : index
    %11 = vector.load %arg7[%c0_5, %c0_6] : memref<2x64xf32, #tpu.memory_space<vmem>>, vector<2x64xf32>
    %c0_i32_7 = arith.constant 0 : i32
    %c1_i32_8 = arith.constant 1 : i32
    %12 = arith.subi %c1_i32_8, %arg0 : i32
    %13 = arith.muli %12, %c0_i32_7 : i32
    %c3_i32 = arith.constant 3 : i32
    %14 = arith.subi %c3_i32, %c0_i32_7 : i32
    %15 = arith.muli %arg0, %14 : i32
    %16 = arith.addi %13, %15 : i32
    %17 = arith.addi %9, %16 : i32
    %c0_9 = arith.constant 0 : index
    %c0_10 = arith.constant 0 : index
    %18 = arith.index_cast %16 : i32 to index
    %c0_11 = arith.constant 0 : index
    %c0_12 = arith.constant 0 : index
    %19 = vector.load %arg3[%c0_9, %c0_10, %18, %c0_11, %c0_12] : memref<1x4x4x2x64xf32, #tpu.memory_space<vmem>>, vector<1x1x1x2x64xf32>
    %20 = vector.shape_cast %19 : vector<1x1x1x2x64xf32> to vector<2x64xf32>
    %c0_13 = arith.constant 0 : index
    %c0_14 = arith.constant 0 : index
    %c0_15 = arith.constant 0 : index
    %c0_16 = arith.constant 0 : index
    %21 = vector.load %arg4[%c0_13, %c0_14, %c0_15, %c0_16] : memref<1x4x64x64xf32, #tpu.memory_space<vmem>>, vector<1x1x64x64xf32>
    %22 = vector.shape_cast %21 : vector<1x1x64x64xf32> to vector<64x64xf32>
    %cst = arith.constant dense<0.000000e+00> : vector<2x64xf32>
    %23 = tpu.matmul %10, %22, %cst {dimension_numbers = #tpu.dot_dimension_numbers<[1], [0], [0], [1], [0, 0, 1, 1], [], []>} : vector<2x64xf32>, vector<64x64xf32>, vector<2x64xf32> -> vector<2x64xf32>
    %24 = arith.addf %20, %23 : vector<2x64xf32>
    %c0_17 = arith.constant 0 : index
    %c1 = arith.constant 1 : index
    %25 = arith.index_cast %16 : i32 to index
    %c0_18 = arith.constant 0 : index
    %c0_19 = arith.constant 0 : index
    %26 = vector.load %arg3[%c0_17, %c1, %25, %c0_18, %c0_19] : memref<1x4x4x2x64xf32, #tpu.memory_space<vmem>>, vector<1x1x1x2x64xf32>
    %27 = vector.shape_cast %26 : vector<1x1x1x2x64xf32> to vector<2x64xf32>
    %c0_20 = arith.constant 0 : index
    %c1_21 = arith.constant 1 : index
    %c0_22 = arith.constant 0 : index
    %c0_23 = arith.constant 0 : index
    %28 = vector.load %arg4[%c0_20, %c1_21, %c0_22, %c0_23] : memref<1x4x64x64xf32, #tpu.memory_space<vmem>>, vector<1x1x64x64xf32>
    %29 = vector.shape_cast %28 : vector<1x1x64x64xf32> to vector<64x64xf32>
    %cst_24 = arith.constant dense<0.000000e+00> : vector<2x64xf32>
    %30 = tpu.matmul %10, %29, %cst_24 {dimension_numbers = #tpu.dot_dimension_numbers<[1], [0], [0], [1], [0, 0, 1, 1], [], []>} : vector<2x64xf32>, vector<64x64xf32>, vector<2x64xf32> -> vector<2x64xf32>
    %31 = arith.addf %27, %30 : vector<2x64xf32>
    %c0_25 = arith.constant 0 : index
    %c2 = arith.constant 2 : index
    %32 = arith.index_cast %16 : i32 to index
    %c0_26 = arith.constant 0 : index
    %c0_27 = arith.constant 0 : index
    %33 = vector.load %arg3[%c0_25, %c2, %32, %c0_26, %c0_27] : memref<1x4x4x2x64xf32, #tpu.memory_space<vmem>>, vector<1x1x1x2x64xf32>
    %34 = vector.shape_cast %33 : vector<1x1x1x2x64xf32> to vector<2x64xf32>
    %c0_28 = arith.constant 0 : index
    %c2_29 = arith.constant 2 : index
    %c0_30 = arith.constant 0 : index
    %c0_31 = arith.constant 0 : index
    %35 = vector.load %arg4[%c0_28, %c2_29, %c0_30, %c0_31] : memref<1x4x64x64xf32, #tpu.memory_space<vmem>>, vector<1x1x64x64xf32>
    %36 = vector.shape_cast %35 : vector<1x1x64x64xf32> to vector<64x64xf32>
    %cst_32 = arith.constant dense<0.000000e+00> : vector<2x64xf32>
    %37 = tpu.matmul %10, %36, %cst_32 {dimension_numbers = #tpu.dot_dimension_numbers<[1], [0], [0], [1], [0, 0, 1, 1], [], []>} : vector<2x64xf32>, vector<64x64xf32>, vector<2x64xf32> -> vector<2x64xf32>
    %38 = arith.addf %34, %37 : vector<2x64xf32>
    %c0_33 = arith.constant 0 : index
    %c3 = arith.constant 3 : index
    %39 = arith.index_cast %16 : i32 to index
    %c0_34 = arith.constant 0 : index
    %c0_35 = arith.constant 0 : index
    %40 = vector.load %arg3[%c0_33, %c3, %39, %c0_34, %c0_35] : memref<1x4x4x2x64xf32, #tpu.memory_space<vmem>>, vector<1x1x1x2x64xf32>
    %41 = vector.shape_cast %40 : vector<1x1x1x2x64xf32> to vector<2x64xf32>
    %c0_36 = arith.constant 0 : index
    %c3_37 = arith.constant 3 : index
    %c0_38 = arith.constant 0 : index
    %c0_39 = arith.constant 0 : index
    %42 = vector.load %arg4[%c0_36, %c3_37, %c0_38, %c0_39] : memref<1x4x64x64xf32, #tpu.memory_space<vmem>>, vector<1x1x64x64xf32>
    %43 = vector.shape_cast %42 : vector<1x1x64x64xf32> to vector<64x64xf32>
    %cst_40 = arith.constant dense<0.000000e+00> : vector<2x64xf32>
    %44 = tpu.matmul %10, %43, %cst_40 {dimension_numbers = #tpu.dot_dimension_numbers<[1], [0], [0], [1], [0, 0, 1, 1], [], []>} : vector<2x64xf32>, vector<64x64xf32>, vector<2x64xf32> -> vector<2x64xf32>
    %45 = arith.addf %41, %44 : vector<2x64xf32>
    %46 = arith.negf %24 : vector<2x64xf32>
    %47 = math.exp %46 : vector<2x64xf32>
    %cst_41 = arith.constant 1.000000e+00 : f32
    %48 = vector.broadcast %cst_41 : f32 to vector<2x64xf32>
    %49 = arith.addf %48, %47 : vector<2x64xf32>
    %50 = arith.divf %48, %49 : vector<2x64xf32>
    %51 = arith.negf %31 : vector<2x64xf32>
    %52 = math.exp %51 : vector<2x64xf32>
    %cst_42 = arith.constant 1.000000e+00 : f32
    %53 = vector.broadcast %cst_42 : f32 to vector<2x64xf32>
    %54 = arith.addf %53, %52 : vector<2x64xf32>
    %55 = arith.divf %53, %54 : vector<2x64xf32>
    %56 = math.tanh %38 : vector<2x64xf32>
    %57 = arith.negf %45 : vector<2x64xf32>
    %58 = math.exp %57 : vector<2x64xf32>
    %cst_43 = arith.constant 1.000000e+00 : f32
    %59 = vector.broadcast %cst_43 : f32 to vector<2x64xf32>
    %60 = arith.addf %59, %58 : vector<2x64xf32>
    %61 = arith.divf %59, %60 : vector<2x64xf32>
    %62 = arith.mulf %55, %11 : vector<2x64xf32>
    %63 = arith.mulf %50, %56 : vector<2x64xf32>
    %64 = arith.addf %62, %63 : vector<2x64xf32>
    %65 = math.tanh %64 : vector<2x64xf32>
    %66 = arith.mulf %61, %65 : vector<2x64xf32>
    %67 = vector.broadcast %17 : i32 to vector<2x1xi32>
    %68 = arith.cmpi slt, %67, %3 : vector<2x1xi32>
    %69 = vector.shape_cast %68 : vector<2x1xi1> to vector<2x1xi1>
    %70 = vector.broadcast %69 : vector<2x1xi1> to vector<2x64xi1>
    %71 = arith.select %70, %66, %10 : vector<2x64xi1>, vector<2x64xf32>
    %72 = vector.shape_cast %68 : vector<2x1xi1> to vector<2x1xi1>
    %73 = vector.broadcast %72 : vector<2x1xi1> to vector<2x64xi1>
    %74 = arith.select %73, %64, %11 : vector<2x64xi1>, vector<2x64xf32>
    %cst_44 = arith.constant 0.000000e+00 : f32
    %75 = vector.shape_cast %68 : vector<2x1xi1> to vector<2x1xi1>
    %76 = vector.broadcast %75 : vector<2x1xi1> to vector<2x64xi1>
    %77 = vector.broadcast %cst_44 : f32 to vector<2x64xf32>
    %78 = arith.select %76, %66, %77 : vector<2x64xi1>, vector<2x64xf32>
    %c0_45 = arith.constant 0 : index
    %79 = arith.index_cast %16 : i32 to index
    %c0_46 = arith.constant 0 : index
    %c0_47 = arith.constant 0 : index
    %80 = vector.load %arg5[%c0_45, %79, %c0_46, %c0_47] : memref<1x4x2x64xf32, #tpu.memory_space<vmem>>, vector<1x1x2x64xf32>
    %81 = vector.shape_cast %80 : vector<1x1x2x64xf32> to vector<2x64xf32>
    %82 = vector.shape_cast %78 : vector<2x64xf32> to vector<1x1x2x64xf32>
    tpu.vector_store %arg5[%c0_45, %79, %c0_46, %c0_47], %82 {strides = array<i32>} : memref<1x4x2x64xf32, #tpu.memory_space<vmem>>, vector<1x1x2x64xf32>,
    %c1_i32_48 = arith.constant 1 : i32
    %c1_i32_49 = arith.constant 1 : i32
    %83 = arith.subi %c1_i32_49, %arg0 : i32
    %84 = arith.muli %83, %c1_i32_48 : i32
    %c3_i32_50 = arith.constant 3 : i32
    %85 = arith.subi %c3_i32_50, %c1_i32_48 : i32
    %86 = arith.muli %arg0, %85 : i32
    %87 = arith.addi %84, %86 : i32
    %88 = arith.addi %9, %87 : i32
    %c0_51 = arith.constant 0 : index
    %c0_52 = arith.constant 0 : index
    %89 = arith.index_cast %87 : i32 to index
    %c0_53 = arith.constant 0 : index
    %c0_54 = arith.constant 0 : index
    %90 = vector.load %arg3[%c0_51, %c0_52, %89, %c0_53, %c0_54] : memref<1x4x4x2x64xf32, #tpu.memory_space<vmem>>, vector<1x1x1x2x64xf32>
    %91 = vector.shape_cast %90 : vector<1x1x1x2x64xf32> to vector<2x64xf32>
    %c0_55 = arith.constant 0 : index
    %c0_56 = arith.constant 0 : index
    %c0_57 = arith.constant 0 : index
    %c0_58 = arith.constant 0 : index
    %92 = vector.load %arg4[%c0_55, %c0_56, %c0_57, %c0_58] : memref<1x4x64x64xf32, #tpu.memory_space<vmem>>, vector<1x1x64x64xf32>
    %93 = vector.shape_cast %92 : vector<1x1x64x64xf32> to vector<64x64xf32>
    %cst_59 = arith.constant dense<0.000000e+00> : vector<2x64xf32>
    %94 = tpu.matmul %71, %93, %cst_59 {dimension_numbers = #tpu.dot_dimension_numbers<[1], [0], [0], [1], [0, 0, 1, 1], [], []>} : vector<2x64xf32>, vector<64x64xf32>, vector<2x64xf32> -> vector<2x64xf32>
    %95 = arith.addf %91, %94 : vector<2x64xf32>
    %c0_60 = arith.constant 0 : index
    %c1_61 = arith.constant 1 : index
    %96 = arith.index_cast %87 : i32 to index
    %c0_62 = arith.constant 0 : index
    %c0_63 = arith.constant 0 : index
    %97 = vector.load %arg3[%c0_60, %c1_61, %96, %c0_62, %c0_63] : memref<1x4x4x2x64xf32, #tpu.memory_space<vmem>>, vector<1x1x1x2x64xf32>
    %98 = vector.shape_cast %97 : vector<1x1x1x2x64xf32> to vector<2x64xf32>
    %c0_64 = arith.constant 0 : index
    %c1_65 = arith.constant 1 : index
    %c0_66 = arith.constant 0 : index
    %c0_67 = arith.constant 0 : index
    %99 = vector.load %arg4[%c0_64, %c1_65, %c0_66, %c0_67] : memref<1x4x64x64xf32, #tpu.memory_space<vmem>>, vector<1x1x64x64xf32>
    %100 = vector.shape_cast %99 : vector<1x1x64x64xf32> to vector<64x64xf32>
    %cst_68 = arith.constant dense<0.000000e+00> : vector<2x64xf32>
    %101 = tpu.matmul %71, %100, %cst_68 {dimension_numbers = #tpu.dot_dimension_numbers<[1], [0], [0], [1], [0, 0, 1, 1], [], []>} : vector<2x64xf32>, vector<64x64xf32>, vector<2x64xf32> -> vector<2x64xf32>
    %102 = arith.addf %98, %101 : vector<2x64xf32>
    %c0_69 = arith.constant 0 : index
    %c2_70 = arith.constant 2 : index
    %103 = arith.index_cast %87 : i32 to index
    %c0_71 = arith.constant 0 : index
    %c0_72 = arith.constant 0 : index
    %104 = vector.load %arg3[%c0_69, %c2_70, %103, %c0_71, %c0_72] : memref<1x4x4x2x64xf32, #tpu.memory_space<vmem>>, vector<1x1x1x2x64xf32>
    %105 = vector.shape_cast %104 : vector<1x1x1x2x64xf32> to vector<2x64xf32>
    %c0_73 = arith.constant 0 : index
    %c2_74 = arith.constant 2 : index
    %c0_75 = arith.constant 0 : index
    %c0_76 = arith.constant 0 : index
    %106 = vector.load %arg4[%c0_73, %c2_74, %c0_75, %c0_76] : memref<1x4x64x64xf32, #tpu.memory_space<vmem>>, vector<1x1x64x64xf32>
    %107 = vector.shape_cast %106 : vector<1x1x64x64xf32> to vector<64x64xf32>
    %cst_77 = arith.constant dense<0.000000e+00> : vector<2x64xf32>
    %108 = tpu.matmul %71, %107, %cst_77 {dimension_numbers = #tpu.dot_dimension_numbers<[1], [0], [0], [1], [0, 0, 1, 1], [], []>} : vector<2x64xf32>, vector<64x64xf32>, vector<2x64xf32> -> vector<2x64xf32>
    %109 = arith.addf %105, %108 : vector<2x64xf32>
    %c0_78 = arith.constant 0 : index
    %c3_79 = arith.constant 3 : index
    %110 = arith.index_cast %87 : i32 to index
    %c0_80 = arith.constant 0 : index
    %c0_81 = arith.constant 0 : index
    %111 = vector.load %arg3[%c0_78, %c3_79, %110, %c0_80, %c0_81] : memref<1x4x4x2x64xf32, #tpu.memory_space<vmem>>, vector<1x1x1x2x64xf32>
    %112 = vector.shape_cast %111 : vector<1x1x1x2x64xf32> to vector<2x64xf32>
    %c0_82 = arith.constant 0 : index
    %c3_83 = arith.constant 3 : index
    %c0_84 = arith.constant 0 : index
    %c0_85 = arith.constant 0 : index
    %113 = vector.load %arg4[%c0_82, %c3_83, %c0_84, %c0_85] : memref<1x4x64x64xf32, #tpu.memory_space<vmem>>, vector<1x1x64x64xf32>
    %114 = vector.shape_cast %113 : vector<1x1x64x64xf32> to vector<64x64xf32>
    %cst_86 = arith.constant dense<0.000000e+00> : vector<2x64xf32>
    %115 = tpu.matmul %71, %114, %cst_86 {dimension_numbers = #tpu.dot_dimension_numbers<[1], [0], [0], [1], [0, 0, 1, 1], [], []>} : vector<2x64xf32>, vector<64x64xf32>, vector<2x64xf32> -> vector<2x64xf32>
    %116 = arith.addf %112, %115 : vector<2x64xf32>
    %117 = arith.negf %95 : vector<2x64xf32>
    %118 = math.exp %117 : vector<2x64xf32>
    %cst_87 = arith.constant 1.000000e+00 : f32
    %119 = vector.broadcast %cst_87 : f32 to vector<2x64xf32>
    %120 = arith.addf %119, %118 : vector<2x64xf32>
    %121 = arith.divf %119, %120 : vector<2x64xf32>
    %122 = arith.negf %102 : vector<2x64xf32>
    %123 = math.exp %122 : vector<2x64xf32>
    %cst_88 = arith.constant 1.000000e+00 : f32
    %124 = vector.broadcast %cst_88 : f32 to vector<2x64xf32>
    %125 = arith.addf %124, %123 : vector<2x64xf32>
    %126 = arith.divf %124, %125 : vector<2x64xf32>
    %127 = math.tanh %109 : vector<2x64xf32>
    %128 = arith.negf %116 : vector<2x64xf32>
    %129 = math.exp %128 : vector<2x64xf32>
    %cst_89 = arith.constant 1.000000e+00 : f32
    %130 = vector.broadcast %cst_89 : f32 to vector<2x64xf32>
    %131 = arith.addf %130, %129 : vector<2x64xf32>
    %132 = arith.divf %130, %131 : vector<2x64xf32>
    %133 = arith.mulf %126, %74 : vector<2x64xf32>
    %134 = arith.mulf %121, %127 : vector<2x64xf32>
    %135 = arith.addf %133, %134 : vector<2x64xf32>
    %136 = math.tanh %135 : vector<2x64xf32>
    %137 = arith.mulf %132, %136 : vector<2x64xf32>
    %138 = vector.broadcast %88 : i32 to vector<2x1xi32>
    %139 = arith.cmpi slt, %138, %3 : vector<2x1xi32>
    %140 = vector.shape_cast %139 : vector<2x1xi1> to vector<2x1xi1>
    %141 = vector.broadcast %140 : vector<2x1xi1> to vector<2x64xi1>
    %142 = arith.select %141, %137, %71 : vector<2x64xi1>, vector<2x64xf32>
    %143 = vector.shape_cast %139 : vector<2x1xi1> to vector<2x1xi1>
    %144 = vector.broadcast %143 : vector<2x1xi1> to vector<2x64xi1>
    %145 = arith.select %144, %135, %74 : vector<2x64xi1>, vector<2x64xf32>
    %cst_90 = arith.constant 0.000000e+00 : f32
    %146 = vector.shape_cast %139 : vector<2x1xi1> to vector<2x1xi1>
    %147 = vector.broadcast %146 : vector<2x1xi1> to vector<2x64xi1>
    %148 = vector.broadcast %cst_90 : f32 to vector<2x64xf32>
    %149 = arith.select %147, %137, %148 : vector<2x64xi1>, vector<2x64xf32>
    %c0_91 = arith.constant 0 : index
    %150 = arith.index_cast %87 : i32 to index
    %c0_92 = arith.constant 0 : index
    %c0_93 = arith.constant 0 : index
    %151 = vector.load %arg5[%c0_91, %150, %c0_92, %c0_93] : memref<1x4x2x64xf32, #tpu.memory_space<vmem>>, vector<1x1x2x64xf32>
    %152 = vector.shape_cast %151 : vector<1x1x2x64xf32> to vector<2x64xf32>
    %153 = vector.shape_cast %149 : vector<2x64xf32> to vector<1x1x2x64xf32>
    tpu.vector_store %arg5[%c0_91, %150, %c0_92, %c0_93], %153 {strides = array<i32>} : memref<1x4x2x64xf32, #tpu.memory_space<vmem>>, vector<1x1x2x64xf32>,
    %c2_i32 = arith.constant 2 : i32
    %c1_i32_94 = arith.constant 1 : i32
    %154 = arith.subi %c1_i32_94, %arg0 : i32
    %155 = arith.muli %154, %c2_i32 : i32
    %c3_i32_95 = arith.constant 3 : i32
    %156 = arith.subi %c3_i32_95, %c2_i32 : i32
    %157 = arith.muli %arg0, %156 : i32
    %158 = arith.addi %155, %157 : i32
    %159 = arith.addi %9, %158 : i32
    %c0_96 = arith.constant 0 : index
    %c0_97 = arith.constant 0 : index
    %160 = arith.index_cast %158 : i32 to index
    %c0_98 = arith.constant 0 : index
    %c0_99 = arith.constant 0 : index
    %161 = vector.load %arg3[%c0_96, %c0_97, %160, %c0_98, %c0_99] : memref<1x4x4x2x64xf32, #tpu.memory_space<vmem>>, vector<1x1x1x2x64xf32>
    %162 = vector.shape_cast %161 : vector<1x1x1x2x64xf32> to vector<2x64xf32>
    %c0_100 = arith.constant 0 : index
    %c0_101 = arith.constant 0 : index
    %c0_102 = arith.constant 0 : index
    %c0_103 = arith.constant 0 : index
    %163 = vector.load %arg4[%c0_100, %c0_101, %c0_102, %c0_103] : memref<1x4x64x64xf32, #tpu.memory_space<vmem>>, vector<1x1x64x64xf32>
    %164 = vector.shape_cast %163 : vector<1x1x64x64xf32> to vector<64x64xf32>
    %cst_104 = arith.constant dense<0.000000e+00> : vector<2x64xf32>
    %165 = tpu.matmul %142, %164, %cst_104 {dimension_numbers = #tpu.dot_dimension_numbers<[1], [0], [0], [1], [0, 0, 1, 1], [], []>} : vector<2x64xf32>, vector<64x64xf32>, vector<2x64xf32> -> vector<2x64xf32>
    %166 = arith.addf %162, %165 : vector<2x64xf32>
    %c0_105 = arith.constant 0 : index
    %c1_106 = arith.constant 1 : index
    %167 = arith.index_cast %158 : i32 to index
    %c0_107 = arith.constant 0 : index
    %c0_108 = arith.constant 0 : index
    %168 = vector.load %arg3[%c0_105, %c1_106, %167, %c0_107, %c0_108] : memref<1x4x4x2x64xf32, #tpu.memory_space<vmem>>, vector<1x1x1x2x64xf32>
    %169 = vector.shape_cast %168 : vector<1x1x1x2x64xf32> to vector<2x64xf32>
    %c0_109 = arith.constant 0 : index
    %c1_110 = arith.constant 1 : index
    %c0_111 = arith.constant 0 : index
    %c0_112 = arith.constant 0 : index
    %170 = vector.load %arg4[%c0_109, %c1_110, %c0_111, %c0_112] : memref<1x4x64x64xf32, #tpu.memory_space<vmem>>, vector<1x1x64x64xf32>
    %171 = vector.shape_cast %170 : vector<1x1x64x64xf32> to vector<64x64xf32>
    %cst_113 = arith.constant dense<0.000000e+00> : vector<2x64xf32>
    %172 = tpu.matmul %142, %171, %cst_113 {dimension_numbers = #tpu.dot_dimension_numbers<[1], [0], [0], [1], [0, 0, 1, 1], [], []>} : vector<2x64xf32>, vector<64x64xf32>, vector<2x64xf32> -> vector<2x64xf32>
    %173 = arith.addf %169, %172 : vector<2x64xf32>
    %c0_114 = arith.constant 0 : index
    %c2_115 = arith.constant 2 : index
    %174 = arith.index_cast %158 : i32 to index
    %c0_116 = arith.constant 0 : index
    %c0_117 = arith.constant 0 : index
    %175 = vector.load %arg3[%c0_114, %c2_115, %174, %c0_116, %c0_117] : memref<1x4x4x2x64xf32, #tpu.memory_space<vmem>>, vector<1x1x1x2x64xf32>
    %176 = vector.shape_cast %175 : vector<1x1x1x2x64xf32> to vector<2x64xf32>
    %c0_118 = arith.constant 0 : index
    %c2_119 = arith.constant 2 : index
    %c0_120 = arith.constant 0 : index
    %c0_121 = arith.constant 0 : index
    %177 = vector.load %arg4[%c0_118, %c2_119, %c0_120, %c0_121] : memref<1x4x64x64xf32, #tpu.memory_space<vmem>>, vector<1x1x64x64xf32>
    %178 = vector.shape_cast %177 : vector<1x1x64x64xf32> to vector<64x64xf32>
    %cst_122 = arith.constant dense<0.000000e+00> : vector<2x64xf32>
    %179 = tpu.matmul %142, %178, %cst_122 {dimension_numbers = #tpu.dot_dimension_numbers<[1], [0], [0], [1], [0, 0, 1, 1], [], []>} : vector<2x64xf32>, vector<64x64xf32>, vector<2x64xf32> -> vector<2x64xf32>
    %180 = arith.addf %176, %179 : vector<2x64xf32>
    %c0_123 = arith.constant 0 : index
    %c3_124 = arith.constant 3 : index
    %181 = arith.index_cast %158 : i32 to index
    %c0_125 = arith.constant 0 : index
    %c0_126 = arith.constant 0 : index
    %182 = vector.load %arg3[%c0_123, %c3_124, %181, %c0_125, %c0_126] : memref<1x4x4x2x64xf32, #tpu.memory_space<vmem>>, vector<1x1x1x2x64xf32>
    %183 = vector.shape_cast %182 : vector<1x1x1x2x64xf32> to vector<2x64xf32>
    %c0_127 = arith.constant 0 : index
    %c3_128 = arith.constant 3 : index
    %c0_129 = arith.constant 0 : index
    %c0_130 = arith.constant 0 : index
    %184 = vector.load %arg4[%c0_127, %c3_128, %c0_129, %c0_130] : memref<1x4x64x64xf32, #tpu.memory_space<vmem>>, vector<1x1x64x64xf32>
    %185 = vector.shape_cast %184 : vector<1x1x64x64xf32> to vector<64x64xf32>
    %cst_131 = arith.constant dense<0.000000e+00> : vector<2x64xf32>
    %186 = tpu.matmul %142, %185, %cst_131 {dimension_numbers = #tpu.dot_dimension_numbers<[1], [0], [0], [1], [0, 0, 1, 1], [], []>} : vector<2x64xf32>, vector<64x64xf32>, vector<2x64xf32> -> vector<2x64xf32>
    %187 = arith.addf %183, %186 : vector<2x64xf32>
    %188 = arith.negf %166 : vector<2x64xf32>
    %189 = math.exp %188 : vector<2x64xf32>
    %cst_132 = arith.constant 1.000000e+00 : f32
    %190 = vector.broadcast %cst_132 : f32 to vector<2x64xf32>
    %191 = arith.addf %190, %189 : vector<2x64xf32>
    %192 = arith.divf %190, %191 : vector<2x64xf32>
    %193 = arith.negf %173 : vector<2x64xf32>
    %194 = math.exp %193 : vector<2x64xf32>
    %cst_133 = arith.constant 1.000000e+00 : f32
    %195 = vector.broadcast %cst_133 : f32 to vector<2x64xf32>
    %196 = arith.addf %195, %194 : vector<2x64xf32>
    %197 = arith.divf %195, %196 : vector<2x64xf32>
    %198 = math.tanh %180 : vector<2x64xf32>
    %199 = arith.negf %187 : vector<2x64xf32>
    %200 = math.exp %199 : vector<2x64xf32>
    %cst_134 = arith.constant 1.000000e+00 : f32
    %201 = vector.broadcast %cst_134 : f32 to vector<2x64xf32>
    %202 = arith.addf %201, %200 : vector<2x64xf32>
    %203 = arith.divf %201, %202 : vector<2x64xf32>
    %204 = arith.mulf %197, %145 : vector<2x64xf32>
    %205 = arith.mulf %192, %198 : vector<2x64xf32>
    %206 = arith.addf %204, %205 : vector<2x64xf32>
    %207 = math.tanh %206 : vector<2x64xf32>
    %208 = arith.mulf %203, %207 : vector<2x64xf32>
    %209 = vector.broadcast %159 : i32 to vector<2x1xi32>
    %210 = arith.cmpi slt, %209, %3 : vector<2x1xi32>
    %211 = vector.shape_cast %210 : vector<2x1xi1> to vector<2x1xi1>
    %212 = vector.broadcast %211 : vector<2x1xi1> to vector<2x64xi1>
    %213 = arith.select %212, %208, %142 : vector<2x64xi1>, vector<2x64xf32>
    %214 = vector.shape_cast %210 : vector<2x1xi1> to vector<2x1xi1>
    %215 = vector.broadcast %214 : vector<2x1xi1> to vector<2x64xi1>
    %216 = arith.select %215, %206, %145 : vector<2x64xi1>, vector<2x64xf32>
    %cst_135 = arith.constant 0.000000e+00 : f32
    %217 = vector.shape_cast %210 : vector<2x1xi1> to vector<2x1xi1>
    %218 = vector.broadcast %217 : vector<2x1xi1> to vector<2x64xi1>
    %219 = vector.broadcast %cst_135 : f32 to vector<2x64xf32>
    %220 = arith.select %218, %208, %219 : vector<2x64xi1>, vector<2x64xf32>
    %c0_136 = arith.constant 0 : index
    %221 = arith.index_cast %158 : i32 to index
    %c0_137 = arith.constant 0 : index
    %c0_138 = arith.constant 0 : index
    %222 = vector.load %arg5[%c0_136, %221, %c0_137, %c0_138] : memref<1x4x2x64xf32, #tpu.memory_space<vmem>>, vector<1x1x2x64xf32>
    %223 = vector.shape_cast %222 : vector<1x1x2x64xf32> to vector<2x64xf32>
    %224 = vector.shape_cast %220 : vector<2x64xf32> to vector<1x1x2x64xf32>
    tpu.vector_store %arg5[%c0_136, %221, %c0_137, %c0_138], %224 {strides = array<i32>} : memref<1x4x2x64xf32, #tpu.memory_space<vmem>>, vector<1x1x2x64xf32>,
    %c3_i32_139 = arith.constant 3 : i32
    %c1_i32_140 = arith.constant 1 : i32
    %225 = arith.subi %c1_i32_140, %arg0 : i32
    %226 = arith.muli %225, %c3_i32_139 : i32
    %c3_i32_141 = arith.constant 3 : i32
    %227 = arith.subi %c3_i32_141, %c3_i32_139 : i32
    %228 = arith.muli %arg0, %227 : i32
    %229 = arith.addi %226, %228 : i32
    %230 = arith.addi %9, %229 : i32
    %c0_142 = arith.constant 0 : index
    %c0_143 = arith.constant 0 : index
    %231 = arith.index_cast %229 : i32 to index
    %c0_144 = arith.constant 0 : index
    %c0_145 = arith.constant 0 : index
    %232 = vector.load %arg3[%c0_142, %c0_143, %231, %c0_144, %c0_145] : memref<1x4x4x2x64xf32, #tpu.memory_space<vmem>>, vector<1x1x1x2x64xf32>
    %233 = vector.shape_cast %232 : vector<1x1x1x2x64xf32> to vector<2x64xf32>
    %c0_146 = arith.constant 0 : index
    %c0_147 = arith.constant 0 : index
    %c0_148 = arith.constant 0 : index
    %c0_149 = arith.constant 0 : index
    %234 = vector.load %arg4[%c0_146, %c0_147, %c0_148, %c0_149] : memref<1x4x64x64xf32, #tpu.memory_space<vmem>>, vector<1x1x64x64xf32>
    %235 = vector.shape_cast %234 : vector<1x1x64x64xf32> to vector<64x64xf32>
    %cst_150 = arith.constant dense<0.000000e+00> : vector<2x64xf32>
    %236 = tpu.matmul %213, %235, %cst_150 {dimension_numbers = #tpu.dot_dimension_numbers<[1], [0], [0], [1], [0, 0, 1, 1], [], []>} : vector<2x64xf32>, vector<64x64xf32>, vector<2x64xf32> -> vector<2x64xf32>
    %237 = arith.addf %233, %236 : vector<2x64xf32>
    %c0_151 = arith.constant 0 : index
    %c1_152 = arith.constant 1 : index
    %238 = arith.index_cast %229 : i32 to index
    %c0_153 = arith.constant 0 : index
    %c0_154 = arith.constant 0 : index
    %239 = vector.load %arg3[%c0_151, %c1_152, %238, %c0_153, %c0_154] : memref<1x4x4x2x64xf32, #tpu.memory_space<vmem>>, vector<1x1x1x2x64xf32>
    %240 = vector.shape_cast %239 : vector<1x1x1x2x64xf32> to vector<2x64xf32>
    %c0_155 = arith.constant 0 : index
    %c1_156 = arith.constant 1 : index
    %c0_157 = arith.constant 0 : index
    %c0_158 = arith.constant 0 : index
    %241 = vector.load %arg4[%c0_155, %c1_156, %c0_157, %c0_158] : memref<1x4x64x64xf32, #tpu.memory_space<vmem>>, vector<1x1x64x64xf32>
    %242 = vector.shape_cast %241 : vector<1x1x64x64xf32> to vector<64x64xf32>
    %cst_159 = arith.constant dense<0.000000e+00> : vector<2x64xf32>
    %243 = tpu.matmul %213, %242, %cst_159 {dimension_numbers = #tpu.dot_dimension_numbers<[1], [0], [0], [1], [0, 0, 1, 1], [], []>} : vector<2x64xf32>, vector<64x64xf32>, vector<2x64xf32> -> vector<2x64xf32>
    %244 = arith.addf %240, %243 : vector<2x64xf32>
    %c0_160 = arith.constant 0 : index
    %c2_161 = arith.constant 2 : index
    %245 = arith.index_cast %229 : i32 to index
    %c0_162 = arith.constant 0 : index
    %c0_163 = arith.constant 0 : index
    %246 = vector.load %arg3[%c0_160, %c2_161, %245, %c0_162, %c0_163] : memref<1x4x4x2x64xf32, #tpu.memory_space<vmem>>, vector<1x1x1x2x64xf32>
    %247 = vector.shape_cast %246 : vector<1x1x1x2x64xf32> to vector<2x64xf32>
    %c0_164 = arith.constant 0 : index
    %c2_165 = arith.constant 2 : index
    %c0_166 = arith.constant 0 : index
    %c0_167 = arith.constant 0 : index
    %248 = vector.load %arg4[%c0_164, %c2_165, %c0_166, %c0_167] : memref<1x4x64x64xf32, #tpu.memory_space<vmem>>, vector<1x1x64x64xf32>
    %249 = vector.shape_cast %248 : vector<1x1x64x64xf32> to vector<64x64xf32>
    %cst_168 = arith.constant dense<0.000000e+00> : vector<2x64xf32>
    %250 = tpu.matmul %213, %249, %cst_168 {dimension_numbers = #tpu.dot_dimension_numbers<[1], [0], [0], [1], [0, 0, 1, 1], [], []>} : vector<2x64xf32>, vector<64x64xf32>, vector<2x64xf32> -> vector<2x64xf32>
    %251 = arith.addf %247, %250 : vector<2x64xf32>
    %c0_169 = arith.constant 0 : index
    %c3_170 = arith.constant 3 : index
    %252 = arith.index_cast %229 : i32 to index
    %c0_171 = arith.constant 0 : index
    %c0_172 = arith.constant 0 : index
    %253 = vector.load %arg3[%c0_169, %c3_170, %252, %c0_171, %c0_172] : memref<1x4x4x2x64xf32, #tpu.memory_space<vmem>>, vector<1x1x1x2x64xf32>
    %254 = vector.shape_cast %253 : vector<1x1x1x2x64xf32> to vector<2x64xf32>
    %c0_173 = arith.constant 0 : index
    %c3_174 = arith.constant 3 : index
    %c0_175 = arith.constant 0 : index
    %c0_176 = arith.constant 0 : index
    %255 = vector.load %arg4[%c0_173, %c3_174, %c0_175, %c0_176] : memref<1x4x64x64xf32, #tpu.memory_space<vmem>>, vector<1x1x64x64xf32>
    %256 = vector.shape_cast %255 : vector<1x1x64x64xf32> to vector<64x64xf32>
    %cst_177 = arith.constant dense<0.000000e+00> : vector<2x64xf32>
    %257 = tpu.matmul %213, %256, %cst_177 {dimension_numbers = #tpu.dot_dimension_numbers<[1], [0], [0], [1], [0, 0, 1, 1], [], []>} : vector<2x64xf32>, vector<64x64xf32>, vector<2x64xf32> -> vector<2x64xf32>
    %258 = arith.addf %254, %257 : vector<2x64xf32>
    %259 = arith.negf %237 : vector<2x64xf32>
    %260 = math.exp %259 : vector<2x64xf32>
    %cst_178 = arith.constant 1.000000e+00 : f32
    %261 = vector.broadcast %cst_178 : f32 to vector<2x64xf32>
    %262 = arith.addf %261, %260 : vector<2x64xf32>
    %263 = arith.divf %261, %262 : vector<2x64xf32>
    %264 = arith.negf %244 : vector<2x64xf32>
    %265 = math.exp %264 : vector<2x64xf32>
    %cst_179 = arith.constant 1.000000e+00 : f32
    %266 = vector.broadcast %cst_179 : f32 to vector<2x64xf32>
    %267 = arith.addf %266, %265 : vector<2x64xf32>
    %268 = arith.divf %266, %267 : vector<2x64xf32>
    %269 = math.tanh %251 : vector<2x64xf32>
    %270 = arith.negf %258 : vector<2x64xf32>
    %271 = math.exp %270 : vector<2x64xf32>
    %cst_180 = arith.constant 1.000000e+00 : f32
    %272 = vector.broadcast %cst_180 : f32 to vector<2x64xf32>
    %273 = arith.addf %272, %271 : vector<2x64xf32>
    %274 = arith.divf %272, %273 : vector<2x64xf32>
    %275 = arith.mulf %268, %216 : vector<2x64xf32>
    %276 = arith.mulf %263, %269 : vector<2x64xf32>
    %277 = arith.addf %275, %276 : vector<2x64xf32>
    %278 = math.tanh %277 : vector<2x64xf32>
    %279 = arith.mulf %274, %278 : vector<2x64xf32>
    %280 = vector.broadcast %230 : i32 to vector<2x1xi32>
    %281 = arith.cmpi slt, %280, %3 : vector<2x1xi32>
    %282 = vector.shape_cast %281 : vector<2x1xi1> to vector<2x1xi1>
    %283 = vector.broadcast %282 : vector<2x1xi1> to vector<2x64xi1>
    %284 = arith.select %283, %279, %213 : vector<2x64xi1>, vector<2x64xf32>
    %285 = vector.shape_cast %281 : vector<2x1xi1> to vector<2x1xi1>
    %286 = vector.broadcast %285 : vector<2x1xi1> to vector<2x64xi1>
    %287 = arith.select %286, %277, %216 : vector<2x64xi1>, vector<2x64xf32>
    %cst_181 = arith.constant 0.000000e+00 : f32
    %288 = vector.shape_cast %281 : vector<2x1xi1> to vector<2x1xi1>
    %289 = vector.broadcast %288 : vector<2x1xi1> to vector<2x64xi1>
    %290 = vector.broadcast %cst_181 : f32 to vector<2x64xf32>
    %291 = arith.select %289, %279, %290 : vector<2x64xi1>, vector<2x64xf32>
    %c0_182 = arith.constant 0 : index
    %292 = arith.index_cast %229 : i32 to index
    %c0_183 = arith.constant 0 : index
    %c0_184 = arith.constant 0 : index
    %293 = vector.load %arg5[%c0_182, %292, %c0_183, %c0_184] : memref<1x4x2x64xf32, #tpu.memory_space<vmem>>, vector<1x1x2x64xf32>
    %294 = vector.shape_cast %293 : vector<1x1x2x64xf32> to vector<2x64xf32>
    %295 = vector.shape_cast %291 : vector<2x64xf32> to vector<1x1x2x64xf32>
    tpu.vector_store %arg5[%c0_182, %292, %c0_183, %c0_184], %295 {strides = array<i32>} : memref<1x4x2x64xf32, #tpu.memory_space<vmem>>, vector<1x1x2x64xf32>,
    %c4_i32_185 = arith.constant 4 : i32
    %c0_186 = arith.constant 0 : index
    %c0_187 = arith.constant 0 : index
    %296 = vector.load %arg6[%c0_186, %c0_187] : memref<2x64xf32, #tpu.memory_space<vmem>>, vector<2x64xf32>
    tpu.vector_store %arg6[%c0_186, %c0_187], %284 {strides = array<i32>} : memref<2x64xf32, #tpu.memory_space<vmem>>, vector<2x64xf32>,
    %c0_188 = arith.constant 0 : index
    %c0_189 = arith.constant 0 : index
    %297 = vector.load %arg7[%c0_188, %c0_189] : memref<2x64xf32, #tpu.memory_space<vmem>>, vector<2x64xf32>
    tpu.vector_store %arg7[%c0_188, %c0_189], %287 {strides = array<i32>} : memref<2x64xf32, #tpu.memory_space<vmem>>, vector<2x64xf32>,
    return
  }
  func.func @transform_0(%arg0: i32, %arg1: i32) -> (i32, i32) {
    %c0_i32 = arith.constant 0 : i32
    %c0_i32_0 = arith.constant 0 : i32
    %c0_i32_1 = arith.constant 0 : i32
    return %c0_i32, %c0_i32_0 : i32, i32
  }
  func.func @transform_1(%arg0: i32, %arg1: i32) -> (i32, i32, i32, i32, i32) {
    %c1_i32 = arith.constant 1 : i32
    %0 = arith.subi %c1_i32, %arg0 : i32
    %1 = arith.muli %0, %arg1 : i32
    %c1_i32_0 = arith.constant 1 : i32
    %2 = arith.subi %c1_i32_0, %arg1 : i32
    %3 = arith.muli %arg0, %2 : i32
    %4 = arith.addi %1, %3 : i32
    %c0_i32 = arith.constant 0 : i32
    %c0_i32_1 = arith.constant 0 : i32
    %c0_i32_2 = arith.constant 0 : i32
    %c0_i32_3 = arith.constant 0 : i32
    return %arg0, %c0_i32, %4, %c0_i32_1, %c0_i32_2 : i32, i32, i32, i32, i32
  }
  func.func @transform_2(%arg0: i32, %arg1: i32) -> (i32, i32, i32, i32) {
    %c0_i32 = arith.constant 0 : i32
    %c0_i32_0 = arith.constant 0 : i32
    %c0_i32_1 = arith.constant 0 : i32
    %c0_i32_2 = arith.constant 0 : i32
    return %arg0, %c0_i32, %c0_i32_0, %c0_i32_1 : i32, i32, i32, i32
  }
  func.func @transform_3(%arg0: i32, %arg1: i32) -> (i32, i32, i32, i32) {
    %c1_i32 = arith.constant 1 : i32
    %0 = arith.subi %c1_i32, %arg0 : i32
    %1 = arith.muli %0, %arg1 : i32
    %c1_i32_0 = arith.constant 1 : i32
    %2 = arith.subi %c1_i32_0, %arg1 : i32
    %3 = arith.muli %arg0, %2 : i32
    %4 = arith.addi %1, %3 : i32
    %c0_i32 = arith.constant 0 : i32
    %c0_i32_1 = arith.constant 0 : i32
    %c0_i32_2 = arith.constant 0 : i32
    return %arg0, %4, %c0_i32, %c0_i32_1 : i32, i32, i32, i32
  }
}

module attributes {stable_mosaic.version = 11 : i64} {
  func.func @proj2_kernel(%arg0: i32, %arg1: i32, %arg2: memref<16x64xf32, #tpu.memory_space<vmem>>, %arg3: memref<16x64xf32, #tpu.memory_space<vmem>>, %arg4: memref<1x64x256xf32, #tpu.memory_space<vmem>>, %arg5: memref<1x64x256xf32, #tpu.memory_space<vmem>>, %arg6: memref<1x1x256xf32, #tpu.memory_space<vmem>>, %arg7: memref<1x4x16x64xf32, #tpu.memory_space<vmem>>) attributes {dimension_semantics = [#tpu.dimension_semantics<parallel>, #tpu.dimension_semantics<parallel>], iteration_bounds = array<i64: 2, 1>, scalar_prefetch = 0 : i64, scratch_operands = 0 : i64, tpu.core_type = #tpu.core_type<tc>, window_params = [{transform_indices = @transform_0, window_bounds = array<i64: 16, 64>}, {transform_indices = @transform_1, window_bounds = array<i64: 16, 64>}, {transform_indices = @transform_2, window_bounds = array<i64: 1, 64, 256>}, {transform_indices = @transform_3, window_bounds = array<i64: 1, 64, 256>}, {transform_indices = @transform_4, window_bounds = array<i64: 1, 1, 256>}, {transform_indices = @transform_5, window_bounds = array<i64: 1, 4, 16, 64>}]} {
    %c0 = arith.constant 0 : index
    %c0_0 = arith.constant 0 : index
    %0 = vector.load %arg2[%c0, %c0_0] : memref<16x64xf32, #tpu.memory_space<vmem>>, vector<16x64xf32>
    %c0_1 = arith.constant 0 : index
    %c0_2 = arith.constant 0 : index
    %c0_3 = arith.constant 0 : index
    %1 = vector.load %arg4[%c0_1, %c0_2, %c0_3] : memref<1x64x256xf32, #tpu.memory_space<vmem>>, vector<1x64x256xf32>
    %2 = vector.shape_cast %1 : vector<1x64x256xf32> to vector<64x256xf32>
    %cst = arith.constant dense<0.000000e+00> : vector<16x256xf32>
    %3 = tpu.matmul %0, %2, %cst {dimension_numbers = #tpu.dot_dimension_numbers<[1], [0], [0], [1], [0, 0, 1, 1], [], []>} : vector<16x64xf32>, vector<64x256xf32>, vector<16x256xf32> -> vector<16x256xf32>
    %c0_4 = arith.constant 0 : index
    %c0_5 = arith.constant 0 : index
    %4 = vector.load %arg3[%c0_4, %c0_5] : memref<16x64xf32, #tpu.memory_space<vmem>>, vector<16x64xf32>
    %c0_6 = arith.constant 0 : index
    %c0_7 = arith.constant 0 : index
    %c0_8 = arith.constant 0 : index
    %5 = vector.load %arg5[%c0_6, %c0_7, %c0_8] : memref<1x64x256xf32, #tpu.memory_space<vmem>>, vector<1x64x256xf32>
    %6 = vector.shape_cast %5 : vector<1x64x256xf32> to vector<64x256xf32>
    %cst_9 = arith.constant dense<0.000000e+00> : vector<16x256xf32>
    %7 = tpu.matmul %4, %6, %cst_9 {dimension_numbers = #tpu.dot_dimension_numbers<[1], [0], [0], [1], [0, 0, 1, 1], [], []>} : vector<16x64xf32>, vector<64x256xf32>, vector<16x256xf32> -> vector<16x256xf32>
    %8 = arith.addf %3, %7 : vector<16x256xf32>
    %c0_10 = arith.constant 0 : index
    %c0_11 = arith.constant 0 : index
    %c0_12 = arith.constant 0 : index
    %9 = vector.load %arg6[%c0_10, %c0_11, %c0_12] : memref<1x1x256xf32, #tpu.memory_space<vmem>>, vector<1x1x256xf32>
    %10 = vector.shape_cast %9 : vector<1x1x256xf32> to vector<1x256xf32>
    %11 = vector.broadcast %10 : vector<1x256xf32> to vector<16x256xf32>
    %12 = arith.addf %8, %11 : vector<16x256xf32>
    %13 = vector.extract_strided_slice %12 {offsets = [0, 0], sizes = [16, 64], strides = [1, 1]} : vector<16x256xf32> to vector<16x64xf32>
    %c0_13 = arith.constant 0 : index
    %c0_14 = arith.constant 0 : index
    %c0_15 = arith.constant 0 : index
    %c0_16 = arith.constant 0 : index
    %14 = vector.load %arg7[%c0_13, %c0_14, %c0_15, %c0_16] : memref<1x4x16x64xf32, #tpu.memory_space<vmem>>, vector<1x1x16x64xf32>
    %15 = vector.shape_cast %14 : vector<1x1x16x64xf32> to vector<16x64xf32>
    %16 = vector.shape_cast %13 : vector<16x64xf32> to vector<1x1x16x64xf32>
    tpu.vector_store %arg7[%c0_13, %c0_14, %c0_15, %c0_16], %16 {strides = array<i32>} : memref<1x4x16x64xf32, #tpu.memory_space<vmem>>, vector<1x1x16x64xf32>,
    %17 = vector.extract_strided_slice %12 {offsets = [0, 64], sizes = [16, 64], strides = [1, 1]} : vector<16x256xf32> to vector<16x64xf32>
    %c0_17 = arith.constant 0 : index
    %c1 = arith.constant 1 : index
    %c0_18 = arith.constant 0 : index
    %c0_19 = arith.constant 0 : index
    %18 = vector.load %arg7[%c0_17, %c1, %c0_18, %c0_19] : memref<1x4x16x64xf32, #tpu.memory_space<vmem>>, vector<1x1x16x64xf32>
    %19 = vector.shape_cast %18 : vector<1x1x16x64xf32> to vector<16x64xf32>
    %20 = vector.shape_cast %17 : vector<16x64xf32> to vector<1x1x16x64xf32>
    tpu.vector_store %arg7[%c0_17, %c1, %c0_18, %c0_19], %20 {strides = array<i32>} : memref<1x4x16x64xf32, #tpu.memory_space<vmem>>, vector<1x1x16x64xf32>,
    %21 = vector.extract_strided_slice %12 {offsets = [0, 128], sizes = [16, 64], strides = [1, 1]} : vector<16x256xf32> to vector<16x64xf32>
    %c0_20 = arith.constant 0 : index
    %c2 = arith.constant 2 : index
    %c0_21 = arith.constant 0 : index
    %c0_22 = arith.constant 0 : index
    %22 = vector.load %arg7[%c0_20, %c2, %c0_21, %c0_22] : memref<1x4x16x64xf32, #tpu.memory_space<vmem>>, vector<1x1x16x64xf32>
    %23 = vector.shape_cast %22 : vector<1x1x16x64xf32> to vector<16x64xf32>
    %24 = vector.shape_cast %21 : vector<16x64xf32> to vector<1x1x16x64xf32>
    tpu.vector_store %arg7[%c0_20, %c2, %c0_21, %c0_22], %24 {strides = array<i32>} : memref<1x4x16x64xf32, #tpu.memory_space<vmem>>, vector<1x1x16x64xf32>,
    %25 = vector.extract_strided_slice %12 {offsets = [0, 192], sizes = [16, 64], strides = [1, 1]} : vector<16x256xf32> to vector<16x64xf32>
    %c0_23 = arith.constant 0 : index
    %c3 = arith.constant 3 : index
    %c0_24 = arith.constant 0 : index
    %c0_25 = arith.constant 0 : index
    %26 = vector.load %arg7[%c0_23, %c3, %c0_24, %c0_25] : memref<1x4x16x64xf32, #tpu.memory_space<vmem>>, vector<1x1x16x64xf32>
    %27 = vector.shape_cast %26 : vector<1x1x16x64xf32> to vector<16x64xf32>
    %28 = vector.shape_cast %25 : vector<16x64xf32> to vector<1x1x16x64xf32>
    tpu.vector_store %arg7[%c0_23, %c3, %c0_24, %c0_25], %28 {strides = array<i32>} : memref<1x4x16x64xf32, #tpu.memory_space<vmem>>, vector<1x1x16x64xf32>,
    return
  }
  func.func @transform_0(%arg0: i32, %arg1: i32) -> (i32, i32) {
    %c0_i32 = arith.constant 0 : i32
    %c0_i32_0 = arith.constant 0 : i32
    return %arg1, %c0_i32 : i32, i32
  }
  func.func @transform_1(%arg0: i32, %arg1: i32) -> (i32, i32) {
    %c0_i32 = arith.constant 0 : i32
    %c0_i32_0 = arith.constant 0 : i32
    return %arg1, %c0_i32 : i32, i32
  }
  func.func @transform_2(%arg0: i32, %arg1: i32) -> (i32, i32, i32) {
    %c0_i32 = arith.constant 0 : i32
    %c0_i32_0 = arith.constant 0 : i32
    %c0_i32_1 = arith.constant 0 : i32
    return %arg0, %c0_i32, %c0_i32_0 : i32, i32, i32
  }
  func.func @transform_3(%arg0: i32, %arg1: i32) -> (i32, i32, i32) {
    %c0_i32 = arith.constant 0 : i32
    %c0_i32_0 = arith.constant 0 : i32
    %c0_i32_1 = arith.constant 0 : i32
    return %arg0, %c0_i32, %c0_i32_0 : i32, i32, i32
  }
  func.func @transform_4(%arg0: i32, %arg1: i32) -> (i32, i32, i32) {
    %c0_i32 = arith.constant 0 : i32
    %c0_i32_0 = arith.constant 0 : i32
    %c0_i32_1 = arith.constant 0 : i32
    return %arg0, %c0_i32, %c0_i32_0 : i32, i32, i32
  }
  func.func @transform_5(%arg0: i32, %arg1: i32) -> (i32, i32, i32, i32) {
    %c0_i32 = arith.constant 0 : i32
    %c0_i32_0 = arith.constant 0 : i32
    %c0_i32_1 = arith.constant 0 : i32
    return %arg0, %c0_i32, %arg1, %c0_i32_0 : i32, i32, i32, i32
  }
}

module attributes {stable_mosaic.version = 11 : i64} {
  func.func @lstm_kernel(%arg0: i32, %arg1: i32, %arg2: memref<2x1xi32, #tpu.memory_space<vmem>>, %arg3: memref<1x4x4x2x64xf32, #tpu.memory_space<vmem>>, %arg4: memref<1x4x64x64xf32, #tpu.memory_space<vmem>>, %arg5: memref<1x4x2x64xf32, #tpu.memory_space<vmem>>, %arg6: memref<2x64xf32, #tpu.memory_space<vmem>>, %arg7: memref<2x64xf32, #tpu.memory_space<vmem>>) attributes {dimension_semantics = [#tpu.dimension_semantics<parallel>, #tpu.dimension_semantics<arbitrary>], iteration_bounds = array<i64: 2, 2>, scalar_prefetch = 0 : i64, scratch_operands = 2 : i64, tpu.core_type = #tpu.core_type<tc>, window_params = [{pipeline_mode = #tpu.pipeline_mode<synchronous>, transform_indices = @transform_0, window_bounds = array<i64: 2, 1>}, {transform_indices = @transform_1, window_bounds = array<i64: 1, 4, 4, 2, 64>}, {transform_indices = @transform_2, window_bounds = array<i64: 1, 4, 64, 64>}, {transform_indices = @transform_3, window_bounds = array<i64: 1, 4, 2, 64>}]} {
    %c0_i32 = arith.constant 0 : i32
    %0 = arith.cmpi eq, %arg1, %c0_i32 : i32
    %1 = arith.extui %0 : i1 to i32
    %c0_i32_0 = arith.constant 0 : i32
    %2 = arith.cmpi ne, %1, %c0_i32_0 : i32
    scf.if %2 {
      %cst_190 = arith.constant 0.000000e+00 : f32
      %298 = vector.broadcast %cst_190 : f32 to vector<2x64xf32>
      %c0_191 = arith.constant 0 : index
      %c0_192 = arith.constant 0 : index
      %299 = vector.load %arg6[%c0_191, %c0_192] : memref<2x64xf32, #tpu.memory_space<vmem>>, vector<2x64xf32>
      tpu.vector_store %arg6[%c0_191, %c0_192], %298 {strides = array<i32>} : memref<2x64xf32, #tpu.memory_space<vmem>>, vector<2x64xf32>,
      %cst_193 = arith.constant 0.000000e+00 : f32
      %300 = vector.broadcast %cst_193 : f32 to vector<2x64xf32>
      %c0_194 = arith.constant 0 : index
      %c0_195 = arith.constant 0 : index
      %301 = vector.load %arg7[%c0_194, %c0_195] : memref<2x64xf32, #tpu.memory_space<vmem>>, vector<2x64xf32>
      tpu.vector_store %arg7[%c0_194, %c0_195], %300 {strides = array<i32>} : memref<2x64xf32, #tpu.memory_space<vmem>>, vector<2x64xf32>,
    } else {
    }
    %c0 = arith.constant 0 : index
    %c0_1 = arith.constant 0 : index
    %3 = vector.load %arg2[%c0, %c0_1] : memref<2x1xi32, #tpu.memory_space<vmem>>, vector<2x1xi32>
    %c1_i32 = arith.constant 1 : i32
    %4 = arith.subi %c1_i32, %arg0 : i32
    %5 = arith.muli %4, %arg1 : i32
    %c1_i32_2 = arith.constant 1 : i32
    %6 = arith.subi %c1_i32_2, %arg1 : i32
    %7 = arith.muli %arg0, %6 : i32
    %8 = arith.addi %5, %7 : i32
    %c4_i32 = arith.constant 4 : i32
    %9 = arith.muli %8, %c4_i32 : i32
    %c0_3 = arith.constant 0 : index
    %c0_4 = arith.constant 0 : index
    %10 = vector.load %arg6[%c0_3, %c0_4] : memref<2x64xf32, #tpu.memory_space<vmem>>, vector<2x64xf32>
    %c0_5 = arith.constant 0 : index
    %c0_6 = arith.constant 0 : index
    %11 = vector.load %arg7[%c0_5, %c0_6] : memref<2x64xf32, #tpu.memory_space<vmem>>, vector<2x64xf32>
    %c0_i32_7 = arith.constant 0 : i32
    %c1_i32_8 = arith.constant 1 : i32
    %12 = arith.subi %c1_i32_8, %arg0 : i32
    %13 = arith.muli %12, %c0_i32_7 : i32
    %c3_i32 = arith.constant 3 : i32
    %14 = arith.subi %c3_i32, %c0_i32_7 : i32
    %15 = arith.muli %arg0, %14 : i32
    %16 = arith.addi %13, %15 : i32
    %17 = arith.addi %9, %16 : i32
    %c0_9 = arith.constant 0 : index
    %c0_10 = arith.constant 0 : index
    %18 = arith.index_cast %16 : i32 to index
    %c0_11 = arith.constant 0 : index
    %c0_12 = arith.constant 0 : index
    %19 = vector.load %arg3[%c0_9, %c0_10, %18, %c0_11, %c0_12] : memref<1x4x4x2x64xf32, #tpu.memory_space<vmem>>, vector<1x1x1x2x64xf32>
    %20 = vector.shape_cast %19 : vector<1x1x1x2x64xf32> to vector<2x64xf32>
    %c0_13 = arith.constant 0 : index
    %c0_14 = arith.constant 0 : index
    %c0_15 = arith.constant 0 : index
    %c0_16 = arith.constant 0 : index
    %21 = vector.load %arg4[%c0_13, %c0_14, %c0_15, %c0_16] : memref<1x4x64x64xf32, #tpu.memory_space<vmem>>, vector<1x1x64x64xf32>
    %22 = vector.shape_cast %21 : vector<1x1x64x64xf32> to vector<64x64xf32>
    %cst = arith.constant dense<0.000000e+00> : vector<2x64xf32>
    %23 = tpu.matmul %10, %22, %cst {dimension_numbers = #tpu.dot_dimension_numbers<[1], [0], [0], [1], [0, 0, 1, 1], [], []>} : vector<2x64xf32>, vector<64x64xf32>, vector<2x64xf32> -> vector<2x64xf32>
    %24 = arith.addf %20, %23 : vector<2x64xf32>
    %c0_17 = arith.constant 0 : index
    %c1 = arith.constant 1 : index
    %25 = arith.index_cast %16 : i32 to index
    %c0_18 = arith.constant 0 : index
    %c0_19 = arith.constant 0 : index
    %26 = vector.load %arg3[%c0_17, %c1, %25, %c0_18, %c0_19] : memref<1x4x4x2x64xf32, #tpu.memory_space<vmem>>, vector<1x1x1x2x64xf32>
    %27 = vector.shape_cast %26 : vector<1x1x1x2x64xf32> to vector<2x64xf32>
    %c0_20 = arith.constant 0 : index
    %c1_21 = arith.constant 1 : index
    %c0_22 = arith.constant 0 : index
    %c0_23 = arith.constant 0 : index
    %28 = vector.load %arg4[%c0_20, %c1_21, %c0_22, %c0_23] : memref<1x4x64x64xf32, #tpu.memory_space<vmem>>, vector<1x1x64x64xf32>
    %29 = vector.shape_cast %28 : vector<1x1x64x64xf32> to vector<64x64xf32>
    %cst_24 = arith.constant dense<0.000000e+00> : vector<2x64xf32>
    %30 = tpu.matmul %10, %29, %cst_24 {dimension_numbers = #tpu.dot_dimension_numbers<[1], [0], [0], [1], [0, 0, 1, 1], [], []>} : vector<2x64xf32>, vector<64x64xf32>, vector<2x64xf32> -> vector<2x64xf32>
    %31 = arith.addf %27, %30 : vector<2x64xf32>
    %c0_25 = arith.constant 0 : index
    %c2 = arith.constant 2 : index
    %32 = arith.index_cast %16 : i32 to index
    %c0_26 = arith.constant 0 : index
    %c0_27 = arith.constant 0 : index
    %33 = vector.load %arg3[%c0_25, %c2, %32, %c0_26, %c0_27] : memref<1x4x4x2x64xf32, #tpu.memory_space<vmem>>, vector<1x1x1x2x64xf32>
    %34 = vector.shape_cast %33 : vector<1x1x1x2x64xf32> to vector<2x64xf32>
    %c0_28 = arith.constant 0 : index
    %c2_29 = arith.constant 2 : index
    %c0_30 = arith.constant 0 : index
    %c0_31 = arith.constant 0 : index
    %35 = vector.load %arg4[%c0_28, %c2_29, %c0_30, %c0_31] : memref<1x4x64x64xf32, #tpu.memory_space<vmem>>, vector<1x1x64x64xf32>
    %36 = vector.shape_cast %35 : vector<1x1x64x64xf32> to vector<64x64xf32>
    %cst_32 = arith.constant dense<0.000000e+00> : vector<2x64xf32>
    %37 = tpu.matmul %10, %36, %cst_32 {dimension_numbers = #tpu.dot_dimension_numbers<[1], [0], [0], [1], [0, 0, 1, 1], [], []>} : vector<2x64xf32>, vector<64x64xf32>, vector<2x64xf32> -> vector<2x64xf32>
    %38 = arith.addf %34, %37 : vector<2x64xf32>
    %c0_33 = arith.constant 0 : index
    %c3 = arith.constant 3 : index
    %39 = arith.index_cast %16 : i32 to index
    %c0_34 = arith.constant 0 : index
    %c0_35 = arith.constant 0 : index
    %40 = vector.load %arg3[%c0_33, %c3, %39, %c0_34, %c0_35] : memref<1x4x4x2x64xf32, #tpu.memory_space<vmem>>, vector<1x1x1x2x64xf32>
    %41 = vector.shape_cast %40 : vector<1x1x1x2x64xf32> to vector<2x64xf32>
    %c0_36 = arith.constant 0 : index
    %c3_37 = arith.constant 3 : index
    %c0_38 = arith.constant 0 : index
    %c0_39 = arith.constant 0 : index
    %42 = vector.load %arg4[%c0_36, %c3_37, %c0_38, %c0_39] : memref<1x4x64x64xf32, #tpu.memory_space<vmem>>, vector<1x1x64x64xf32>
    %43 = vector.shape_cast %42 : vector<1x1x64x64xf32> to vector<64x64xf32>
    %cst_40 = arith.constant dense<0.000000e+00> : vector<2x64xf32>
    %44 = tpu.matmul %10, %43, %cst_40 {dimension_numbers = #tpu.dot_dimension_numbers<[1], [0], [0], [1], [0, 0, 1, 1], [], []>} : vector<2x64xf32>, vector<64x64xf32>, vector<2x64xf32> -> vector<2x64xf32>
    %45 = arith.addf %41, %44 : vector<2x64xf32>
    %46 = arith.negf %24 : vector<2x64xf32>
    %47 = math.exp %46 : vector<2x64xf32>
    %cst_41 = arith.constant 1.000000e+00 : f32
    %48 = vector.broadcast %cst_41 : f32 to vector<2x64xf32>
    %49 = arith.addf %48, %47 : vector<2x64xf32>
    %50 = arith.divf %48, %49 : vector<2x64xf32>
    %51 = arith.negf %31 : vector<2x64xf32>
    %52 = math.exp %51 : vector<2x64xf32>
    %cst_42 = arith.constant 1.000000e+00 : f32
    %53 = vector.broadcast %cst_42 : f32 to vector<2x64xf32>
    %54 = arith.addf %53, %52 : vector<2x64xf32>
    %55 = arith.divf %53, %54 : vector<2x64xf32>
    %56 = math.tanh %38 : vector<2x64xf32>
    %57 = arith.negf %45 : vector<2x64xf32>
    %58 = math.exp %57 : vector<2x64xf32>
    %cst_43 = arith.constant 1.000000e+00 : f32
    %59 = vector.broadcast %cst_43 : f32 to vector<2x64xf32>
    %60 = arith.addf %59, %58 : vector<2x64xf32>
    %61 = arith.divf %59, %60 : vector<2x64xf32>
    %62 = arith.mulf %55, %11 : vector<2x64xf32>
    %63 = arith.mulf %50, %56 : vector<2x64xf32>
    %64 = arith.addf %62, %63 : vector<2x64xf32>
    %65 = math.tanh %64 : vector<2x64xf32>
    %66 = arith.mulf %61, %65 : vector<2x64xf32>
    %67 = vector.broadcast %17 : i32 to vector<2x1xi32>
    %68 = arith.cmpi slt, %67, %3 : vector<2x1xi32>
    %69 = vector.shape_cast %68 : vector<2x1xi1> to vector<2x1xi1>
    %70 = vector.broadcast %69 : vector<2x1xi1> to vector<2x64xi1>
    %71 = arith.select %70, %66, %10 : vector<2x64xi1>, vector<2x64xf32>
    %72 = vector.shape_cast %68 : vector<2x1xi1> to vector<2x1xi1>
    %73 = vector.broadcast %72 : vector<2x1xi1> to vector<2x64xi1>
    %74 = arith.select %73, %64, %11 : vector<2x64xi1>, vector<2x64xf32>
    %cst_44 = arith.constant 0.000000e+00 : f32
    %75 = vector.shape_cast %68 : vector<2x1xi1> to vector<2x1xi1>
    %76 = vector.broadcast %75 : vector<2x1xi1> to vector<2x64xi1>
    %77 = vector.broadcast %cst_44 : f32 to vector<2x64xf32>
    %78 = arith.select %76, %66, %77 : vector<2x64xi1>, vector<2x64xf32>
    %c0_45 = arith.constant 0 : index
    %79 = arith.index_cast %16 : i32 to index
    %c0_46 = arith.constant 0 : index
    %c0_47 = arith.constant 0 : index
    %80 = vector.load %arg5[%c0_45, %79, %c0_46, %c0_47] : memref<1x4x2x64xf32, #tpu.memory_space<vmem>>, vector<1x1x2x64xf32>
    %81 = vector.shape_cast %80 : vector<1x1x2x64xf32> to vector<2x64xf32>
    %82 = vector.shape_cast %78 : vector<2x64xf32> to vector<1x1x2x64xf32>
    tpu.vector_store %arg5[%c0_45, %79, %c0_46, %c0_47], %82 {strides = array<i32>} : memref<1x4x2x64xf32, #tpu.memory_space<vmem>>, vector<1x1x2x64xf32>,
    %c1_i32_48 = arith.constant 1 : i32
    %c1_i32_49 = arith.constant 1 : i32
    %83 = arith.subi %c1_i32_49, %arg0 : i32
    %84 = arith.muli %83, %c1_i32_48 : i32
    %c3_i32_50 = arith.constant 3 : i32
    %85 = arith.subi %c3_i32_50, %c1_i32_48 : i32
    %86 = arith.muli %arg0, %85 : i32
    %87 = arith.addi %84, %86 : i32
    %88 = arith.addi %9, %87 : i32
    %c0_51 = arith.constant 0 : index
    %c0_52 = arith.constant 0 : index
    %89 = arith.index_cast %87 : i32 to index
    %c0_53 = arith.constant 0 : index
    %c0_54 = arith.constant 0 : index
    %90 = vector.load %arg3[%c0_51, %c0_52, %89, %c0_53, %c0_54] : memref<1x4x4x2x64xf32, #tpu.memory_space<vmem>>, vector<1x1x1x2x64xf32>
    %91 = vector.shape_cast %90 : vector<1x1x1x2x64xf32> to vector<2x64xf32>
    %c0_55 = arith.constant 0 : index
    %c0_56 = arith.constant 0 : index
    %c0_57 = arith.constant 0 : index
    %c0_58 = arith.constant 0 : index
    %92 = vector.load %arg4[%c0_55, %c0_56, %c0_57, %c0_58] : memref<1x4x64x64xf32, #tpu.memory_space<vmem>>, vector<1x1x64x64xf32>
    %93 = vector.shape_cast %92 : vector<1x1x64x64xf32> to vector<64x64xf32>
    %cst_59 = arith.constant dense<0.000000e+00> : vector<2x64xf32>
    %94 = tpu.matmul %71, %93, %cst_59 {dimension_numbers = #tpu.dot_dimension_numbers<[1], [0], [0], [1], [0, 0, 1, 1], [], []>} : vector<2x64xf32>, vector<64x64xf32>, vector<2x64xf32> -> vector<2x64xf32>
    %95 = arith.addf %91, %94 : vector<2x64xf32>
    %c0_60 = arith.constant 0 : index
    %c1_61 = arith.constant 1 : index
    %96 = arith.index_cast %87 : i32 to index
    %c0_62 = arith.constant 0 : index
    %c0_63 = arith.constant 0 : index
    %97 = vector.load %arg3[%c0_60, %c1_61, %96, %c0_62, %c0_63] : memref<1x4x4x2x64xf32, #tpu.memory_space<vmem>>, vector<1x1x1x2x64xf32>
    %98 = vector.shape_cast %97 : vector<1x1x1x2x64xf32> to vector<2x64xf32>
    %c0_64 = arith.constant 0 : index
    %c1_65 = arith.constant 1 : index
    %c0_66 = arith.constant 0 : index
    %c0_67 = arith.constant 0 : index
    %99 = vector.load %arg4[%c0_64, %c1_65, %c0_66, %c0_67] : memref<1x4x64x64xf32, #tpu.memory_space<vmem>>, vector<1x1x64x64xf32>
    %100 = vector.shape_cast %99 : vector<1x1x64x64xf32> to vector<64x64xf32>
    %cst_68 = arith.constant dense<0.000000e+00> : vector<2x64xf32>
    %101 = tpu.matmul %71, %100, %cst_68 {dimension_numbers = #tpu.dot_dimension_numbers<[1], [0], [0], [1], [0, 0, 1, 1], [], []>} : vector<2x64xf32>, vector<64x64xf32>, vector<2x64xf32> -> vector<2x64xf32>
    %102 = arith.addf %98, %101 : vector<2x64xf32>
    %c0_69 = arith.constant 0 : index
    %c2_70 = arith.constant 2 : index
    %103 = arith.index_cast %87 : i32 to index
    %c0_71 = arith.constant 0 : index
    %c0_72 = arith.constant 0 : index
    %104 = vector.load %arg3[%c0_69, %c2_70, %103, %c0_71, %c0_72] : memref<1x4x4x2x64xf32, #tpu.memory_space<vmem>>, vector<1x1x1x2x64xf32>
    %105 = vector.shape_cast %104 : vector<1x1x1x2x64xf32> to vector<2x64xf32>
    %c0_73 = arith.constant 0 : index
    %c2_74 = arith.constant 2 : index
    %c0_75 = arith.constant 0 : index
    %c0_76 = arith.constant 0 : index
    %106 = vector.load %arg4[%c0_73, %c2_74, %c0_75, %c0_76] : memref<1x4x64x64xf32, #tpu.memory_space<vmem>>, vector<1x1x64x64xf32>
    %107 = vector.shape_cast %106 : vector<1x1x64x64xf32> to vector<64x64xf32>
    %cst_77 = arith.constant dense<0.000000e+00> : vector<2x64xf32>
    %108 = tpu.matmul %71, %107, %cst_77 {dimension_numbers = #tpu.dot_dimension_numbers<[1], [0], [0], [1], [0, 0, 1, 1], [], []>} : vector<2x64xf32>, vector<64x64xf32>, vector<2x64xf32> -> vector<2x64xf32>
    %109 = arith.addf %105, %108 : vector<2x64xf32>
    %c0_78 = arith.constant 0 : index
    %c3_79 = arith.constant 3 : index
    %110 = arith.index_cast %87 : i32 to index
    %c0_80 = arith.constant 0 : index
    %c0_81 = arith.constant 0 : index
    %111 = vector.load %arg3[%c0_78, %c3_79, %110, %c0_80, %c0_81] : memref<1x4x4x2x64xf32, #tpu.memory_space<vmem>>, vector<1x1x1x2x64xf32>
    %112 = vector.shape_cast %111 : vector<1x1x1x2x64xf32> to vector<2x64xf32>
    %c0_82 = arith.constant 0 : index
    %c3_83 = arith.constant 3 : index
    %c0_84 = arith.constant 0 : index
    %c0_85 = arith.constant 0 : index
    %113 = vector.load %arg4[%c0_82, %c3_83, %c0_84, %c0_85] : memref<1x4x64x64xf32, #tpu.memory_space<vmem>>, vector<1x1x64x64xf32>
    %114 = vector.shape_cast %113 : vector<1x1x64x64xf32> to vector<64x64xf32>
    %cst_86 = arith.constant dense<0.000000e+00> : vector<2x64xf32>
    %115 = tpu.matmul %71, %114, %cst_86 {dimension_numbers = #tpu.dot_dimension_numbers<[1], [0], [0], [1], [0, 0, 1, 1], [], []>} : vector<2x64xf32>, vector<64x64xf32>, vector<2x64xf32> -> vector<2x64xf32>
    %116 = arith.addf %112, %115 : vector<2x64xf32>
    %117 = arith.negf %95 : vector<2x64xf32>
    %118 = math.exp %117 : vector<2x64xf32>
    %cst_87 = arith.constant 1.000000e+00 : f32
    %119 = vector.broadcast %cst_87 : f32 to vector<2x64xf32>
    %120 = arith.addf %119, %118 : vector<2x64xf32>
    %121 = arith.divf %119, %120 : vector<2x64xf32>
    %122 = arith.negf %102 : vector<2x64xf32>
    %123 = math.exp %122 : vector<2x64xf32>
    %cst_88 = arith.constant 1.000000e+00 : f32
    %124 = vector.broadcast %cst_88 : f32 to vector<2x64xf32>
    %125 = arith.addf %124, %123 : vector<2x64xf32>
    %126 = arith.divf %124, %125 : vector<2x64xf32>
    %127 = math.tanh %109 : vector<2x64xf32>
    %128 = arith.negf %116 : vector<2x64xf32>
    %129 = math.exp %128 : vector<2x64xf32>
    %cst_89 = arith.constant 1.000000e+00 : f32
    %130 = vector.broadcast %cst_89 : f32 to vector<2x64xf32>
    %131 = arith.addf %130, %129 : vector<2x64xf32>
    %132 = arith.divf %130, %131 : vector<2x64xf32>
    %133 = arith.mulf %126, %74 : vector<2x64xf32>
    %134 = arith.mulf %121, %127 : vector<2x64xf32>
    %135 = arith.addf %133, %134 : vector<2x64xf32>
    %136 = math.tanh %135 : vector<2x64xf32>
    %137 = arith.mulf %132, %136 : vector<2x64xf32>
    %138 = vector.broadcast %88 : i32 to vector<2x1xi32>
    %139 = arith.cmpi slt, %138, %3 : vector<2x1xi32>
    %140 = vector.shape_cast %139 : vector<2x1xi1> to vector<2x1xi1>
    %141 = vector.broadcast %140 : vector<2x1xi1> to vector<2x64xi1>
    %142 = arith.select %141, %137, %71 : vector<2x64xi1>, vector<2x64xf32>
    %143 = vector.shape_cast %139 : vector<2x1xi1> to vector<2x1xi1>
    %144 = vector.broadcast %143 : vector<2x1xi1> to vector<2x64xi1>
    %145 = arith.select %144, %135, %74 : vector<2x64xi1>, vector<2x64xf32>
    %cst_90 = arith.constant 0.000000e+00 : f32
    %146 = vector.shape_cast %139 : vector<2x1xi1> to vector<2x1xi1>
    %147 = vector.broadcast %146 : vector<2x1xi1> to vector<2x64xi1>
    %148 = vector.broadcast %cst_90 : f32 to vector<2x64xf32>
    %149 = arith.select %147, %137, %148 : vector<2x64xi1>, vector<2x64xf32>
    %c0_91 = arith.constant 0 : index
    %150 = arith.index_cast %87 : i32 to index
    %c0_92 = arith.constant 0 : index
    %c0_93 = arith.constant 0 : index
    %151 = vector.load %arg5[%c0_91, %150, %c0_92, %c0_93] : memref<1x4x2x64xf32, #tpu.memory_space<vmem>>, vector<1x1x2x64xf32>
    %152 = vector.shape_cast %151 : vector<1x1x2x64xf32> to vector<2x64xf32>
    %153 = vector.shape_cast %149 : vector<2x64xf32> to vector<1x1x2x64xf32>
    tpu.vector_store %arg5[%c0_91, %150, %c0_92, %c0_93], %153 {strides = array<i32>} : memref<1x4x2x64xf32, #tpu.memory_space<vmem>>, vector<1x1x2x64xf32>,
    %c2_i32 = arith.constant 2 : i32
    %c1_i32_94 = arith.constant 1 : i32
    %154 = arith.subi %c1_i32_94, %arg0 : i32
    %155 = arith.muli %154, %c2_i32 : i32
    %c3_i32_95 = arith.constant 3 : i32
    %156 = arith.subi %c3_i32_95, %c2_i32 : i32
    %157 = arith.muli %arg0, %156 : i32
    %158 = arith.addi %155, %157 : i32
    %159 = arith.addi %9, %158 : i32
    %c0_96 = arith.constant 0 : index
    %c0_97 = arith.constant 0 : index
    %160 = arith.index_cast %158 : i32 to index
    %c0_98 = arith.constant 0 : index
    %c0_99 = arith.constant 0 : index
    %161 = vector.load %arg3[%c0_96, %c0_97, %160, %c0_98, %c0_99] : memref<1x4x4x2x64xf32, #tpu.memory_space<vmem>>, vector<1x1x1x2x64xf32>
    %162 = vector.shape_cast %161 : vector<1x1x1x2x64xf32> to vector<2x64xf32>
    %c0_100 = arith.constant 0 : index
    %c0_101 = arith.constant 0 : index
    %c0_102 = arith.constant 0 : index
    %c0_103 = arith.constant 0 : index
    %163 = vector.load %arg4[%c0_100, %c0_101, %c0_102, %c0_103] : memref<1x4x64x64xf32, #tpu.memory_space<vmem>>, vector<1x1x64x64xf32>
    %164 = vector.shape_cast %163 : vector<1x1x64x64xf32> to vector<64x64xf32>
    %cst_104 = arith.constant dense<0.000000e+00> : vector<2x64xf32>
    %165 = tpu.matmul %142, %164, %cst_104 {dimension_numbers = #tpu.dot_dimension_numbers<[1], [0], [0], [1], [0, 0, 1, 1], [], []>} : vector<2x64xf32>, vector<64x64xf32>, vector<2x64xf32> -> vector<2x64xf32>
    %166 = arith.addf %162, %165 : vector<2x64xf32>
    %c0_105 = arith.constant 0 : index
    %c1_106 = arith.constant 1 : index
    %167 = arith.index_cast %158 : i32 to index
    %c0_107 = arith.constant 0 : index
    %c0_108 = arith.constant 0 : index
    %168 = vector.load %arg3[%c0_105, %c1_106, %167, %c0_107, %c0_108] : memref<1x4x4x2x64xf32, #tpu.memory_space<vmem>>, vector<1x1x1x2x64xf32>
    %169 = vector.shape_cast %168 : vector<1x1x1x2x64xf32> to vector<2x64xf32>
    %c0_109 = arith.constant 0 : index
    %c1_110 = arith.constant 1 : index
    %c0_111 = arith.constant 0 : index
    %c0_112 = arith.constant 0 : index
    %170 = vector.load %arg4[%c0_109, %c1_110, %c0_111, %c0_112] : memref<1x4x64x64xf32, #tpu.memory_space<vmem>>, vector<1x1x64x64xf32>
    %171 = vector.shape_cast %170 : vector<1x1x64x64xf32> to vector<64x64xf32>
    %cst_113 = arith.constant dense<0.000000e+00> : vector<2x64xf32>
    %172 = tpu.matmul %142, %171, %cst_113 {dimension_numbers = #tpu.dot_dimension_numbers<[1], [0], [0], [1], [0, 0, 1, 1], [], []>} : vector<2x64xf32>, vector<64x64xf32>, vector<2x64xf32> -> vector<2x64xf32>
    %173 = arith.addf %169, %172 : vector<2x64xf32>
    %c0_114 = arith.constant 0 : index
    %c2_115 = arith.constant 2 : index
    %174 = arith.index_cast %158 : i32 to index
    %c0_116 = arith.constant 0 : index
    %c0_117 = arith.constant 0 : index
    %175 = vector.load %arg3[%c0_114, %c2_115, %174, %c0_116, %c0_117] : memref<1x4x4x2x64xf32, #tpu.memory_space<vmem>>, vector<1x1x1x2x64xf32>
    %176 = vector.shape_cast %175 : vector<1x1x1x2x64xf32> to vector<2x64xf32>
    %c0_118 = arith.constant 0 : index
    %c2_119 = arith.constant 2 : index
    %c0_120 = arith.constant 0 : index
    %c0_121 = arith.constant 0 : index
    %177 = vector.load %arg4[%c0_118, %c2_119, %c0_120, %c0_121] : memref<1x4x64x64xf32, #tpu.memory_space<vmem>>, vector<1x1x64x64xf32>
    %178 = vector.shape_cast %177 : vector<1x1x64x64xf32> to vector<64x64xf32>
    %cst_122 = arith.constant dense<0.000000e+00> : vector<2x64xf32>
    %179 = tpu.matmul %142, %178, %cst_122 {dimension_numbers = #tpu.dot_dimension_numbers<[1], [0], [0], [1], [0, 0, 1, 1], [], []>} : vector<2x64xf32>, vector<64x64xf32>, vector<2x64xf32> -> vector<2x64xf32>
    %180 = arith.addf %176, %179 : vector<2x64xf32>
    %c0_123 = arith.constant 0 : index
    %c3_124 = arith.constant 3 : index
    %181 = arith.index_cast %158 : i32 to index
    %c0_125 = arith.constant 0 : index
    %c0_126 = arith.constant 0 : index
    %182 = vector.load %arg3[%c0_123, %c3_124, %181, %c0_125, %c0_126] : memref<1x4x4x2x64xf32, #tpu.memory_space<vmem>>, vector<1x1x1x2x64xf32>
    %183 = vector.shape_cast %182 : vector<1x1x1x2x64xf32> to vector<2x64xf32>
    %c0_127 = arith.constant 0 : index
    %c3_128 = arith.constant 3 : index
    %c0_129 = arith.constant 0 : index
    %c0_130 = arith.constant 0 : index
    %184 = vector.load %arg4[%c0_127, %c3_128, %c0_129, %c0_130] : memref<1x4x64x64xf32, #tpu.memory_space<vmem>>, vector<1x1x64x64xf32>
    %185 = vector.shape_cast %184 : vector<1x1x64x64xf32> to vector<64x64xf32>
    %cst_131 = arith.constant dense<0.000000e+00> : vector<2x64xf32>
    %186 = tpu.matmul %142, %185, %cst_131 {dimension_numbers = #tpu.dot_dimension_numbers<[1], [0], [0], [1], [0, 0, 1, 1], [], []>} : vector<2x64xf32>, vector<64x64xf32>, vector<2x64xf32> -> vector<2x64xf32>
    %187 = arith.addf %183, %186 : vector<2x64xf32>
    %188 = arith.negf %166 : vector<2x64xf32>
    %189 = math.exp %188 : vector<2x64xf32>
    %cst_132 = arith.constant 1.000000e+00 : f32
    %190 = vector.broadcast %cst_132 : f32 to vector<2x64xf32>
    %191 = arith.addf %190, %189 : vector<2x64xf32>
    %192 = arith.divf %190, %191 : vector<2x64xf32>
    %193 = arith.negf %173 : vector<2x64xf32>
    %194 = math.exp %193 : vector<2x64xf32>
    %cst_133 = arith.constant 1.000000e+00 : f32
    %195 = vector.broadcast %cst_133 : f32 to vector<2x64xf32>
    %196 = arith.addf %195, %194 : vector<2x64xf32>
    %197 = arith.divf %195, %196 : vector<2x64xf32>
    %198 = math.tanh %180 : vector<2x64xf32>
    %199 = arith.negf %187 : vector<2x64xf32>
    %200 = math.exp %199 : vector<2x64xf32>
    %cst_134 = arith.constant 1.000000e+00 : f32
    %201 = vector.broadcast %cst_134 : f32 to vector<2x64xf32>
    %202 = arith.addf %201, %200 : vector<2x64xf32>
    %203 = arith.divf %201, %202 : vector<2x64xf32>
    %204 = arith.mulf %197, %145 : vector<2x64xf32>
    %205 = arith.mulf %192, %198 : vector<2x64xf32>
    %206 = arith.addf %204, %205 : vector<2x64xf32>
    %207 = math.tanh %206 : vector<2x64xf32>
    %208 = arith.mulf %203, %207 : vector<2x64xf32>
    %209 = vector.broadcast %159 : i32 to vector<2x1xi32>
    %210 = arith.cmpi slt, %209, %3 : vector<2x1xi32>
    %211 = vector.shape_cast %210 : vector<2x1xi1> to vector<2x1xi1>
    %212 = vector.broadcast %211 : vector<2x1xi1> to vector<2x64xi1>
    %213 = arith.select %212, %208, %142 : vector<2x64xi1>, vector<2x64xf32>
    %214 = vector.shape_cast %210 : vector<2x1xi1> to vector<2x1xi1>
    %215 = vector.broadcast %214 : vector<2x1xi1> to vector<2x64xi1>
    %216 = arith.select %215, %206, %145 : vector<2x64xi1>, vector<2x64xf32>
    %cst_135 = arith.constant 0.000000e+00 : f32
    %217 = vector.shape_cast %210 : vector<2x1xi1> to vector<2x1xi1>
    %218 = vector.broadcast %217 : vector<2x1xi1> to vector<2x64xi1>
    %219 = vector.broadcast %cst_135 : f32 to vector<2x64xf32>
    %220 = arith.select %218, %208, %219 : vector<2x64xi1>, vector<2x64xf32>
    %c0_136 = arith.constant 0 : index
    %221 = arith.index_cast %158 : i32 to index
    %c0_137 = arith.constant 0 : index
    %c0_138 = arith.constant 0 : index
    %222 = vector.load %arg5[%c0_136, %221, %c0_137, %c0_138] : memref<1x4x2x64xf32, #tpu.memory_space<vmem>>, vector<1x1x2x64xf32>
    %223 = vector.shape_cast %222 : vector<1x1x2x64xf32> to vector<2x64xf32>
    %224 = vector.shape_cast %220 : vector<2x64xf32> to vector<1x1x2x64xf32>
    tpu.vector_store %arg5[%c0_136, %221, %c0_137, %c0_138], %224 {strides = array<i32>} : memref<1x4x2x64xf32, #tpu.memory_space<vmem>>, vector<1x1x2x64xf32>,
    %c3_i32_139 = arith.constant 3 : i32
    %c1_i32_140 = arith.constant 1 : i32
    %225 = arith.subi %c1_i32_140, %arg0 : i32
    %226 = arith.muli %225, %c3_i32_139 : i32
    %c3_i32_141 = arith.constant 3 : i32
    %227 = arith.subi %c3_i32_141, %c3_i32_139 : i32
    %228 = arith.muli %arg0, %227 : i32
    %229 = arith.addi %226, %228 : i32
    %230 = arith.addi %9, %229 : i32
    %c0_142 = arith.constant 0 : index
    %c0_143 = arith.constant 0 : index
    %231 = arith.index_cast %229 : i32 to index
    %c0_144 = arith.constant 0 : index
    %c0_145 = arith.constant 0 : index
    %232 = vector.load %arg3[%c0_142, %c0_143, %231, %c0_144, %c0_145] : memref<1x4x4x2x64xf32, #tpu.memory_space<vmem>>, vector<1x1x1x2x64xf32>
    %233 = vector.shape_cast %232 : vector<1x1x1x2x64xf32> to vector<2x64xf32>
    %c0_146 = arith.constant 0 : index
    %c0_147 = arith.constant 0 : index
    %c0_148 = arith.constant 0 : index
    %c0_149 = arith.constant 0 : index
    %234 = vector.load %arg4[%c0_146, %c0_147, %c0_148, %c0_149] : memref<1x4x64x64xf32, #tpu.memory_space<vmem>>, vector<1x1x64x64xf32>
    %235 = vector.shape_cast %234 : vector<1x1x64x64xf32> to vector<64x64xf32>
    %cst_150 = arith.constant dense<0.000000e+00> : vector<2x64xf32>
    %236 = tpu.matmul %213, %235, %cst_150 {dimension_numbers = #tpu.dot_dimension_numbers<[1], [0], [0], [1], [0, 0, 1, 1], [], []>} : vector<2x64xf32>, vector<64x64xf32>, vector<2x64xf32> -> vector<2x64xf32>
    %237 = arith.addf %233, %236 : vector<2x64xf32>
    %c0_151 = arith.constant 0 : index
    %c1_152 = arith.constant 1 : index
    %238 = arith.index_cast %229 : i32 to index
    %c0_153 = arith.constant 0 : index
    %c0_154 = arith.constant 0 : index
    %239 = vector.load %arg3[%c0_151, %c1_152, %238, %c0_153, %c0_154] : memref<1x4x4x2x64xf32, #tpu.memory_space<vmem>>, vector<1x1x1x2x64xf32>
    %240 = vector.shape_cast %239 : vector<1x1x1x2x64xf32> to vector<2x64xf32>
    %c0_155 = arith.constant 0 : index
    %c1_156 = arith.constant 1 : index
    %c0_157 = arith.constant 0 : index
    %c0_158 = arith.constant 0 : index
    %241 = vector.load %arg4[%c0_155, %c1_156, %c0_157, %c0_158] : memref<1x4x64x64xf32, #tpu.memory_space<vmem>>, vector<1x1x64x64xf32>
    %242 = vector.shape_cast %241 : vector<1x1x64x64xf32> to vector<64x64xf32>
    %cst_159 = arith.constant dense<0.000000e+00> : vector<2x64xf32>
    %243 = tpu.matmul %213, %242, %cst_159 {dimension_numbers = #tpu.dot_dimension_numbers<[1], [0], [0], [1], [0, 0, 1, 1], [], []>} : vector<2x64xf32>, vector<64x64xf32>, vector<2x64xf32> -> vector<2x64xf32>
    %244 = arith.addf %240, %243 : vector<2x64xf32>
    %c0_160 = arith.constant 0 : index
    %c2_161 = arith.constant 2 : index
    %245 = arith.index_cast %229 : i32 to index
    %c0_162 = arith.constant 0 : index
    %c0_163 = arith.constant 0 : index
    %246 = vector.load %arg3[%c0_160, %c2_161, %245, %c0_162, %c0_163] : memref<1x4x4x2x64xf32, #tpu.memory_space<vmem>>, vector<1x1x1x2x64xf32>
    %247 = vector.shape_cast %246 : vector<1x1x1x2x64xf32> to vector<2x64xf32>
    %c0_164 = arith.constant 0 : index
    %c2_165 = arith.constant 2 : index
    %c0_166 = arith.constant 0 : index
    %c0_167 = arith.constant 0 : index
    %248 = vector.load %arg4[%c0_164, %c2_165, %c0_166, %c0_167] : memref<1x4x64x64xf32, #tpu.memory_space<vmem>>, vector<1x1x64x64xf32>
    %249 = vector.shape_cast %248 : vector<1x1x64x64xf32> to vector<64x64xf32>
    %cst_168 = arith.constant dense<0.000000e+00> : vector<2x64xf32>
    %250 = tpu.matmul %213, %249, %cst_168 {dimension_numbers = #tpu.dot_dimension_numbers<[1], [0], [0], [1], [0, 0, 1, 1], [], []>} : vector<2x64xf32>, vector<64x64xf32>, vector<2x64xf32> -> vector<2x64xf32>
    %251 = arith.addf %247, %250 : vector<2x64xf32>
    %c0_169 = arith.constant 0 : index
    %c3_170 = arith.constant 3 : index
    %252 = arith.index_cast %229 : i32 to index
    %c0_171 = arith.constant 0 : index
    %c0_172 = arith.constant 0 : index
    %253 = vector.load %arg3[%c0_169, %c3_170, %252, %c0_171, %c0_172] : memref<1x4x4x2x64xf32, #tpu.memory_space<vmem>>, vector<1x1x1x2x64xf32>
    %254 = vector.shape_cast %253 : vector<1x1x1x2x64xf32> to vector<2x64xf32>
    %c0_173 = arith.constant 0 : index
    %c3_174 = arith.constant 3 : index
    %c0_175 = arith.constant 0 : index
    %c0_176 = arith.constant 0 : index
    %255 = vector.load %arg4[%c0_173, %c3_174, %c0_175, %c0_176] : memref<1x4x64x64xf32, #tpu.memory_space<vmem>>, vector<1x1x64x64xf32>
    %256 = vector.shape_cast %255 : vector<1x1x64x64xf32> to vector<64x64xf32>
    %cst_177 = arith.constant dense<0.000000e+00> : vector<2x64xf32>
    %257 = tpu.matmul %213, %256, %cst_177 {dimension_numbers = #tpu.dot_dimension_numbers<[1], [0], [0], [1], [0, 0, 1, 1], [], []>} : vector<2x64xf32>, vector<64x64xf32>, vector<2x64xf32> -> vector<2x64xf32>
    %258 = arith.addf %254, %257 : vector<2x64xf32>
    %259 = arith.negf %237 : vector<2x64xf32>
    %260 = math.exp %259 : vector<2x64xf32>
    %cst_178 = arith.constant 1.000000e+00 : f32
    %261 = vector.broadcast %cst_178 : f32 to vector<2x64xf32>
    %262 = arith.addf %261, %260 : vector<2x64xf32>
    %263 = arith.divf %261, %262 : vector<2x64xf32>
    %264 = arith.negf %244 : vector<2x64xf32>
    %265 = math.exp %264 : vector<2x64xf32>
    %cst_179 = arith.constant 1.000000e+00 : f32
    %266 = vector.broadcast %cst_179 : f32 to vector<2x64xf32>
    %267 = arith.addf %266, %265 : vector<2x64xf32>
    %268 = arith.divf %266, %267 : vector<2x64xf32>
    %269 = math.tanh %251 : vector<2x64xf32>
    %270 = arith.negf %258 : vector<2x64xf32>
    %271 = math.exp %270 : vector<2x64xf32>
    %cst_180 = arith.constant 1.000000e+00 : f32
    %272 = vector.broadcast %cst_180 : f32 to vector<2x64xf32>
    %273 = arith.addf %272, %271 : vector<2x64xf32>
    %274 = arith.divf %272, %273 : vector<2x64xf32>
    %275 = arith.mulf %268, %216 : vector<2x64xf32>
    %276 = arith.mulf %263, %269 : vector<2x64xf32>
    %277 = arith.addf %275, %276 : vector<2x64xf32>
    %278 = math.tanh %277 : vector<2x64xf32>
    %279 = arith.mulf %274, %278 : vector<2x64xf32>
    %280 = vector.broadcast %230 : i32 to vector<2x1xi32>
    %281 = arith.cmpi slt, %280, %3 : vector<2x1xi32>
    %282 = vector.shape_cast %281 : vector<2x1xi1> to vector<2x1xi1>
    %283 = vector.broadcast %282 : vector<2x1xi1> to vector<2x64xi1>
    %284 = arith.select %283, %279, %213 : vector<2x64xi1>, vector<2x64xf32>
    %285 = vector.shape_cast %281 : vector<2x1xi1> to vector<2x1xi1>
    %286 = vector.broadcast %285 : vector<2x1xi1> to vector<2x64xi1>
    %287 = arith.select %286, %277, %216 : vector<2x64xi1>, vector<2x64xf32>
    %cst_181 = arith.constant 0.000000e+00 : f32
    %288 = vector.shape_cast %281 : vector<2x1xi1> to vector<2x1xi1>
    %289 = vector.broadcast %288 : vector<2x1xi1> to vector<2x64xi1>
    %290 = vector.broadcast %cst_181 : f32 to vector<2x64xf32>
    %291 = arith.select %289, %279, %290 : vector<2x64xi1>, vector<2x64xf32>
    %c0_182 = arith.constant 0 : index
    %292 = arith.index_cast %229 : i32 to index
    %c0_183 = arith.constant 0 : index
    %c0_184 = arith.constant 0 : index
    %293 = vector.load %arg5[%c0_182, %292, %c0_183, %c0_184] : memref<1x4x2x64xf32, #tpu.memory_space<vmem>>, vector<1x1x2x64xf32>
    %294 = vector.shape_cast %293 : vector<1x1x2x64xf32> to vector<2x64xf32>
    %295 = vector.shape_cast %291 : vector<2x64xf32> to vector<1x1x2x64xf32>
    tpu.vector_store %arg5[%c0_182, %292, %c0_183, %c0_184], %295 {strides = array<i32>} : memref<1x4x2x64xf32, #tpu.memory_space<vmem>>, vector<1x1x2x64xf32>,
    %c4_i32_185 = arith.constant 4 : i32
    %c0_186 = arith.constant 0 : index
    %c0_187 = arith.constant 0 : index
    %296 = vector.load %arg6[%c0_186, %c0_187] : memref<2x64xf32, #tpu.memory_space<vmem>>, vector<2x64xf32>
    tpu.vector_store %arg6[%c0_186, %c0_187], %284 {strides = array<i32>} : memref<2x64xf32, #tpu.memory_space<vmem>>, vector<2x64xf32>,
    %c0_188 = arith.constant 0 : index
    %c0_189 = arith.constant 0 : index
    %297 = vector.load %arg7[%c0_188, %c0_189] : memref<2x64xf32, #tpu.memory_space<vmem>>, vector<2x64xf32>
    tpu.vector_store %arg7[%c0_188, %c0_189], %287 {strides = array<i32>} : memref<2x64xf32, #tpu.memory_space<vmem>>, vector<2x64xf32>,
    return
  }
  func.func @transform_0(%arg0: i32, %arg1: i32) -> (i32, i32) {
    %c0_i32 = arith.constant 0 : i32
    %c0_i32_0 = arith.constant 0 : i32
    %c0_i32_1 = arith.constant 0 : i32
    return %c0_i32, %c0_i32_0 : i32, i32
  }
  func.func @transform_1(%arg0: i32, %arg1: i32) -> (i32, i32, i32, i32, i32) {
    %c1_i32 = arith.constant 1 : i32
    %0 = arith.subi %c1_i32, %arg0 : i32
    %1 = arith.muli %0, %arg1 : i32
    %c1_i32_0 = arith.constant 1 : i32
    %2 = arith.subi %c1_i32_0, %arg1 : i32
    %3 = arith.muli %arg0, %2 : i32
    %4 = arith.addi %1, %3 : i32
    %c0_i32 = arith.constant 0 : i32
    %c0_i32_1 = arith.constant 0 : i32
    %c0_i32_2 = arith.constant 0 : i32
    %c0_i32_3 = arith.constant 0 : i32
    return %arg0, %c0_i32, %4, %c0_i32_1, %c0_i32_2 : i32, i32, i32, i32, i32
  }
  func.func @transform_2(%arg0: i32, %arg1: i32) -> (i32, i32, i32, i32) {
    %c0_i32 = arith.constant 0 : i32
    %c0_i32_0 = arith.constant 0 : i32
    %c0_i32_1 = arith.constant 0 : i32
    %c0_i32_2 = arith.constant 0 : i32
    return %arg0, %c0_i32, %c0_i32_0, %c0_i32_1 : i32, i32, i32, i32
  }
  func.func @transform_3(%arg0: i32, %arg1: i32) -> (i32, i32, i32, i32) {
    %c1_i32 = arith.constant 1 : i32
    %0 = arith.subi %c1_i32, %arg0 : i32
    %1 = arith.muli %0, %arg1 : i32
    %c1_i32_0 = arith.constant 1 : i32
    %2 = arith.subi %c1_i32_0, %arg1 : i32
    %3 = arith.muli %arg0, %2 : i32
    %4 = arith.addi %1, %3 : i32
    %c0_i32 = arith.constant 0 : i32
    %c0_i32_1 = arith.constant 0 : i32
    %c0_i32_2 = arith.constant 0 : i32
    return %arg0, %4, %c0_i32, %c0_i32_1 : i32, i32, i32, i32
  }
}

module attributes {stable_mosaic.version = 11 : i64} {
  func.func @fc_ln_kernel(%arg0: i32, %arg1: memref<16x64xf32, #tpu.memory_space<vmem>>, %arg2: memref<16x64xf32, #tpu.memory_space<vmem>>, %arg3: memref<64x1xf32, #tpu.memory_space<vmem>>, %arg4: memref<64x1xf32, #tpu.memory_space<vmem>>, %arg5: memref<1x1xf32, #tpu.memory_space<vmem>>, %arg6: memref<1x1xf32, #tpu.memory_space<vmem>>, %arg7: memref<1x1xf32, #tpu.memory_space<vmem>>, %arg8: memref<16x1xf32, #tpu.memory_space<vmem>>) attributes {dimension_semantics = [#tpu.dimension_semantics<parallel>], iteration_bounds = array<i64: 1>, scalar_prefetch = 0 : i64, scratch_operands = 0 : i64, tpu.core_type = #tpu.core_type<tc>, window_params = [{transform_indices = @transform_0, window_bounds = array<i64: 16, 64>}, {transform_indices = @transform_1, window_bounds = array<i64: 16, 64>}, {pipeline_mode = #tpu.pipeline_mode<synchronous>, transform_indices = @transform_2, window_bounds = array<i64: 64, 1>}, {pipeline_mode = #tpu.pipeline_mode<synchronous>, transform_indices = @transform_3, window_bounds = array<i64: 64, 1>}, {pipeline_mode = #tpu.pipeline_mode<synchronous>, transform_indices = @transform_4, window_bounds = array<i64: 1, 1>}, {pipeline_mode = #tpu.pipeline_mode<synchronous>, transform_indices = @transform_5, window_bounds = array<i64: 1, 1>}, {pipeline_mode = #tpu.pipeline_mode<synchronous>, transform_indices = @transform_6, window_bounds = array<i64: 1, 1>}, {transform_indices = @transform_7, window_bounds = array<i64: 16, 1>}]} {
    %c0 = arith.constant 0 : index
    %c0_0 = arith.constant 0 : index
    %0 = vector.load %arg1[%c0, %c0_0] : memref<16x64xf32, #tpu.memory_space<vmem>>, vector<16x64xf32>
    %c0_1 = arith.constant 0 : index
    %c0_2 = arith.constant 0 : index
    %1 = vector.load %arg3[%c0_1, %c0_2] : memref<64x1xf32, #tpu.memory_space<vmem>>, vector<64x1xf32>
    %cst = arith.constant dense<0.000000e+00> : vector<16x1xf32>
    %2 = tpu.matmul %0, %1, %cst {dimension_numbers = #tpu.dot_dimension_numbers<[1], [0], [0], [1], [0, 0, 1, 1], [], []>} : vector<16x64xf32>, vector<64x1xf32>, vector<16x1xf32> -> vector<16x1xf32>
    %c0_3 = arith.constant 0 : index
    %c0_4 = arith.constant 0 : index
    %3 = vector.load %arg2[%c0_3, %c0_4] : memref<16x64xf32, #tpu.memory_space<vmem>>, vector<16x64xf32>
    %c0_5 = arith.constant 0 : index
    %c0_6 = arith.constant 0 : index
    %4 = vector.load %arg4[%c0_5, %c0_6] : memref<64x1xf32, #tpu.memory_space<vmem>>, vector<64x1xf32>
    %cst_7 = arith.constant dense<0.000000e+00> : vector<16x1xf32>
    %5 = tpu.matmul %3, %4, %cst_7 {dimension_numbers = #tpu.dot_dimension_numbers<[1], [0], [0], [1], [0, 0, 1, 1], [], []>} : vector<16x64xf32>, vector<64x1xf32>, vector<16x1xf32> -> vector<16x1xf32>
    %6 = arith.addf %2, %5 : vector<16x1xf32>
    %c0_8 = arith.constant 0 : index
    %c0_9 = arith.constant 0 : index
    %7 = vector.load %arg5[%c0_8, %c0_9] : memref<1x1xf32, #tpu.memory_space<vmem>>, vector<1x1xf32>
    %8 = vector.broadcast %7 : vector<1x1xf32> to vector<16x1xf32>
    %9 = arith.addf %6, %8 : vector<16x1xf32>
    %cst_10 = arith.constant dense<0.000000e+00> : vector<16xf32>
    %10 = vector.multi_reduction <add>, %9, %cst_10 [1] : vector<16x1xf32> to vector<16xf32>
    %11 = vector.shape_cast %10 : vector<16xf32> to vector<16x1xf32>
    %cst_11 = arith.constant 1.000000e+00 : f32
    %12 = vector.broadcast %cst_11 : f32 to vector<16x1xf32>
    %13 = arith.divf %11, %12 : vector<16x1xf32>
    %14 = arith.subf %9, %13 : vector<16x1xf32>
    %15 = arith.mulf %14, %14 : vector<16x1xf32>
    %cst_12 = arith.constant dense<0.000000e+00> : vector<16xf32>
    %16 = vector.multi_reduction <add>, %15, %cst_12 [1] : vector<16x1xf32> to vector<16xf32>
    %17 = vector.shape_cast %16 : vector<16xf32> to vector<16x1xf32>
    %cst_13 = arith.constant 1.000000e+00 : f32
    %18 = vector.broadcast %cst_13 : f32 to vector<16x1xf32>
    %19 = arith.divf %17, %18 : vector<16x1xf32>
    %20 = arith.subf %9, %13 : vector<16x1xf32>
    %cst_14 = arith.constant 9.99999974E-6 : f32
    %21 = vector.broadcast %cst_14 : f32 to vector<16x1xf32>
    %22 = arith.addf %19, %21 : vector<16x1xf32>
    %23 = math.rsqrt %22 : vector<16x1xf32>
    %24 = arith.mulf %20, %23 : vector<16x1xf32>
    %c0_15 = arith.constant 0 : index
    %c0_16 = arith.constant 0 : index
    %25 = vector.load %arg6[%c0_15, %c0_16] : memref<1x1xf32, #tpu.memory_space<vmem>>, vector<1x1xf32>
    %26 = vector.broadcast %25 : vector<1x1xf32> to vector<16x1xf32>
    %27 = arith.mulf %24, %26 : vector<16x1xf32>
    %c0_17 = arith.constant 0 : index
    %c0_18 = arith.constant 0 : index
    %28 = vector.load %arg7[%c0_17, %c0_18] : memref<1x1xf32, #tpu.memory_space<vmem>>, vector<1x1xf32>
    %29 = vector.broadcast %28 : vector<1x1xf32> to vector<16x1xf32>
    %30 = arith.addf %27, %29 : vector<16x1xf32>
    %c0_19 = arith.constant 0 : index
    %c0_20 = arith.constant 0 : index
    %31 = vector.load %arg8[%c0_19, %c0_20] : memref<16x1xf32, #tpu.memory_space<vmem>>, vector<16x1xf32>
    tpu.vector_store %arg8[%c0_19, %c0_20], %30 {strides = array<i32>} : memref<16x1xf32, #tpu.memory_space<vmem>>, vector<16x1xf32>,
    return
  }
  func.func @transform_0(%arg0: i32) -> (i32, i32) {
    %c0_i32 = arith.constant 0 : i32
    %c0_i32_0 = arith.constant 0 : i32
    return %arg0, %c0_i32 : i32, i32
  }
  func.func @transform_1(%arg0: i32) -> (i32, i32) {
    %c0_i32 = arith.constant 0 : i32
    %c0_i32_0 = arith.constant 0 : i32
    return %arg0, %c0_i32 : i32, i32
  }
  func.func @transform_2(%arg0: i32) -> (i32, i32) {
    %c0_i32 = arith.constant 0 : i32
    %c0_i32_0 = arith.constant 0 : i32
    %c0_i32_1 = arith.constant 0 : i32
    return %c0_i32, %c0_i32_0 : i32, i32
  }
  func.func @transform_3(%arg0: i32) -> (i32, i32) {
    %c0_i32 = arith.constant 0 : i32
    %c0_i32_0 = arith.constant 0 : i32
    %c0_i32_1 = arith.constant 0 : i32
    return %c0_i32, %c0_i32_0 : i32, i32
  }
  func.func @transform_4(%arg0: i32) -> (i32, i32) {
    %c0_i32 = arith.constant 0 : i32
    %c0_i32_0 = arith.constant 0 : i32
    %c0_i32_1 = arith.constant 0 : i32
    return %c0_i32, %c0_i32_0 : i32, i32
  }
  func.func @transform_5(%arg0: i32) -> (i32, i32) {
    %c0_i32 = arith.constant 0 : i32
    %c0_i32_0 = arith.constant 0 : i32
    %c0_i32_1 = arith.constant 0 : i32
    return %c0_i32, %c0_i32_0 : i32, i32
  }
  func.func @transform_6(%arg0: i32) -> (i32, i32) {
    %c0_i32 = arith.constant 0 : i32
    %c0_i32_0 = arith.constant 0 : i32
    %c0_i32_1 = arith.constant 0 : i32
    return %c0_i32, %c0_i32_0 : i32, i32
  }
  func.func @transform_7(%arg0: i32) -> (i32, i32) {
    %c0_i32 = arith.constant 0 : i32
    %c0_i32_0 = arith.constant 0 : i32
    return %arg0, %c0_i32 : i32, i32
  }
}

</mosaic_0001>

<bundles_post_ra>
// kernel: bilstm_forward.5
= control target key start
LH: loop header
LB: loop body
LE: loop exit
PB: predicated region body
PF: predicated region fallthrough
CT: control target
= control target key end

     0   :  { %s572_s12 = smov 0   ;;  %s574_s13 = smov 0   ;;  %s627_s0 = inlined_call_operand.vmem [shape: f32[16,16], index: 0, kind: input, shape index: {}]   ;;  %s628_s1 = inlined_call_operand.vmem [shape: f32[2,16,256], index: 1, kind: input, shape index: {}]   ;;  %s629_s2 = inlined_call_operand.vmem [shape: f32[2,1,256], index: 2, kind: input, shape index: {}]   ;;  %s630_s3 = inlined_call_operand.vmem [shape: f32[2,4,16,64], index: 3, kind: output, shape index: {}]  }
   0x1   :  { %s576_s14 = smov 0  }
   0x2 LB: > { %s25_s15 = sadd.s32 1, %s544_s13  ;;  %p476_p0 = scmp.ge.s32.totalorder %s548_s14, 1  ;;  %s548_s14 = sphi %s576_s14, %s13_s14   ;;  %s544_s13 = sphi %s574_s13, %s632_s13   ;;  %s540_s12 = sphi %s572_s12, %s631_s12  }
   0x3   : > { %p27_p1 = scmp.ge.s32.totalorder %s25_s15, 2  ;;  %p171_p2 = scmp.lt.s32.totalorder %s548_s14, 3 }
   0x5   : > { %s634_s15 = smov (%p27_p1, %s25_s15), 0  ;;  %p172_p3 = pnand %p476_p0, %p171_p2 }
   0x6   : > { %p214_p4 = scmp.lt.s32.totalorder (!%p172_p3), %s540_s12, 1  ;;  %v550_v0 = vmov (!%p172_p3), 0.0   ;;  %v233_v7 = vld [vmem:[%s627_s0] sm:$0xff] (!%p172_p3)  ;;  %vm251_vm0 = vcmask (!%p172_p3), 130048   ;;  %v234_v8 = vld [vmem:[%s627_s0 + $0x8] sm:$0xff] (!%p172_p3)  ;;  %v241_v9 = vlaneseq (!%p172_p3)  ;;  %vm335_vm1 = vcmask (!%p172_p3), 523264  }
   0x7   : > { %175 = sbr.rel (%p172_p3) target bundleno = 359 (0x167), region = 32  ;;  %322 = vmatprep.mubr.f32.mxu0 (!%p172_p3), %v550_v0  ;;  %328 = vmatprep.mubr.f32.mxu1 (!%p172_p3), %v550_v0  ;;  %s551_s5 = smov (!%p172_p3), 64  }
   0x8   : > { %v242_v10 = vshrl.u32 (!%p172_p3), %v241_v9, 7 }
   0xa   : > { %v243_v11 = vsub.s32 (!%p172_p3), 0, %v242_v10  ;;  %v247_v13 = vsub.s32 (!%p172_p3), 1, %v242_v10 }
   0xe   : > { %s636_s12 = smov (!%p214_p4, %s540_s12), 1 }
   0xf   : > { %s492_s16 = sshll.u32 %s636_s12, 5  ;;  %s479_s24 = sshll.u32 %s636_s12, 1 }
  0x10   : > { %s218_s19 = scalar_lea.vmem %s628_s1, %s492_s16  ;;  %s222_s27 = scalar_lea.vmem %s629_s2, %s479_s24 }
  0x11   : > { %v236_v1 = vld [vmem:[%s218_s19 + $0x8] sm:$0xff]  ;;  %v238_v2 = vld [vmem:[%s218_s19 + $0x18] sm:$0xff]  ;;  %v235_v3 = vld [vmem:[%s218_s19] sm:$0xff]  ;;  %s493_s28 = sshll.u32 %s636_s12, 6 }
  0x12   : > { %v494_v4 = vpack.c.bf16 %v238_v2, %v236_v1  ;;  %v237_v5 = vld [vmem:[%s218_s19 + $0x10] sm:$0xff]  ;;  %v239_v12 = vld [vmem:[%s222_s27] sm:$0x3]  ;;  %s231_s4 = scalar_lea.vmem %s630_s3, %s493_s28 }
  0x13   : > { %v496_v6 = vpack.c.bf16 %v237_v5, %v235_v3  ;;  %v244_v14 = vrot.slane %v239_v12, %v243_v11  ;;  %v248_v15 = vrot.slane %v239_v12, %v247_v13 }
  0x14   : > { %495 = vmatprep.subr.bf16.mxu0 %v494_v4  ;;  %498 = vmatprep.subr.bf16.mxu1 %v494_v4 }
  0x15   : > { %497 = vmatpush1.bf16.msra.mxu0 %v496_v6  ;;  %499 = vmatpush1.bf16.msra.mxu1 %v496_v6 }
  0x18   : > { %482 = vmatmul.mubr.msk.f32.vlgmr.msra.gmra.mrb[0].mxu0 %vm251_vm0, %v233_v7  ;;  %483 = vmatmul.mubr.msk.f32.vlgmr.msra.gmra.mrb[0].mxu1 %vm251_vm0, %v234_v8 }
  0xeb   : > { %v324_v16 = vpop.f32.mrb[0].mxu0  ;;  %v330_v17 = vpop.f32.mrb[0].mxu1 }
  0xec   : > { %v325_v18 = vadd.f32 %v324_v16, %v244_v14  ;;  %v326_v19 = vpop.f32.mrb[1].mxu0  ;;  %v331_v20 = vadd.f32 %v330_v17, %v244_v14  ;;  %v332_v21 = vpop.f32.mrb[1].mxu1 }
  0xed   : > { %v327_v22 = vadd.f32 %v326_v19, %v248_v15  ;;  %v333_v23 = vadd.f32 %v332_v21, %v248_v15 }
  0xee   : > { %336 = vst.msk [vmem:[%s231_s4] sm:$0xff] %vm335_vm1, %v325_v18  ;;  %337 = vst.msk [vmem:[%s231_s4 + $0x8] sm:$0xff] %vm335_vm1, %v331_v20  ;;  %340 = vrot.lane.b32.xlu0 %v325_v18, %s551_s5 }
  0xef   : > { %486 = vst.msk [vmem:[%s231_s4 + $0x20] sm:$0xff] %vm335_vm1, %v327_v22  ;;  %487 = vst.msk [vmem:[%s231_s4 + $0x28] sm:$0xff] %vm335_vm1, %v333_v23  ;;  %354 = vrot.lane.b32.xlu1 %v327_v22, %s551_s5 }
  0xf2   : > { %342 = vrot.lane.b32.xlu0 %v331_v20, %s551_s5 }
  0xf3   : > { %356 = vrot.lane.b32.xlu1 %v333_v23, %s551_s5 }
 0x160   : > { %v341_v24 = vpop.permute.xlu0 %340 }
 0x161   : > { %484 = vst.msk [vmem:[%s231_s4 + $0x10] sm:$0xff] %vm335_vm1, %v341_v24  ;;  %v355_v25 = vpop.permute.xlu1 %354 }
 0x162   : > { %488 = vst.msk [vmem:[%s231_s4 + $0x30] sm:$0xff] %vm335_vm1, %v355_v25 }
 0x164   : > { %v343_v26 = vpop.permute.xlu0 %342 }
 0x165   : > { %485 = vst.msk [vmem:[%s231_s4 + $0x18] sm:$0xff] %vm335_vm1, %v343_v26  ;;  %v357_v27 = vpop.permute.xlu1 %356 }
 0x166   : > { %489 = vst.msk [vmem:[%s231_s4 + $0x38] sm:$0xff] %vm335_vm1, %v357_v27 }
 0x167 PF: > { %s13_s14 = sadd.s32 1, %s548_s14   ;;  %s631_s12 = smov %s544_s13 }
 0x168   : > { %p10_p5 = scmp.ge.s32.totalorder %s13_s14, 4   ;;  %s632_s13 = smov %s634_s15 }
 0x16a   :  { %12 = sbr.rel (!%p10_p5) target bundleno = 2 (0x2), region = 71 }

// kernel: bilstm_forward.7
= control target key start
LH: loop header
LB: loop body
LE: loop exit
PB: predicated region body
PF: predicated region fallthrough
CT: control target
= control target key end

     0   :  { %s857_s18 = smov 0   ;;  %s859_s19 = smov 0   ;;  %s965_s0 = inlined_call_operand.vmem [shape: f32[16,64], index: 0, kind: input, shape index: {}]   ;;  %s966_s1 = inlined_call_operand.vmem [shape: f32[16,64], index: 1, kind: input, shape index: {}]   ;;  %s967_s2 = inlined_call_operand.vmem [shape: f32[2,64,256], index: 2, kind: input, shape index: {}]   ;;  %s968_s3 = inlined_call_operand.vmem [shape: f32[2,64,256], index: 3, kind: input, shape index: {}]   ;;  %s969_s4 = inlined_call_operand.vmem [shape: f32[2,1,256], index: 4, kind: input, shape index: {}]   ;;  %s970_s5 = inlined_call_operand.vmem [shape: f32[2,4,16,64], index: 5, kind: output, shape index: {}]  }
   0x1   :  { %s861_s20 = smov 0  }
   0x2 LB: > { %s27_s21 = sadd.s32 1, %s819_s19  ;;  %p716_p0 = scmp.ge.s32.totalorder %s823_s20, 1  ;;  %s823_s20 = sphi %s861_s20, %s15_s20   ;;  %s819_s19 = sphi %s859_s19, %s972_s19   ;;  %s815_s18 = sphi %s857_s18, %s971_s18  }
   0x3   : > { %p29_p1 = scmp.ge.s32.totalorder %s27_s21, 2  ;;  %p242_p2 = scmp.lt.s32.totalorder %s823_s20, 3 }
   0x5   : > { %s974_s21 = smov (%p29_p1, %s27_s21), 0  ;;  %p243_p3 = pnand %p716_p0, %p242_p2 }
   0x6   : > { %p305_p4 = scmp.lt.s32.totalorder (!%p243_p3), %s815_s18, 1  ;;  %v825_v0 = vmov (!%p243_p3), 0.0   ;;  %v347_v49 = vld [vmem:[%s966_s1] sm:$0xff] (!%p243_p3)  ;;  %vm365_vm0 = vcmask (!%p243_p3), 523264   ;;  %v348_v51 = vld [vmem:[%s966_s1 + $0x8] sm:$0xff] (!%p243_p3)  ;;  %v534_v53 = vlaneseq (!%p243_p3)  ;;  %s826_s24 = smov (!%p243_p3), 64  }
   0x7   : > { %246 = sbr.rel (%p243_p3) target bundleno = 374 (0x176), region = 40  ;;  %436 = vmatprep.mubr.f32.mxu1 (!%p243_p3), %v825_v0  ;;  %519 = vmatprep.mubr.f32.mxu0 (!%p243_p3), %v825_v0  ;;  %v329_v50 = vld [vmem:[%s965_s0] sm:$0xff] (!%p243_p3)  ;;  %v330_v52 = vld [vmem:[%s965_s0 + $0x8] sm:$0xff] (!%p243_p3) }
   0x8   : > { %v535_v54 = vshrl.u32 (!%p243_p3), %v534_v53, 7 }
   0xa   : > { %v536_v55 = vsub.s32 (!%p243_p3), 0, %v535_v54  ;;  %v540_v57 = vsub.s32 (!%p243_p3), 1, %v535_v54 }
   0xe   : > { %s976_s18 = smov (!%p305_p4, %s815_s18), 1 }
   0xf   : > { %s736_s22 = sshll.u32 %s976_s18, 7  ;;  %s721_s12 = sshll.u32 %s976_s18, 1 }
  0x10   : > { %s883_s25 = scalar_lea.vmem %s968_s3, %s736_s22  ;;  %s888_s28 = scalar_lea.vmem %s967_s2, %s736_s22 }
  0x11   : > { %v350_v1 = vld [vmem:[%s883_s25 + $0x8] sm:$0xff]  ;;  %v352_v2 = vld [vmem:[%s883_s25 + $0x18] sm:$0xff]  ;;  %v349_v6 = vld [vmem:[%s883_s25] sm:$0xff]  ;;  %s318_s15 = scalar_lea.vmem %s969_s4, %s721_s12  ;;  %s738_s16 = sshll.u32 %s976_s18, 6 }
  0x12   : > { %v332_v3 = vld [vmem:[%s888_s28 + $0x8] sm:$0xff]  ;;  %v739_v4 = vpack.c.bf16 %v352_v2, %v350_v1  ;;  %v334_v5 = vld [vmem:[%s888_s28 + $0x18] sm:$0xff]  ;;  %v351_v7 = vld [vmem:[%s883_s25 + $0x10] sm:$0xff]  ;;  %s327_s23 = scalar_lea.vmem %s970_s5, %s738_s16 }
  0x13   : > { %v755_v8 = vpack.c.bf16 %v334_v5, %v332_v3  ;;  %v741_v9 = vpack.c.bf16 %v351_v7, %v349_v6  ;;  %v331_v10 = vld [vmem:[%s888_s28] sm:$0xff]  ;;  %v333_v11 = vld [vmem:[%s888_s28 + $0x10] sm:$0xff]  ;;  %v354_v12 = vld [vmem:[%s883_s25 + $0x28] sm:$0xff] }
  0x14   : > { %740 = vmatprep.subr.bf16.mxu1 %v739_v4  ;;  %v757_v13 = vpack.c.bf16 %v333_v11, %v331_v10  ;;  %v356_v14 = vld [vmem:[%s883_s25 + $0x38] sm:$0xff]  ;;  %v336_v15 = vld [vmem:[%s888_s28 + $0x28] sm:$0xff]  ;;  %v353_v19 = vld [vmem:[%s883_s25 + $0x20] sm:$0xff] }
  0x15   : > { %v338_v16 = vld [vmem:[%s888_s28 + $0x38] sm:$0xff]  ;;  %756 = vmatprep.subr.bf16.mxu0 %v755_v8  ;;  %742 = vmatpush1.bf16.msra.mxu1 %v741_v9  ;;  %v743_v17 = vpack.c.bf16 %v356_v14, %v354_v12  ;;  %v355_v20 = vld [vmem:[%s883_s25 + $0x30] sm:$0xff]  ;;  %v335_v21 = vld [vmem:[%s888_s28 + $0x20] sm:$0xff] }
  0x16   : > { %v759_v18 = vpack.c.bf16 %v338_v16, %v336_v15  ;;  %758 = vmatpush1.bf16.msra.mxu0 %v757_v13  ;;  %v745_v22 = vpack.c.bf16 %v355_v20, %v353_v19  ;;  %v337_v23 = vld [vmem:[%s888_s28 + $0x30] sm:$0xff]  ;;  %v358_v24 = vld [vmem:[%s883_s25 + $0x48] sm:$0xff]  ;;  %v360_v25 = vld [vmem:[%s883_s25 + $0x58] sm:$0xff] }
  0x17   : > { %744 = vmatprep.subr.bf16.mxu1 %v743_v17  ;;  %v761_v26 = vpack.c.bf16 %v337_v23, %v335_v21  ;;  %v747_v27 = vpack.c.bf16 %v360_v25, %v358_v24  ;;  %v340_v28 = vld [vmem:[%s888_s28 + $0x48] sm:$0xff]  ;;  %v342_v29 = vld [vmem:[%s888_s28 + $0x58] sm:$0xff]  ;;  %v357_v30 = vld [vmem:[%s883_s25 + $0x40] sm:$0xff] }
  0x18   : > { %760 = vmatprep.subr.bf16.mxu0 %v759_v18  ;;  %v763_v31 = vpack.c.bf16 %v342_v29, %v340_v28  ;;  %v359_v32 = vld [vmem:[%s883_s25 + $0x50] sm:$0xff]  ;;  %v339_v33 = vld [vmem:[%s888_s28 + $0x40] sm:$0xff]  ;;  %v362_v36 = vld [vmem:[%s883_s25 + $0x68] sm:$0xff] }
  0x19   : > { %v341_v34 = vld [vmem:[%s888_s28 + $0x50] sm:$0xff]  ;;  %746 = vmatpush1.bf16.msra.mxu1 %v745_v22  ;;  %v749_v35 = vpack.c.bf16 %v359_v32, %v357_v30  ;;  %v364_v37 = vld [vmem:[%s883_s25 + $0x78] sm:$0xff]  ;;  %v344_v38 = vld [vmem:[%s888_s28 + $0x68] sm:$0xff] }
  0x1a   : > { %762 = vmatpush1.bf16.msra.mxu0 %v761_v26  ;;  %748 = vmatprep.subr.bf16.mxu1 %v747_v27  ;;  %v765_v39 = vpack.c.bf16 %v341_v34, %v339_v33  ;;  %v751_v40 = vpack.c.bf16 %v364_v37, %v362_v36  ;;  %v346_v41 = vld [vmem:[%s888_s28 + $0x78] sm:$0xff]  ;;  %v361_v42 = vld [vmem:[%s883_s25 + $0x60] sm:$0xff]  ;;  %v363_v43 = vld [vmem:[%s883_s25 + $0x70] sm:$0xff] }
  0x1b   : > { %764 = vmatprep.subr.bf16.mxu0 %v763_v31  ;;  %v767_v44 = vpack.c.bf16 %v346_v41, %v344_v38  ;;  %v343_v45 = vld [vmem:[%s888_s28 + $0x60] sm:$0xff]  ;;  %v345_v46 = vld [vmem:[%s888_s28 + $0x70] sm:$0xff]  ;;  %v753_v47 = vpack.c.bf16 %v363_v43, %v361_v42 }
  0x1c   : > { %v769_v48 = vpack.c.bf16 %v345_v46, %v343_v45  ;;  %v532_v56 = vld [vmem:[%s318_s15] sm:$0x3] }
  0x1d   : > { %750 = vmatpush1.bf16.msra.mxu1 %v749_v35  ;;  %v537_v59 = vrot.slane %v532_v56, %v536_v55  ;;  %v541_v62 = vrot.slane %v532_v56, %v540_v57 }
  0x1e   : > { %766 = vmatpush1.bf16.msra.mxu0 %v765_v39  ;;  %752 = vmatprep.subr.bf16.mxu1 %v751_v40 }
  0x1f   : > { %768 = vmatprep.subr.bf16.mxu0 %v767_v44 }
  0x21   : > { %754 = vmatpush1.bf16.msra.mxu1 %v753_v47 }
  0x22   : > { %770 = vmatpush1.bf16.msra.mxu0 %v769_v48 }
  0x24   : > { %724 = vmatmul.mubr.msk.f32.vlgmr.msra.gmra.mrb[0].mxu1 %vm365_vm0, %v347_v49 }
  0x25   : > { %726 = vmatmul.mubr.msk.f32.vlgmr.msra.gmra.mrb[0].mxu0 %vm365_vm0, %v329_v50  ;;  %442 = vmatprep.mubr.f32.mxu1 %v825_v0 }
  0x26   : > { %525 = vmatprep.mubr.f32.mxu0 %v825_v0 }
  0x28   : > { %725 = vmatmul.mubr.msk.f32.gmra.mrb[2].mxu1 %vm365_vm0, %v348_v51 }
  0x29   : > { %727 = vmatmul.mubr.msk.f32.gmra.mrb[2].mxu0 %vm365_vm0, %v330_v52 }
  0xf7   : > { %v438_v58 = vpop.f32.mrb[0].mxu1 }
  0xf8   : > { %v521_v60 = vpop.f32.mrb[0].mxu0  ;;  %v440_v61 = vpop.f32.mrb[1].mxu1 }
  0xf9   : > { %v522_v63 = vadd.f32 %v521_v60, %v438_v58  ;;  %v523_v0 = vpop.f32.mrb[1].mxu0 }
  0xfa   : > { %v524_v1 = vadd.f32 %v523_v0, %v440_v61 }
  0xfb   : > { %v444_v2 = vpop.f32.mrb[2].mxu1  ;;  %v544_v3 = vadd.f32 %v537_v59, %v522_v63 }
  0xfc   : > { %v527_v4 = vpop.f32.mrb[2].mxu0  ;;  %v446_v5 = vpop.f32.mrb[3].mxu1  ;;  %v545_v6 = vadd.f32 %v541_v62, %v524_v1 }
  0xfd   : > { %v528_v7 = vadd.f32 %v527_v4, %v444_v2  ;;  %v529_v8 = vpop.f32.mrb[3].mxu0  ;;  %552 = vrot.lane.b32.xlu0 %v544_v3, %s826_s24  ;;  %548 = vst.msk [vmem:[%s327_s23] sm:$0xff] %vm365_vm0, %v544_v3 }
  0xfe   : > { %v530_v9 = vadd.f32 %v529_v8, %v446_v5  ;;  %566 = vrot.lane.b32.xlu1 %v545_v6, %s826_s24  ;;  %730 = vst.msk [vmem:[%s327_s23 + $0x20] sm:$0xff] %vm365_vm0, %v545_v6 }
  0xff   : > { %v546_v10 = vadd.f32 %v537_v59, %v528_v7 }
 0x100   : > { %v547_v11 = vadd.f32 %v541_v62, %v530_v9 }
 0x101   : > { %549 = vst.msk [vmem:[%s327_s23 + $0x8] sm:$0xff] %vm365_vm0, %v546_v10  ;;  %554 = vrot.lane.b32.xlu0 %v546_v10, %s826_s24 }
 0x102   : > { %731 = vst.msk [vmem:[%s327_s23 + $0x28] sm:$0xff] %vm365_vm0, %v547_v11  ;;  %568 = vrot.lane.b32.xlu1 %v547_v11, %s826_s24 }
 0x16f   : > { %v553_v12 = vpop.permute.xlu0 %552 }
 0x170   : > { %728 = vst.msk [vmem:[%s327_s23 + $0x10] sm:$0xff] %vm365_vm0, %v553_v12  ;;  %v567_v13 = vpop.permute.xlu1 %566 }
 0x171   : > { %732 = vst.msk [vmem:[%s327_s23 + $0x30] sm:$0xff] %vm365_vm0, %v567_v13 }
 0x173   : > { %v555_v14 = vpop.permute.xlu0 %554 }
 0x174   : > { %729 = vst.msk [vmem:[%s327_s23 + $0x18] sm:$0xff] %vm365_vm0, %v555_v14  ;;  %v569_v15 = vpop.permute.xlu1 %568 }
 0x175   : > { %733 = vst.msk [vmem:[%s327_s23 + $0x38] sm:$0xff] %vm365_vm0, %v569_v15 }
 0x176 PF: > { %s15_s20 = sadd.s32 1, %s823_s20   ;;  %s971_s18 = smov %s819_s19 }
 0x177   : > { %p12_p5 = scmp.ge.s32.totalorder %s15_s20, 4   ;;  %s972_s19 = smov %s974_s21 }
 0x179   :  { %14 = sbr.rel (!%p12_p5) target bundleno = 2 (0x2), region = 85 }

// kernel: bilstm_forward.9
= control target key start
LH: loop header
LB: loop body
LE: loop exit
PB: predicated region body
PF: predicated region fallthrough
CT: control target
= control target key end

     0   :  { %vm52_vm0 = vcmask 523264   ;;  %vm256_vm1 = vcmask 7168   ;;  %s485_s3 = inlined_call_operand.vmem [shape: f32[64,1], index: 3, kind: input, shape index: {}]   ;;  %s486_s2 = inlined_call_operand.vmem [shape: f32[64,1], index: 2, kind: input, shape index: {}]   ;;  %s487_s1 = inlined_call_operand.vmem [shape: f32[16,64], index: 1, kind: input, shape index: {}]   ;;  %s488_s0 = inlined_call_operand.vmem [shape: f32[16,64], index: 0, kind: input, shape index: {}]   ;;  %s489_s4 = inlined_call_operand.<no memory space> [shape: f32[1,1], index: 4, kind: input, shape index: {}]   ;;  %s490_s5 = inlined_call_operand.<no memory space> [shape: f32[1,1], index: 5, kind: input, shape index: {}]   ;;  %s491_s6 = inlined_call_operand.<no memory space> [shape: f32[1,1], index: 6, kind: input, shape index: {}]   ;;  %s492_s7 = inlined_call_operand.vmem [shape: f32[16,1], index: 7, kind: output, shape index: {}]  }
   0x1   :  { %v44_v0 = vld [vmem:[%s485_s3] sm:$0xff]  ;;  %v45_v1 = vld [vmem:[%s485_s3 + $0x8] sm:$0xff]  ;;  %v46_v5 = vld [vmem:[%s485_s3 + $0x10] sm:$0xff]  ;;  %v12_v28 = vstv %s489_s4 }
   0x2   :  { %v34_v2 = vld [vmem:[%s486_s2] sm:$0xff]  ;;  %v328_v3 = vpack.c.bf16 %v45_v1, %v44_v0  ;;  %v35_v4 = vld [vmem:[%s486_s2 + $0x8] sm:$0xff]  ;;  %v47_v6 = vld [vmem:[%s485_s3 + $0x18] sm:$0xff]  ;;  %13 = vst [vmem:[#allocation2] sm:$0x1] %v12_v28  ;;  %v14_v29 = vstv %s490_s5 }
   0x3   :  { %v344_v7 = vpack.c.bf16 %v35_v4, %v34_v2  ;;  %v332_v8 = vpack.c.bf16 %v47_v6, %v46_v5  ;;  %v36_v9 = vld [vmem:[%s486_s2 + $0x10] sm:$0xff]  ;;  %v37_v10 = vld [vmem:[%s486_s2 + $0x18] sm:$0xff]  ;;  %v48_v11 = vld [vmem:[%s485_s3 + $0x20] sm:$0xff]  ;;  %v16_v30 = vstv %s491_s6  ;;  %15 = vst [vmem:[#allocation3] sm:$0x1] %v14_v29 }
   0x4   :  { %329 = vmatprep.subr.bf16.mxu1 %v328_v3  ;;  %v348_v12 = vpack.c.bf16 %v37_v10, %v36_v9  ;;  %v49_v13 = vld [vmem:[%s485_s3 + $0x28] sm:$0xff]  ;;  %v38_v14 = vld [vmem:[%s486_s2 + $0x20] sm:$0xff]  ;;  %v50_v19 = vld [vmem:[%s485_s3 + $0x30] sm:$0xff]  ;;  %17 = vst [vmem:[#allocation4] sm:$0x1] %v16_v30 }
   0x5   :  { %v39_v15 = vld [vmem:[%s486_s2 + $0x28] sm:$0xff]  ;;  %345 = vmatprep.subr.bf16.mxu0 %v344_v7  ;;  %331 = vmatpush3.bf16.msra.mxu1 %v328_v3  ;;  %v336_v16 = vpack.c.bf16 %v49_v13, %v48_v11  ;;  %v42_v17 = vld [vmem:[%s487_s1] sm:$0xff]  ;;  %v51_v20 = vld [vmem:[%s485_s3 + $0x38] sm:$0xff] }
   0x6   :  { %347 = vmatpush3.bf16.msra.mxu0 %v344_v7  ;;  %333 = vmatprep.subr.bf16.mxu1 %v332_v8  ;;  %v352_v18 = vpack.c.bf16 %v39_v15, %v38_v14  ;;  %v32_v21 = vld [vmem:[%s488_s0] sm:$0xff]  ;;  %v40_v22 = vld [vmem:[%s486_s2 + $0x30] sm:$0xff]  ;;  %v41_v23 = vld [vmem:[%s486_s2 + $0x38] sm:$0xff]  ;;  %v340_v24 = vpack.c.bf16 %v51_v20, %v50_v19 }
   0x7   :  { %349 = vmatprep.subr.bf16.mxu0 %v348_v12  ;;  %306 = vmatprep.mubr.msk.f32.mxu1 %vm52_vm0, %v42_v17  ;;  %v356_v25 = vpack.c.bf16 %v41_v23, %v40_v22  ;;  %v43_v26 = vld [vmem:[%s487_s1 + $0x8] sm:$0xff] }
   0x8   :  { %325 = vmatprep.mubr.msk.f32.mxu0 %vm52_vm0, %v32_v21  ;;  %v33_v27 = vld [vmem:[%s488_s0 + $0x8] sm:$0xff] }
   0x9   :  { %335 = vmatpush3.bf16.msra.mxu1 %v332_v8  ;;  %v267_v33 = vld [vmem:[#allocation2] ss:$0 sm:$0xff] }
   0xa   :  { %351 = vmatpush3.bf16.msra.mxu0 %v348_v12  ;;  %337 = vmatprep.subr.bf16.mxu1 %v336_v16  ;;  %v268_v47 = vld [vmem:[#allocation3] ss:$0 sm:$0xff] }
   0xb   :  { %353 = vmatprep.subr.bf16.mxu0 %v352_v18  ;;  %v269_v50 = vld [vmem:[#allocation4] ss:$0 sm:$0xff] }
   0xd   :  { %339 = vmatpush3.bf16.msra.mxu1 %v336_v16 }
   0xe   :  { %355 = vmatpush3.bf16.msra.mxu0 %v352_v18  ;;  %341 = vmatprep.subr.bf16.mxu1 %v340_v24 }
   0xf   :  { %357 = vmatprep.subr.bf16.mxu0 %v356_v25 }
  0x11   :  { %343 = vmatpush3.bf16.msra.mxu1 %v340_v24 }
  0x12   :  { %359 = vmatpush3.bf16.msra.mxu0 %v356_v25 }
  0x14   :  { %307 = vmatmul.mubr.msk.f32.vlgmr.msra.gmra.mrb[0].mxu1 %vm52_vm0, %v43_v26 }
  0x15   :  { %326 = vmatmul.mubr.msk.f32.vlgmr.msra.gmra.mrb[0].mxu0 %vm52_vm0, %v33_v27 }
  0xe7   :  { %v308_v31 = vpop.f32.mrb[0].mxu1 }
  0xe8   :  { %v327_v32 = vpop.f32.mrb[0].mxu0  ;;  %v125_v34 = vpop.f32.mrb[1].mxu1 }
  0xe9   :  { %v212_v35 = vadd.f32 %v327_v32, %v308_v31  ;;  %v206_v36 = vpop.f32.mrb[1].mxu0 }
  0xea   :  { %v207_v37 = vadd.f32 %v206_v36, %v125_v34 }
  0xeb   :  { %v223_v38 = vadd.f32 %v267_v33, %v212_v35 }
  0xec   :  { %v222_v39 = vadd.f32 %v267_v33, %v207_v37 }
  0xed   :  { %v227_v40 = vsub.f32 %v223_v38, %v223_v38 }
  0xee   :  { %v226_v41 = vsub.f32 %v222_v39, %v222_v39 }
  0xef   :  { %v229_v42 = vmul.f32 %v227_v40, %v227_v40 }
  0xf0   :  { %v228_v43 = vmul.f32 %v226_v41, %v226_v41 }
  0xf1   :  { %v233_v44 = vadd.f32 1e-05, %v229_v42 }
  0xf2   :  { %v232_v45 = vadd.f32 1e-05, %v228_v43 }
  0xf3   :  { %362 = vrsqrt.f32 %v233_v44 }
  0xf4   :  { %364 = vrsqrt.f32 %v232_v45 }
  0xfd   :  { %v363_v46 = vpop.eup %362 }
  0xfe   :  { %v365_v48 = vpop.eup %364  ;;  %v237_v49 = vmul.f32 %v363_v46, %v227_v40 }
  0xff   :  { %v236_v51 = vmul.f32 %v365_v48, %v226_v41 }
 0x100   :  { %v246_v52 = vmul.f32 %v268_v47, %v237_v49 }
 0x101   :  { %v245_v53 = vmul.f32 %v268_v47, %v236_v51 }
 0x102   :  { %v255_v54 = vadd.f32 %v269_v50, %v246_v52 }
 0x103   :  { %v254_v55 = vadd.f32 %v269_v50, %v245_v53 }
 0x104   :  { %258 = vst.msk [vmem:[%s492_s7 + $0x8] sm:$0xff] %vm256_vm1, %v255_v54 }
 0x105   :  { %257 = vst.msk [vmem:[%s492_s7] sm:$0xff] %vm256_vm1, %v254_v55 }

// kernel: bilstm_forward.6
= control target key start
LH: loop header
LB: loop body
LE: loop exit
PB: predicated region body
PF: predicated region fallthrough
CT: control target
= control target key end

     0   :  { %s3750_s0 = inlined_call_operand.vmem [shape: s32[2,1], index: 0, kind: input, shape index: {}]   ;;  %s3751_s1 = inlined_call_operand.vmem [shape: f32[2,4,8,2,64], index: 1, kind: input, shape index: {}]   ;;  %s3752_s2 = inlined_call_operand.hbm [shape: f32[2,4,64,64], index: 2, kind: input, shape index: {}]   ;;  %s3753_s3 = inlined_call_operand.vmem [shape: f32[2,8,2,64], index: 3, kind: output, shape index: {}]  }
   0x1   :  { %3754 = sst [smem:[#allocation8_spill]] %s3751_s1 }
   0x2   :  { %8 = vsyncpa [#allocation6], 0 }
   0x3   :  { %10 = vsyncpa [#allocation6 + $0x1], 0  ;;  %s3202_s12 = smov 0   ;;  %s3204_s13 = smov 0  }
   0x4   :  { %s3206_s14 = smov 0   ;;  %s3208_s15 = smov 0  }
   0x5   :  { %s3210_s16 = smov 0   ;;  %s3212_s17 = smov 0  }
   0x6   :  { %s3214_s18 = smov 0   ;;  %s3216_s19 = smov 0  }
   0x7   :  { %s3218_s20 = smov 0   ;;  %s3220_s21 = smov 0  }
   0x8 LB: > { %s2091_s22 = sadd.s32 4294967295, %s3172_s21   ;;  %s25_s23 = sadd.s32 1, %s3164_s19  ;;  %s3172_s21 = sphi %s3220_s21, %s16_s21   ;;  %s3168_s20 = sphi %s3218_s20, %s3767_s20   ;;  %s3164_s19 = sphi %s3216_s19, %s3766_s19   ;;  %s3160_s18 = sphi %s3214_s18, %s3765_s18   ;;  %s3156_s17 = sphi %s3212_s17, %s3764_s17   ;;  %s3152_s16 = sphi %s3210_s16, %s3763_s16   ;;  %s3148_s15 = sphi %s3208_s15, %s3762_s15   ;;  %s3144_s14 = sphi %s3206_s14, %s3761_s14   ;;  %s3140_s13 = sphi %s3204_s13, %s3760_s13   ;;  %s3136_s12 = sphi %s3202_s12, %s3759_s12  }
   0x9   : > { %p26_p0 = scmp.ge.s32.totalorder %s25_s23, 2  ;;  %s28_s24 = sadd.s32 1, %s3168_s20 }
   0xa   : > { %s53_s25 = ssub.s32 1, %s3168_s20  ;;  %s55_s26 = ssub.s32 1, %s3164_s19 }
   0xb   : > { %s3769_s23 = smov (%p26_p0, %s25_s23), 0  ;;  %s3771_s24 = smov (!%p26_p0, %s28_s24), %s3168_s20 }
   0xc   : > { %s54_s27 = smul.u32 %s3164_s19, %s53_s25  ;;  %s60_s28 = ssub.s32 1, %s3769_s23 }
   0xd   : > { %p30_p1 = scmp.ge.s32.totalorder %s3771_s24, 2  ;;  %s56_s29 = smul.u32 %s3168_s20, %s55_s26 }
   0xe   : > { %s68_s30 = sadd.s32 1, %s3152_s16  ;;  %p75_p2 = scmp.ne.s32.totalorder %s3152_s16, %s3148_s15 }
   0xf   : > { %s3773_s24 = smov (%p30_p1, %s3771_s24), 0  ;;  %s57_s4 = sadd.s32 %s56_s29, %s54_s27 }
  0x10   : > { %p76_p3 = scmp.eq.s32.totalorder %s3172_s21, 0  ;;  %s58_s5 = ssub.s32 1, %s3773_s24 }
  0x11   : > { %s61_s6 = smul.u32 %s60_s28, %s3773_s24  ;;  %s63_s8 = ssub.s32 %s3168_s20, %s3773_s24 }
  0x12   : > { %s59_s7 = smul.u32 %s58_s5, %s3769_s23  ;;  %p3276_p4 = por %p76_p3, %p75_p2 }
  0x13   : > { %p92_p5 = scmp.eq.s32.totalorder %s63_s8, 0  ;;  %s94_s11 = sadd.s32 1, %s3144_s14 }
  0x14   : > { %s62_s10 = sadd.s32 %s61_s6, %s59_s7  ;;  %p101_p6 = scmp.ne.s32.totalorder %s3144_s14, %s3140_s13 }
  0x15   : > { %s64_s25 = ssub.s32 %s57_s4, %s62_s10  ;;  %p107_p7 = scmp.ne.s32.totalorder %s3140_s13, %s3136_s12 }
  0x16   : > { %s65_s26 = sor.u32 %s64_s25, %s63_s8  ;;  %p3287_p9 = por %p101_p6, %p76_p3 }
  0x17   : > { %p66_p8 = scmp.eq.s32.totalorder %s65_s26, 0  ;;  %p108_p10 = scmp.eq.s32.totalorder %s2091_s22, 0 }
  0x18   : > { %s3292_s28 = scalar_select %p92_p5, %s3144_s14, %s94_s11  }
  0x19   : > { %s3295_s29 = scalar_select %p66_p8, %s3152_s16, %s68_s30  }
  0x1a   : > { %p3299_p11 = por %p108_p10, %p107_p7  ;;  %p2094_p12 = scmp.ge.s32.totalorder %s3172_s21, 4 }
  0x1c   : > { %168 = sbr.rel (%p2094_p12) target bundleno = 73 (0x49), region = 20 }
  0x23   : > { %171 = sbr.rel (!%p3276_p4) target bundleno = 47 (0x2f), region = 24  ;;  %s173_s12 = sand.u32 (%p3276_p4), 1, %s3152_s16  }
  0x24   : > { %s2096_s6 = sshll.u32 (%p3276_p4), %s57_s4, 2  ;;  %s2095_s7 = sshll.u32 (%p3276_p4), %s173_s12, 5 }
  0x25   : > { %s2097_s8 = sshll.u32 (%p3276_p4), %s3168_s20, 5  ;;  %s3758_s1 = sld [smem:[#allocation8_spill]] (%p3276_p4) }
  0x26   : > { %s183_s30 = sadd.s32 (%p3276_p4), %s2097_s8, %s2096_s6  ;;  %s175_s26 = scalar_lea.vmem (%p3276_p4), [#allocation4], %s2095_s7 }
  0x27   : > { %s2098_s10 = sshll.u32 (%p3276_p4), %s183_s30, 1 }
  0x2b   : > { %s185_s25 = scalar_lea.vmem %s3758_s1, %s2098_s10 }
  0x2c   : > { %v201_v0 = vld [vmem:[%s185_s25] sm:$0xff]   ;;  %v209_v1 = vld [vmem:[%s185_s25 + $0x10] sm:$0xff]  }
  0x2d   : > { %v217_v2 = vld [vmem:[%s185_s25 + $0x20] sm:$0xff]   ;;  %202 = vst [vmem:[%s175_s26] sm:$0xff] %v201_v0   ;;  %210 = vst [vmem:[%s175_s26 + $0x8] sm:$0xff] %v209_v1   ;;  %v225_v3 = vld [vmem:[%s185_s25 + $0x30] sm:$0xff]  }
  0x2e   : > { %218 = vst [vmem:[%s175_s26 + $0x10] sm:$0xff] %v217_v2   ;;  %226 = vst [vmem:[%s175_s26 + $0x18] sm:$0xff] %v225_v3  }
  0x2f PF: > { %s288_s4 = sand.u32 1, %s3144_s14   ;;  %s2266_s9 = sshll.u32 %s3168_s20, 12 }
  0x30   : > { %s2099_s12 = sshll.u32 %s288_s4, 8  ;;  %s3316_s30 = scalar_lea.hbm %s3752_s2, %s2266_s9 }
  0x31   : > { %s292_s7 = scalar_lea.vmem [#allocation5], %s2099_s12  ;;  %s3320_s11 = scalar_lea.sflag [#allocation6], %s288_s4 }
  0x32   : > { %s299_s10 = sshll.u32 %s292_s7, 4  ;;  %s3062_s22 = scalar_lea.hbm %s3316_s30, 4096  ;;  %s3318_s10 = int_to_ptr.vmem [resolvable:$true] %s299_s10 }
  0x33   : > { %p3063_p13 = scmp.ne.s32.totalorder %s3316_s30, %s3062_s22  ;;  %s3066_s9 = scalar_lea.hbm %s3752_s2, 8192 }
  0x34   : > { %p3067_p2 = scmp.lt.u32.totalorder %s3316_s30, %s3752_s2  ;;  %p3068_p3 = scmp.lt.u32.totalorder %s3066_s9, %s3062_s22 }
  0x35   : > { %p3064_p0 = pnand %p3063_p13, %p3287_p9  ;;  %p3070_p5 = scmp.lt.u32.totalorder %s3062_s22, %s3316_s30 }
  0x36   : > { %p3069_p4 = por %p3068_p3, %p3067_p2 }
  0x37   : > { %p3065_p1 = pneg %p3064_p0 }
  0x38   : > { %p3071_p6 = por %p3070_p5, %p3069_p4 }
  0x3a   : > { %p3072_p7 = pnand %p3071_p6, %p3065_p1 }
  0x3c   : > { %3075 = shalt.err (!%p3072_p7)
}
  0x3d   : > { %s3076_s4 = scalar_lea.vmem %s3318_s10, 4096  ;;  %s3174_s12 = smov [#allocation5]  }
  0x3e   : > { %p3077_p8 = scmp.ne.s32.totalorder %s3318_s10, %s3076_s4  ;;  %s3080_s7 = sshll.u32 %s3174_s12, 4  ;;  %s3081_s7 = int_to_ptr.vmem [resolvable:$false] %s3080_s7 }
  0x3f   : > { %s3082_s25 = scalar_lea.vmem %s3081_s7, 8192  ;;  %p3083_p13 = scmp.lt.s32.totalorder %s3318_s10, %s3081_s7 }
  0x40   : > { %p3078_p10 = pnand %p3077_p8, %p3287_p9  ;;  %p3084_p0 = scmp.lt.s32.totalorder %s3082_s25, %s3076_s4 }
  0x42   : > { %p3079_p12 = pneg %p3078_p10  ;;  %p3085_p2 = por %p3084_p0, %p3083_p13 }
  0x44   : > { %p3086_p3 = pnand %p3085_p2, %p3079_p12 }
  0x46   : > { %3089 = shalt.err (!%p3086_p3)
}
  0x47   : > { %s3175_s22 = smov 128   ;;  %s3176_s26 = smov 8  }
  0x48   : > { %2907 = dma.hbm_to_vmem [thread:$0]  (%p3287_p9), %s3316_s30, 4096, %s3318_s10, %s3320_s11, %s3175_s22, %s3175_s22, %s3176_s26  }
  0x49 PF: > { %p2102_p1 = scmp.ge.s32.totalorder %s3172_s21, 1  ;;  %p307_p4 = scmp.lt.s32.totalorder %s3172_s21, 5 }
  0x4b   : > { %p308_p5 = pnand %p2102_p1, %p307_p4 }
  0x4c   : > { %s314_s9 = sand.u32 (!%p308_p5), 1, %s3148_s15   ;;  %s320_s6 = sand.u32 (!%p308_p5), 1, %s3140_s13  }
  0x4d   : > { %311 = sbr.rel (%p308_p5) target bundleno = 1161 (0x489), region = 69  ;;  %s2103_s8 = sshll.u32 (!%p308_p5), %s314_s9, 5 }
  0x4e   : > { %s2104_s4 = sshll.u32 (!%p308_p5), %s320_s6, 8  ;;  %s3348_s12 = scalar_lea.vmem (!%p308_p5), [#allocation4], %s2103_s8 }
  0x4f   : > { %s321_s7 = scalar_lea.sflag (!%p308_p5), [#allocation6], %s320_s6  ;;  %s3350_s25 = scalar_lea.vmem (!%p308_p5), [#allocation5], %s2104_s4 }
  0x54   : > { %3131 = dma.done.wait (%p3299_p11), %s321_s7, 4096  }
  0x55   : > { %3133 = vsyncadd (%p3299_p11), %s321_s7, 4294963200  ;;  %s3357_s15 = ssub.s32 1, %s3160_s18  ;;  %s368_s27 = ssub.s32 1, %s3156_s17 }
  0x56   : > { %s367_s30 = smul.u32 %s3156_s17, %s3357_s15  ;;  %p372_p9 = scmp.lt.s32.totalorder %s3160_s18, 1 }
  0x57   : > { %s369_s10 = smul.u32 %s3160_s18, %s368_s27  ;;  %p2108_p6 = scmp.ne.s32.totalorder %s3156_s17, 0 }
  0x58   : > { %s373_s11 = scalar_select %p372_p9, %s3160_s18, 1 }
  0x59   : > { %s370_s22 = sadd.s32 %s369_s10, %s367_s30  ;;  %vm390_vm0 = vcmask (!%p2108_p6), 517120   ;;  %v3177_v4 = vmov (!%p2108_p6), 0.0  }
  0x5a   : > { %s3365_s26 = sshll.u32 %s370_s22, 2  ;;  %s2106_s5 = sshll.u32 %s373_s11, 3  ;;  %391 = vst.msk [vmem:[#allocation2] sm:$0x3] (!%p2108_p6), %vm390_vm0, %v3177_v4  ;;  %392 = vst.msk [vmem:[#allocation3] sm:$0x3] (!%p2108_p6), %vm390_vm0, %v3177_v4 }
  0x5b   : > { %p374_p11 = scmp.lt.s32.totalorder %s3365_s26, 7  ;;  %389 = sbr.rel (%p2108_p6) target bundleno = 98 (0x62), region = 81 }
  0x5d   : > { %s375_s9 = scalar_select %p374_p11, %s3365_s26, 7 }
  0x5f   : > { %s377_s6 = sadd.s32 %s2106_s5, %s375_s9 }
  0x60   : > { %s2107_s8 = sshll.u32 %s377_s6, 1 }
  0x61   : > { %s3372_s1 = scalar_lea.vmem %s3753_s3, %s2107_s8 }
  0x62 PF: > { %v407_v5 = vld [vmem:[%s3350_s25] sm:$0xff]  ;;  %v408_v6 = vld [vmem:[%s3350_s25 + $0x8] sm:$0xff]  ;;  %v3178_v8 = vmov 0.0|0.0   ;;  %v409_v11 = vld [vmem:[%s3350_s25 + $0x10] sm:$0xff]  ;;  %vm3179_vm1 = vmmov 0   ;;  %v3180_v16 = vmov 0.0  }
  0x63   : > { %v2113_v7 = vld [vmem:[%s3350_s25 + $0x40] sm:$0xff]  ;;  %2715 = vmatprep.subr.bf16.mxu0 %v3178_v8  ;;  %2727 = vmatprep.subr.bf16.mxu1 %v3178_v8  ;;  %v3380_v9 = vpack.c.bf16 %v408_v6, %v407_v5  ;;  %v2114_v10 = vld [vmem:[%s3350_s25 + $0x48] sm:$0xff]  ;;  %v410_v12 = vld [vmem:[%s3350_s25 + $0x18] sm:$0xff]  ;;  %s402_s17 = smul.u32 3, %s3160_s18  ;;  %s2145_s27 = sshll.u32 %s3160_s18, 1  ;;  %v3181_v18 = vmov 0  }
  0x64   : > { %v3385_v13 = vpack.c.bf16 %v2114_v10, %v2113_v7  ;;  %v2115_v14 = vld [vmem:[%s3350_s25 + $0x50] sm:$0xff]  ;;  %v2116_v15 = vld [vmem:[%s3350_s25 + $0x58] sm:$0xff]  ;;  %2427 = vmatprep.mubr.msk.f32.mxu0 %vm3179_vm1, %v3180_v16  ;;  %2446 = vmatprep.mubr.msk.f32.mxu1 %vm3179_vm1, %v3180_v16  ;;  %v3396_v17 = vpack.c.bf16 %v410_v12, %v409_v11  ;;  %s3400_s30 = sadd.s32 %s2145_s27, %s3357_s15  ;;  %v411_v20 = vld [vmem:[%s3350_s25 + $0x20] sm:$0xff]  ;;  %vm415_vm4 = vcmask 523264   ;;  %vm774_vm6 = vcmask 517120   ;;  %s2187_s8 = sshll.u32 %s3357_s15, 1 }
  0x65   : > { %2717 = vmatpush3.bf16.msra.mxu0 %v3380_v9  ;;  %2996 = vset.pattern.permute.xlu0 %v3181_v18  ;;  %v3404_v19 = vpack.c.bf16 %v2116_v15, %v2115_v14  ;;  %v412_v21 = vld [vmem:[%s3350_s25 + $0x28] sm:$0xff]  ;;  %v2117_v22 = vld [vmem:[%s3350_s25 + $0x60] sm:$0xff]  ;;  %s403_s10 = sadd.s32 %s3365_s26, %s402_s17  ;;  %s778_s11 = sadd.s32 %s3365_s26, %s3400_s30  ;;  %v413_v26 = vld [vmem:[%s3350_s25 + $0x30] sm:$0xff] }
  0x66   : > { %2729 = vmatpush3.bf16.msra.mxu1 %v3385_v13  ;;  %2718 = vmatprep.subr.bf16.mxu0 %v3178_v8  ;;  %v2118_v23 = vld [vmem:[%s3350_s25 + $0x68] sm:$0xff]  ;;  %v3416_v24 = vpack.c.bf16 %v412_v21, %v411_v20  ;;  %v414_v27 = vld [vmem:[%s3350_s25 + $0x38] sm:$0xff]  ;;  %v2119_v28 = vld [vmem:[%s3350_s25 + $0x70] sm:$0xff]  ;;  %v763_v30 = vstv %s403_s10  ;;  %s1516_s4 = smul.u32 3, %s3357_s15  ;;  %s3594_s7 = sadd.s32 %s3160_s18, %s2187_s8 }
  0x67   : > { %2730 = vmatprep.subr.bf16.mxu1 %v3178_v8  ;;  %2997 = vset.pattern.permute.xlu1 %v3181_v18  ;;  %v3420_v25 = vpack.c.bf16 %v2118_v23, %v2117_v22  ;;  %v2120_v29 = vld [vmem:[%s3350_s25 + $0x78] sm:$0xff]  ;;  %v1134_v31 = vstv %s778_s11  ;;  %v3428_v32 = vpack.c.bf16 %v414_v27, %v413_v26  ;;  %v2123_v35 = vld [vmem:[%s3350_s25 + $0x80] sm:$0xff]  ;;  %v2124_v36 = vld [vmem:[%s3350_s25 + $0x88] sm:$0xff]  ;;  %s1148_s17 = sadd.s32 %s3365_s26, %s3594_s7  ;;  %s2146_s10 = sshll.u32 %s3400_s30, 1 }
  0x68   : > { %v3433_v33 = vld [vmem:[%s3750_s0] sm:$0x3]  ;;  %v3437_v34 = vpack.c.bf16 %v2120_v29, %v2119_v28  ;;  %v2133_v37 = vld [vmem:[%s3350_s25 + $0xc0] sm:$0xff]  ;;  %v2134_v38 = vld [vmem:[%s3350_s25 + $0xc8] sm:$0xff]  ;;  %v3450_v41 = vpack.c.bf16 %v2124_v36, %v2123_v35  ;;  %s1517_s27 = sadd.s32 %s3365_s26, %s1516_s4  ;;  %s780_s11 = scalar_lea.vmem %s3348_s12, %s2146_s10 [#allocation4] }
  0x69   : > { %2720 = vmatpush3.bf16.msra.mxu0 %v3396_v17  ;;  %vm764_vm2 = vcmp.lt.s32.totalorder %v763_v30, %v3433_v33  ;;  %vm1135_vm3 = vcmp.lt.s32.totalorder %v1134_v31, %v3433_v33  ;;  %v3448_v40 = vld [vmem:[#allocation2] sm:$0x3]  ;;  %v3455_v43 = vpack.c.bf16 %v2134_v38, %v2133_v37  ;;  %v2125_v44 = vld [vmem:[%s3350_s25 + $0x90] sm:$0xff]  ;;  %v2127_v50 = vld [vmem:[%s3350_s25 + $0xa0] sm:$0xff]  ;;  %s2188_s26 = sshll.u32 %s3594_s7, 1  ;;  %s2229_s5 = smul.u32 6, %s3357_s15 }
  0x6a   : > { %2732 = vmatpush3.bf16.msra.mxu1 %v3404_v19  ;;  %2721 = vmatprep.subr.bf16.mxu0 %v3178_v8  ;;  %v765_v39 = vsel %vm764_vm2, 1, %v3181_v18  ;;  %v1136_v42 = vsel %vm1135_vm3, 1, %v3181_v18  ;;  %v2126_v45 = vld [vmem:[%s3350_s25 + $0x98] sm:$0xff]  ;;  %v2135_v46 = vld [vmem:[%s3350_s25 + $0xd0] sm:$0xff]  ;;  %v2128_v51 = vld [vmem:[%s3350_s25 + $0xa8] sm:$0xff]  ;;  %s1150_s30 = scalar_lea.vmem %s3348_s12, %s2188_s26 [#allocation4]  ;;  %s1514_s22 = scalar_lea.vmem %s3372_s1, %s2188_s26 }
  0x6b   : > { %2733 = vmatprep.subr.bf16.mxu1 %v3178_v8  ;;  %767 = vperm.xlu0 %2996, %v765_v39   ;;  %v2136_v47 = vld [vmem:[%s3350_s25 + $0xd8] sm:$0xff]  ;;  %v3467_v48 = vpack.c.bf16 %v2126_v45, %v2125_v44  ;;  %v2137_v52 = vld [vmem:[%s3350_s25 + $0xe0] sm:$0xff]  ;;  %v2138_v53 = vld [vmem:[%s3350_s25 + $0xe8] sm:$0xff]  ;;  %v3483_v54 = vpack.c.bf16 %v2128_v51, %v2127_v50 }
  0x6c   : > { %v3471_v49 = vpack.c.bf16 %v2136_v47, %v2135_v46  ;;  %v3487_v55 = vpack.c.bf16 %v2138_v53, %v2137_v52  ;;  %v2129_v56 = vld [vmem:[%s3350_s25 + $0xb0] sm:$0xff]  ;;  %v2130_v57 = vld [vmem:[%s3350_s25 + $0xb8] sm:$0xff] }
  0x6d   : > { %2723 = vmatpush3.bf16.msra.mxu0 %v3416_v24  ;;  %v2139_v58 = vld [vmem:[%s3350_s25 + $0xf0] sm:$0xff]  ;;  %v2140_v59 = vld [vmem:[%s3350_s25 + $0xf8] sm:$0xff]  ;;  %v3495_v60 = vpack.c.bf16 %v2130_v57, %v2129_v56  ;;  %s2110_s25 = smul.u32 6, %s3160_s18  ;;  %v1873_v56 = vstv %s1517_s27  ;;  %s1144_s18 = scalar_lea.vmem %s3372_s1, %s2146_s10 }
  0x6e   : > { %2735 = vmatpush3.bf16.msra.mxu1 %v3420_v25  ;;  %2724 = vmatprep.subr.bf16.mxu0 %v3178_v8  ;;  %v3499_v61 = vpack.c.bf16 %v2140_v59, %v2139_v58  ;;  %v401_v30 = vld [vmem:[#allocation3] sm:$0x3]  ;;  %vm1874_vm8 = vcmp.lt.s32.totalorder %v1873_v56, %v3433_v33  ;;  %v781_v59 = vld [vmem:[%s780_s11] sm:$0x3] }
  0x6f   : > { %2736 = vmatprep.subr.bf16.mxu1 %v3178_v8  ;;  %1138 = vperm.xlu0 %2996, %v1136_v42   ;;  %s405_s9 = scalar_lea.vmem %s3348_s12, %s2110_s25 [#allocation4]  ;;  %s773_s6 = scalar_lea.vmem %s3372_s1, %s2110_s25  ;;  %v1875_v58 = vsel %vm1874_vm8, 1, %v3181_v18 }
  0x70   : > { %v406_v62 = vld [vmem:[%s405_s9] sm:$0x3]  ;;  %v2112_v63 = vld [vmem:[%s405_s9 + $0x8] sm:$0x3]  ;;  %v2122_v10 = vld [vmem:[%s405_s9 + $0x10] sm:$0x3]  ;;  %s1519_s25 = scalar_lea.vmem %s3348_s12, %s2229_s5 [#allocation4]  ;;  %s1883_s12 = scalar_lea.vmem %s3372_s1, %s2229_s5 }
  0x71   : > { %2726 = vmatpush3.bf16.msra.mxu0 %v3428_v32  ;;  %v2132_v12 = vld [vmem:[%s405_s9 + $0x18] sm:$0x3] }
  0x72   : > { %2738 = vmatpush3.bf16.msra.mxu1 %v3437_v34  ;;  %2739 = vmatprep.subr.bf16.mxu0 %v3178_v8 }
  0x73   : > { %2751 = vmatprep.subr.bf16.mxu1 %v3178_v8 }
  0x74   : > { %2428 = vmatmul.mubr.msk.f32.vlgmr.msra.gmra.mrb[0].mxu0 %vm415_vm4, %v3448_v40 }
  0x75   : > { %2447 = vmatmul.mubr.msk.f32.vlgmr.msra.gmra.mrb[0].mxu1 %vm415_vm4, %v3448_v40  ;;  %2741 = vmatpush3.bf16.msra.mxu0 %v3450_v41 }
  0x76   : > { %2753 = vmatpush3.bf16.msra.mxu1 %v3455_v43  ;;  %2742 = vmatprep.subr.bf16.mxu0 %v3178_v8 }
  0x77   : > { %2754 = vmatprep.subr.bf16.mxu1 %v3178_v8  ;;  %2465 = vmatprep.mubr.msk.f32.mxu0 %vm3179_vm1, %v3180_v16 }
  0x78   : > { %2484 = vmatprep.mubr.msk.f32.mxu1 %vm3179_vm1, %v3180_v16 }
  0x79   : > { %2744 = vmatpush3.bf16.msra.mxu0 %v3467_v48 }
  0x7a   : > { %2756 = vmatpush3.bf16.msra.mxu1 %v3471_v49  ;;  %2745 = vmatprep.subr.bf16.mxu0 %v3178_v8 }
  0x7b   : > { %2757 = vmatprep.subr.bf16.mxu1 %v3178_v8 }
  0x7d   : > { %2747 = vmatpush3.bf16.msra.mxu0 %v3483_v54 }
  0x7e   : > { %2759 = vmatpush3.bf16.msra.mxu1 %v3487_v55  ;;  %2748 = vmatprep.subr.bf16.mxu0 %v3178_v8 }
  0x7f   : > { %2760 = vmatprep.subr.bf16.mxu1 %v3178_v8 }
  0x81   : > { %2750 = vmatpush3.bf16.msra.mxu0 %v3495_v60 }
  0x82   : > { %2762 = vmatpush3.bf16.msra.mxu1 %v3499_v61  ;;  %2763 = vmatprep.subr.bf16.mxu0 %v3178_v8 }
  0x83   : > { %2775 = vmatprep.subr.bf16.mxu1 %v3178_v8 }
  0x84   : > { %2466 = vmatmul.mubr.msk.f32.vlgmr.msra.gmra.mrb[2].mxu0 %vm415_vm4, %v3448_v40 }
  0x85   : > { %2485 = vmatmul.mubr.msk.f32.vlgmr.msra.gmra.mrb[2].mxu1 %vm415_vm4, %v3448_v40  ;;  %2765 = vmatpush3.bf16.msra.mxu0 %v3380_v9 }
  0x86   : > { %2777 = vmatpush3.bf16.msra.mxu1 %v3385_v13  ;;  %2766 = vmatprep.subr.bf16.mxu0 %v3178_v8 }
  0x87   : > { %2778 = vmatprep.subr.bf16.mxu1 %v3178_v8  ;;  %2503 = vmatprep.mubr.msk.f32.mxu0 %vm3179_vm1, %v3180_v16 }
  0x88   : > { %2522 = vmatprep.mubr.msk.f32.mxu1 %vm3179_vm1, %v3180_v16 }
  0x89   : > { %2768 = vmatpush3.bf16.msra.mxu0 %v3396_v17 }
  0x8a   : > { %2780 = vmatpush3.bf16.msra.mxu1 %v3404_v19  ;;  %2769 = vmatprep.subr.bf16.mxu0 %v3178_v8 }
  0x8b   : > { %2781 = vmatprep.subr.bf16.mxu1 %v3178_v8 }
  0x8d   : > { %2771 = vmatpush3.bf16.msra.mxu0 %v3416_v24 }
  0x8e   : > { %2783 = vmatpush3.bf16.msra.mxu1 %v3420_v25  ;;  %2772 = vmatprep.subr.bf16.mxu0 %v3178_v8 }
  0x8f   : > { %2784 = vmatprep.subr.bf16.mxu1 %v3178_v8 }
  0x91   : > { %2774 = vmatpush3.bf16.msra.mxu0 %v3428_v32 }
  0x92   : > { %2786 = vmatpush3.bf16.msra.mxu1 %v3437_v34  ;;  %2787 = vmatprep.subr.bf16.mxu0 %v3178_v8 }
  0x93   : > { %2799 = vmatprep.subr.bf16.mxu1 %v3178_v8 }
  0xea   : > { %v768_v36 = vpop.permute.xlu0 %767 }
  0xeb   : > { %vm769_vm5 = vcmp.eq.s32.totalorder %v768_v36, 1 }
 0x147   : > { %v485_v0 = vpop.f32.mrb[0].mxu0 }
 0x148   : > { %v489_v1 = vadd.f32 %v485_v0, %v406_v62  ;;  %v568_v2 = vpop.f32.mrb[0].mxu1  ;;  %v2429_v3 = vpop.f32.mrb[1].mxu0  ;;  %v2150_v62 = vld [vmem:[%s780_s11 + $0x8] sm:$0x3] }
 0x149   : > { %v572_v4 = vadd.f32 %v2112_v63, %v568_v2  ;;  %v2448_v5 = vpop.f32.mrb[1].mxu1 }
 0x14a   : > { %v2142_v6 = vmul.f32 -1.442695, %v489_v1 }
 0x14b   : > { %v2143_v7 = vmul.f32 -1.442695, %v572_v4 }
 0x14c   : > { %2998 = vpow2.f32 %v2142_v6 }
 0x14d   : > { %3000 = vpow2.f32 %v2143_v7  ;;  %v2174_v7 = vld [vmem:[%s780_s11 + $0x18] sm:$0x3] }
 0x156   : > { %v2999_v11 = vpop.eup %2998 }
 0x157   : > { %v3001_v14 = vpop.eup %3000  ;;  %v742_v15 = vadd.f32 1.0, %v2999_v11  ;;  %v651_v20 = vpop.f32.mrb[2].mxu0 }
 0x158   : > { %v748_v21 = vadd.f32 1.0, %v3001_v14  ;;  %v655_v22 = vadd.f32 %v2122_v10, %v651_v20  ;;  %v734_v23 = vpop.f32.mrb[2].mxu1  ;;  %v2467_v26 = vpop.f32.mrb[3].mxu0 }
 0x159   : > { %3002 = vrcp.f32 %v742_v15  ;;  %v738_v27 = vadd.f32 %v2132_v12, %v734_v23  ;;  %v2486_v28 = vpop.f32.mrb[3].mxu1 }
 0x15a   : > { %3004 = vrcp.f32 %v748_v21 }
 0x15b   : > { %3006 = vtanh.f32 %v655_v22  ;;  %v2144_v29 = vmul.f32 -1.442695, %v738_v27 }
 0x15d   : > { %3008 = vpow2.f32 %v2144_v29 }
 0x163   : > { %v3003_v31 = vpop.eup %3002 }
 0x164   : > { %v3005_v35 = vpop.eup %3004 }
 0x165   : > { %v3007_v37 = vpop.eup %3006  ;;  %v758_v38 = vmul.f32 %v3005_v35, %v401_v30  ;;  %v1139_v35 = vpop.permute.xlu0 %1138 }
 0x166   : > { %v759_v39 = vmul.f32 %v3007_v37, %v3003_v31  ;;  %vm1140_vm9 = vcmp.eq.s32.totalorder %v1139_v35, 1 }
 0x167   : > { %v3009_v42 = vpop.eup %3008 }
 0x168   : > { %v755_v44 = vadd.f32 1.0, %v3009_v42  ;;  %v760_v45 = vadd.f32 %v759_v39, %v758_v38 }
 0x16a   : > { %3010 = vrcp.f32 %v755_v44  ;;  %v3534_v46 = vsel %vm769_vm5, %v760_v45, %v401_v30 }
 0x16b   : > { %3012 = vtanh.f32 %v760_v45 }
 0x174   : > { %v3011_v47 = vpop.eup %3010 }
 0x175   : > { %v3013_v50 = vpop.eup %3012 }
 0x176   : > { %v762_v51 = vmul.f32 %v3013_v50, %v3011_v47 }
 0x178   : > { %v3540_v52 = vsel %vm769_vm5, %v762_v51, %v3448_v40  ;;  %v772_v53 = vsel %vm769_vm5, %v762_v51, 0.0  ;;  %v1504_v40 = vstv %s1148_s17 }
 0x179   : > { %775 = vst.msk [vmem:[%s773_s6] sm:$0x3] %vm774_vm6, %v772_v53  ;;  %2504 = vmatmul.mubr.msk.f32.vlgmr.msra.gmra.mrb[4].mxu0 %vm415_vm4, %v3540_v52  ;;  %2523 = vmatmul.mubr.msk.f32.vlgmr.msra.gmra.mrb[4].mxu1 %vm415_vm4, %v3540_v52  ;;  %vm1505_vm7 = vcmp.lt.s32.totalorder %v1504_v40, %v3433_v33  ;;  %v2162_v33 = vld [vmem:[%s780_s11 + $0x10] sm:$0x3] }
 0x17a   : > { %2789 = vmatpush3.bf16.msra.mxu0 %v3450_v41  ;;  %2801 = vmatpush3.bf16.msra.mxu1 %v3455_v43  ;;  %v1506_v57 = vsel %vm1505_vm7, 1, %v3181_v18 }
 0x17b   : > { %2790 = vmatprep.subr.bf16.mxu0 %v3178_v8  ;;  %2802 = vmatprep.subr.bf16.mxu1 %v3178_v8 }
 0x17c   : > { %2541 = vmatprep.mubr.msk.f32.mxu0 %vm3179_vm1, %v3180_v16  ;;  %2560 = vmatprep.mubr.msk.f32.mxu1 %vm3179_vm1, %v3180_v16 }
 0x17d   : > { %1508 = vperm.xlu1 %2997, %v1506_v57  }
 0x17e   : > { %2792 = vmatpush3.bf16.msra.mxu0 %v3467_v48  ;;  %2804 = vmatpush3.bf16.msra.mxu1 %v3471_v49 }
 0x17f   : > { %2793 = vmatprep.subr.bf16.mxu0 %v3178_v8  ;;  %2805 = vmatprep.subr.bf16.mxu1 %v3178_v8 }
 0x181   : > { %1877 = vperm.xlu1 %2997, %v1875_v58  }
 0x182   : > { %2795 = vmatpush3.bf16.msra.mxu0 %v3483_v54  ;;  %2807 = vmatpush3.bf16.msra.mxu1 %v3487_v55 }
 0x183   : > { %2796 = vmatprep.subr.bf16.mxu0 %v3178_v8  ;;  %2808 = vmatprep.subr.bf16.mxu1 %v3178_v8 }
 0x186   : > { %2798 = vmatpush3.bf16.msra.mxu0 %v3495_v60  ;;  %2810 = vmatpush3.bf16.msra.mxu1 %v3499_v61 }
 0x187   : > { %2811 = vmatprep.subr.bf16.mxu0 %v3178_v8  ;;  %2823 = vmatprep.subr.bf16.mxu1 %v3178_v8 }
 0x189   : > { %2542 = vmatmul.mubr.msk.f32.vlgmr.msra.gmra.mrb[6].mxu0 %vm415_vm4, %v3540_v52  ;;  %2561 = vmatmul.mubr.msk.f32.vlgmr.msra.gmra.mrb[6].mxu1 %vm415_vm4, %v3540_v52 }
 0x18a   : > { %2813 = vmatpush3.bf16.msra.mxu0 %v3380_v9  ;;  %2825 = vmatpush3.bf16.msra.mxu1 %v3385_v13 }
 0x18b   : > { %2814 = vmatprep.subr.bf16.mxu0 %v3178_v8  ;;  %2826 = vmatprep.subr.bf16.mxu1 %v3178_v8 }
 0x18c   : > { %2579 = vmatprep.mubr.msk.f32.mxu0 %vm3179_vm1, %v3180_v16  ;;  %2598 = vmatprep.mubr.msk.f32.mxu1 %vm3179_vm1, %v3180_v16 }
 0x18e   : > { %2816 = vmatpush3.bf16.msra.mxu0 %v3396_v17  ;;  %2828 = vmatpush3.bf16.msra.mxu1 %v3404_v19 }
 0x18f   : > { %2817 = vmatprep.subr.bf16.mxu0 %v3178_v8  ;;  %2829 = vmatprep.subr.bf16.mxu1 %v3178_v8 }
 0x192   : > { %2819 = vmatpush3.bf16.msra.mxu0 %v3416_v24  ;;  %2831 = vmatpush3.bf16.msra.mxu1 %v3420_v25 }
 0x193   : > { %2820 = vmatprep.subr.bf16.mxu0 %v3178_v8  ;;  %2832 = vmatprep.subr.bf16.mxu1 %v3178_v8 }
 0x196   : > { %2822 = vmatpush3.bf16.msra.mxu0 %v3428_v32  ;;  %2834 = vmatpush3.bf16.msra.mxu1 %v3437_v34 }
 0x197   : > { %2835 = vmatprep.subr.bf16.mxu0 %v3178_v8  ;;  %2847 = vmatprep.subr.bf16.mxu1 %v3178_v8 }
 0x24c   : > { %v859_v63 = vpop.f32.mrb[4].mxu0  ;;  %v941_v0 = vpop.f32.mrb[4].mxu1 }
 0x24d   : > { %v863_v1 = vadd.f32 %v859_v63, %v781_v59  ;;  %v945_v2 = vadd.f32 %v2150_v62, %v941_v0  ;;  %v2505_v3 = vpop.f32.mrb[5].mxu0  ;;  %v2524_v4 = vpop.f32.mrb[5].mxu1 }
 0x24f   : > { %v2184_v5 = vmul.f32 -1.442695, %v863_v1  ;;  %v2185_v6 = vmul.f32 -1.442695, %v945_v2 }
 0x251   : > { %3014 = vpow2.f32 %v2184_v5 }
 0x252   : > { %3016 = vpow2.f32 %v2185_v6  ;;  %v1509_v6 = vpop.permute.xlu1 %1508 }
 0x253   : > { %vm1510_vm10 = vcmp.eq.s32.totalorder %v1509_v6, 1 }
 0x25b   : > { %v3015_v10 = vpop.eup %3014 }
 0x25c   : > { %v3017_v18 = vpop.eup %3016  ;;  %v1113_v11 = vadd.f32 1.0, %v3015_v10  ;;  %v1023_v12 = vpop.f32.mrb[6].mxu0 }
 0x25d   : > { %v1105_v14 = vpop.f32.mrb[6].mxu1  ;;  %v1119_v15 = vadd.f32 1.0, %v3017_v18  ;;  %v1027_v20 = vadd.f32 %v2162_v33, %v1023_v12  ;;  %v2543_v22 = vpop.f32.mrb[7].mxu0 }
 0x25e   : > { %v1109_v21 = vadd.f32 %v2174_v7, %v1105_v14  ;;  %v2562_v23 = vpop.f32.mrb[7].mxu1  ;;  %3018 = vrcp.f32 %v1113_v11 }
 0x25f   : > { %3020 = vrcp.f32 %v1119_v15 }
 0x260   : > { %v2186_v26 = vmul.f32 -1.442695, %v1109_v21  ;;  %3022 = vtanh.f32 %v1027_v20 }
 0x262   : > { %3024 = vpow2.f32 %v2186_v26 }
 0x268   : > { %v3019_v27 = vpop.eup %3018 }
 0x269   : > { %v3021_v28 = vpop.eup %3020 }
 0x26a   : > { %v3023_v29 = vpop.eup %3022  ;;  %v1129_v30 = vmul.f32 %v3021_v28, %v3534_v46 }
 0x26b   : > { %v1130_v36 = vmul.f32 %v3023_v29, %v3019_v27  ;;  %v2251_v27 = vld [vmem:[%s1519_s25 + $0x18] sm:$0x3] }
 0x26c   : > { %v3025_v31 = vpop.eup %3024 }
 0x26d   : > { %v1126_v37 = vadd.f32 1.0, %v3025_v31  ;;  %v1131_v38 = vadd.f32 %v1130_v36, %v1129_v30 }
 0x26f   : > { %3026 = vrcp.f32 %v1126_v37  ;;  %v3609_v39 = vsel %vm1140_vm9, %v1131_v38, %v3534_v46 }
 0x270   : > { %3028 = vtanh.f32 %v1131_v38 }
 0x279   : > { %v3027_v42 = vpop.eup %3026 }
 0x27a   : > { %v3029_v44 = vpop.eup %3028 }
 0x27b   : > { %v1133_v45 = vmul.f32 %v3029_v44, %v3027_v42 }
 0x27d   : > { %v3615_v47 = vsel %vm1140_vm9, %v1133_v45, %v3540_v52  ;;  %v1143_v50 = vsel %vm1140_vm9, %v1133_v45, 0.0 }
 0x27e   : > { %2580 = vmatmul.mubr.msk.f32.vlgmr.msra.gmra.mrb[8].mxu0 %vm415_vm4, %v3615_v47  ;;  %1145 = vst.msk [vmem:[%s1144_s18] sm:$0x3] %vm774_vm6, %v1143_v50  ;;  %2599 = vmatmul.mubr.msk.f32.vlgmr.msra.gmra.mrb[8].mxu1 %vm415_vm4, %v3615_v47 }
 0x27f   : > { %2837 = vmatpush3.bf16.msra.mxu0 %v3450_v41  ;;  %2849 = vmatpush3.bf16.msra.mxu1 %v3455_v43 }
 0x280   : > { %2838 = vmatprep.subr.bf16.mxu0 %v3178_v8  ;;  %2850 = vmatprep.subr.bf16.mxu1 %v3178_v8 }
 0x281   : > { %2617 = vmatprep.mubr.msk.f32.mxu0 %vm3179_vm1, %v3180_v16  ;;  %2636 = vmatprep.mubr.msk.f32.mxu1 %vm3179_vm1, %v3180_v16 }
 0x283   : > { %2840 = vmatpush3.bf16.msra.mxu0 %v3467_v48  ;;  %2852 = vmatpush3.bf16.msra.mxu1 %v3471_v49 }
 0x284   : > { %2841 = vmatprep.subr.bf16.mxu0 %v3178_v8  ;;  %2853 = vmatprep.subr.bf16.mxu1 %v3178_v8 }
 0x287   : > { %2843 = vmatpush3.bf16.msra.mxu0 %v3483_v54  ;;  %2855 = vmatpush3.bf16.msra.mxu1 %v3487_v55 }
 0x288   : > { %2844 = vmatprep.subr.bf16.mxu0 %v3178_v8  ;;  %2856 = vmatprep.subr.bf16.mxu1 %v3178_v8 }
 0x28b   : > { %2846 = vmatpush3.bf16.msra.mxu0 %v3495_v60  ;;  %2858 = vmatpush3.bf16.msra.mxu1 %v3499_v61 }
 0x28c   : > { %2859 = vmatprep.subr.bf16.mxu0 %v3178_v8  ;;  %2871 = vmatprep.subr.bf16.mxu1 %v3178_v8 }
 0x28e   : > { %2618 = vmatmul.mubr.msk.f32.vlgmr.msra.gmra.mrb[10].mxu0 %vm415_vm4, %v3615_v47  ;;  %2637 = vmatmul.mubr.msk.f32.vlgmr.msra.gmra.mrb[10].mxu1 %vm415_vm4, %v3615_v47 }
 0x28f   : > { %2861 = vmatpush3.bf16.msra.mxu0 %v3380_v9  ;;  %2873 = vmatpush3.bf16.msra.mxu1 %v3385_v13  ;;  %v1151_v9 = vld [vmem:[%s1150_s30] sm:$0x3]  ;;  %v2192_v13 = vld [vmem:[%s1150_s30 + $0x8] sm:$0x3] }
 0x290   : > { %2862 = vmatprep.subr.bf16.mxu0 %v3178_v8  ;;  %2874 = vmatprep.subr.bf16.mxu1 %v3178_v8 }
 0x291   : > { %2655 = vmatprep.mubr.msk.f32.mxu0 %vm3179_vm1, %v3180_v16  ;;  %2674 = vmatprep.mubr.msk.f32.mxu1 %vm3179_vm1, %v3180_v16 }
 0x293   : > { %2864 = vmatpush3.bf16.msra.mxu0 %v3396_v17  ;;  %2876 = vmatpush3.bf16.msra.mxu1 %v3404_v19 }
 0x294   : > { %2865 = vmatprep.subr.bf16.mxu0 %v3178_v8  ;;  %2877 = vmatprep.subr.bf16.mxu1 %v3178_v8 }
 0x297   : > { %2867 = vmatpush3.bf16.msra.mxu0 %v3416_v24  ;;  %2879 = vmatpush3.bf16.msra.mxu1 %v3420_v25 }
 0x298   : > { %2868 = vmatprep.subr.bf16.mxu0 %v3178_v8  ;;  %2880 = vmatprep.subr.bf16.mxu1 %v3178_v8 }
 0x29b   : > { %2870 = vmatpush3.bf16.msra.mxu0 %v3428_v32  ;;  %2882 = vmatpush3.bf16.msra.mxu1 %v3437_v34  ;;  %v2204_v32 = vld [vmem:[%s1150_s30 + $0x10] sm:$0x3]  ;;  %v2216_v34 = vld [vmem:[%s1150_s30 + $0x18] sm:$0x3] }
 0x29c   : > { %2883 = vmatprep.subr.bf16.mxu0 %v3178_v8  ;;  %2895 = vmatprep.subr.bf16.mxu1 %v3178_v8 }
 0x351   : > { %v1229_v17 = vpop.f32.mrb[8].mxu0  ;;  %v1311_v19 = vpop.f32.mrb[8].mxu1 }
 0x352   : > { %v1233_v24 = vadd.f32 %v1229_v17, %v1151_v9  ;;  %v1315_v25 = vadd.f32 %v2192_v13, %v1311_v19  ;;  %v2581_v46 = vpop.f32.mrb[9].mxu0  ;;  %v2600_v51 = vpop.f32.mrb[9].mxu1 }
 0x353   : > { %v1878_v17 = vpop.permute.xlu1 %1877 }
 0x354   : > { %v2226_v52 = vmul.f32 -1.442695, %v1233_v24  ;;  %v2227_v53 = vmul.f32 -1.442695, %v1315_v25  ;;  %vm1879_vm11 = vcmp.eq.s32.totalorder %v1878_v17, 1 }
 0x356   : > { %3030 = vpow2.f32 %v2226_v52 }
 0x357   : > { %3032 = vpow2.f32 %v2227_v53 }
 0x360   : > { %v3031_v40 = vpop.eup %3030 }
 0x361   : > { %v3033_v56 = vpop.eup %3032  ;;  %v1483_v57 = vadd.f32 1.0, %v3031_v40  ;;  %v1393_v58 = vpop.f32.mrb[10].mxu0 }
 0x362   : > { %v1475_v59 = vpop.f32.mrb[10].mxu1  ;;  %v1489_v62 = vadd.f32 1.0, %v3033_v56  ;;  %v1397_v63 = vadd.f32 %v2204_v32, %v1393_v58  ;;  %v2619_v1 = vpop.f32.mrb[11].mxu0 }
 0x363   : > { %v1479_v0 = vadd.f32 %v2216_v34, %v1475_v59  ;;  %v2638_v2 = vpop.f32.mrb[11].mxu1  ;;  %3034 = vrcp.f32 %v1483_v57 }
 0x364   : > { %3036 = vrcp.f32 %v1489_v62 }
 0x365   : > { %v2228_v3 = vmul.f32 -1.442695, %v1479_v0  ;;  %3038 = vtanh.f32 %v1397_v63 }
 0x367   : > { %3040 = vpow2.f32 %v2228_v3 }
 0x36d   : > { %v3035_v4 = vpop.eup %3034 }
 0x36e   : > { %v3037_v5 = vpop.eup %3036 }
 0x36f   : > { %v3039_v33 = vpop.eup %3038  ;;  %v1499_v7 = vmul.f32 %v3037_v5, %v3609_v39 }
 0x370   : > { %v1500_v18 = vmul.f32 %v3039_v33, %v3035_v4 }
 0x371   : > { %v3041_v10 = vpop.eup %3040 }
 0x372   : > { %v1496_v11 = vadd.f32 1.0, %v3041_v10  ;;  %v1501_v12 = vadd.f32 %v1500_v18, %v1499_v7 }
 0x374   : > { %3042 = vrcp.f32 %v1496_v11  ;;  %v3672_v14 = vsel %vm1510_vm10, %v1501_v12, %v3609_v39 }
 0x375   : > { %3044 = vtanh.f32 %v1501_v12 }
 0x37e   : > { %v3043_v15 = vpop.eup %3042 }
 0x37f   : > { %v3045_v20 = vpop.eup %3044 }
 0x380   : > { %v1503_v21 = vmul.f32 %v3045_v20, %v3043_v15 }
 0x382   : > { %v3678_v22 = vsel %vm1510_vm10, %v1503_v21, %v3615_v47  ;;  %v1513_v23 = vsel %vm1510_vm10, %v1503_v21, 0.0 }
 0x383   : > { %1515 = vst.msk [vmem:[%s1514_s22] sm:$0x3] %vm774_vm6, %v1513_v23  ;;  %2656 = vmatmul.mubr.msk.f32.vlgmr.msra.gmra.mrb[12].mxu0 %vm415_vm4, %v3678_v22  ;;  %2675 = vmatmul.mubr.msk.f32.vlgmr.msra.gmra.mrb[12].mxu1 %vm415_vm4, %v3678_v22 }
 0x384   : > { %2885 = vmatpush3.bf16.msra.mxu0 %v3450_v41  ;;  %2897 = vmatpush3.bf16.msra.mxu1 %v3455_v43  ;;  %v2231_v41 = vld [vmem:[%s1519_s25 + $0x8] sm:$0x3] }
 0x385   : > { %2886 = vmatprep.subr.bf16.mxu0 %v3178_v8  ;;  %2898 = vmatprep.subr.bf16.mxu1 %v3178_v8 }
 0x386   : > { %2693 = vmatprep.mubr.msk.f32.mxu0 %vm3179_vm1, %v3180_v16  ;;  %2712 = vmatprep.mubr.msk.f32.mxu1 %vm3179_vm1, %v3180_v16  ;;  %v1520_v16 = vld [vmem:[%s1519_s25] sm:$0x3] }
 0x388   : > { %2888 = vmatpush3.bf16.msra.mxu0 %v3467_v48  ;;  %2900 = vmatpush3.bf16.msra.mxu1 %v3471_v49 }
 0x389   : > { %2889 = vmatprep.subr.bf16.mxu0 %v3178_v8  ;;  %2901 = vmatprep.subr.bf16.mxu1 %v3178_v8 }
 0x38c   : > { %2891 = vmatpush3.bf16.msra.mxu0 %v3483_v54  ;;  %2903 = vmatpush3.bf16.msra.mxu1 %v3487_v55 }
 0x38d   : > { %2892 = vmatprep.subr.bf16.mxu0 %v3178_v8  ;;  %2904 = vmatprep.subr.bf16.mxu1 %v3178_v8 }
 0x390   : > { %2894 = vmatpush3.bf16.msra.mxu0 %v3495_v60  ;;  %2906 = vmatpush3.bf16.msra.mxu1 %v3499_v61  ;;  %v2241_v61 = vld [vmem:[%s1519_s25 + $0x10] sm:$0x3] }
 0x393   : > { %2694 = vmatmul.mubr.msk.f32.vlgmr.msra.gmra.mrb[14].mxu0 %vm415_vm4, %v3678_v22  ;;  %2713 = vmatmul.mubr.msk.f32.vlgmr.msra.gmra.mrb[14].mxu1 %vm415_vm4, %v3678_v22 }
 0x456   : > { %v1598_v43 = vpop.f32.mrb[12].mxu0  ;;  %v1680_v48 = vpop.f32.mrb[12].mxu1 }
 0x457   : > { %v1602_v49 = vadd.f32 %v1598_v43, %v1520_v16  ;;  %v1684_v54 = vadd.f32 %v2231_v41, %v1680_v48  ;;  %v2657_v8 = vpop.f32.mrb[13].mxu0  ;;  %v2676_v55 = vpop.f32.mrb[13].mxu1 }
 0x459   : > { %v2261_v60 = vmul.f32 -1.442695, %v1602_v49  ;;  %v2262_v26 = vmul.f32 -1.442695, %v1684_v54 }
 0x45b   : > { %3046 = vpow2.f32 %v2261_v60 }
 0x45c   : > { %3048 = vpow2.f32 %v2262_v26 }
 0x465   : > { %v3047_v28 = vpop.eup %3046 }
 0x466   : > { %v3049_v29 = vpop.eup %3048  ;;  %v1852_v30 = vadd.f32 1.0, %v3047_v28  ;;  %v1762_v31 = vpop.f32.mrb[14].mxu0 }
 0x467   : > { %v1844_v35 = vpop.f32.mrb[14].mxu1  ;;  %v1858_v36 = vadd.f32 1.0, %v3049_v29  ;;  %v1766_v37 = vadd.f32 %v2241_v61, %v1762_v31  ;;  %v2695_v39 = vpop.f32.mrb[15].mxu0 }
 0x468   : > { %v1848_v38 = vadd.f32 %v2251_v27, %v1844_v35  ;;  %v2714_v42 = vpop.f32.mrb[15].mxu1  ;;  %3050 = vrcp.f32 %v1852_v30 }
 0x469   : > { %3052 = vrcp.f32 %v1858_v36 }
 0x46a   : > { %v2263_v44 = vmul.f32 -1.442695, %v1848_v38  ;;  %3054 = vtanh.f32 %v1766_v37 }
 0x46c   : > { %3056 = vpow2.f32 %v2263_v44 }
 0x472   : > { %v3051_v45 = vpop.eup %3050 }
 0x473   : > { %v3053_v47 = vpop.eup %3052 }
 0x474   : > { %v3055_v50 = vpop.eup %3054  ;;  %v1868_v9 = vmul.f32 %v3053_v47, %v3672_v14 }
 0x475   : > { %v1869_v19 = vmul.f32 %v3055_v50, %v3051_v45 }
 0x476   : > { %v3057_v13 = vpop.eup %3056 }
 0x477   : > { %v1865_v24 = vadd.f32 1.0, %v3057_v13  ;;  %v1870_v25 = vadd.f32 %v1869_v19, %v1868_v9 }
 0x479   : > { %3058 = vrcp.f32 %v1865_v24  ;;  %v1881_v46 = vsel %vm1879_vm11, %v1870_v25, %v3672_v14 }
 0x47a   : > { %3060 = vtanh.f32 %v1870_v25  ;;  %1886 = vst.msk [vmem:[#allocation3] sm:$0x3] %vm774_vm6, %v1881_v46 }
 0x483   : > { %v3059_v51 = vpop.eup %3058 }
 0x484   : > { %v3061_v52 = vpop.eup %3060 }
 0x485   : > { %v1872_v53 = vmul.f32 %v3061_v52, %v3059_v51 }
 0x487   : > { %v1880_v32 = vsel %vm1879_vm11, %v1872_v53, %v3678_v22  ;;  %v1882_v34 = vsel %vm1879_vm11, %v1872_v53, 0.0 }
 0x488   : > { %1884 = vst.msk [vmem:[%s1883_s12] sm:$0x3] %vm774_vm6, %v1882_v34  ;;  %1885 = vst.msk [vmem:[#allocation2] sm:$0x3] %vm774_vm6, %v1880_v32 }
 0x489 PF: > { %s16_s21 = sadd.s32 1, %s3172_s21   ;;  %s3759_s12 = smov %s3140_s13 }
 0x48a   : > { %p13_p7 = scmp.ge.s32.totalorder %s16_s21, 6   ;;  %s3760_s13 = smov %s3144_s14 }
 0x48b   : > { %s3761_s14 = smov %s3292_s28  ;;  %s3762_s15 = smov %s3152_s16 }
 0x48c   : > { %s3763_s16 = smov %s3295_s29  ;;  %s3764_s17 = smov %s3164_s19 }
 0x48d   : > { %s3765_s18 = smov %s3168_s20  ;;  %s3766_s19 = smov %s3769_s23 }
 0x48e   : > { %s3767_s20 = smov %s3773_s24  ;;  %15 = sbr.rel (!%p13_p7) target bundleno = 8 (0x8), region = 148 }
 0x495   :  { %1932 = vsyncpa [#allocation6], 1 }
 0x496   :  { %1934 = vsyncpa [#allocation6 + $0x1], 1 }

// kernel: bilstm_forward.8
= control target key start
LH: loop header
LB: loop body
LE: loop exit
PB: predicated region body
PF: predicated region fallthrough
CT: control target
= control target key end

     0   :  { %s3542_s0 = inlined_call_operand.vmem [shape: s32[2,1], index: 0, kind: input, shape index: {}]   ;;  %s3543_s1 = inlined_call_operand.vmem [shape: f32[2,4,8,2,64], index: 1, kind: input, shape index: {}]   ;;  %s3544_s2 = inlined_call_operand.vmem [shape: f32[2,4,64,64], index: 2, kind: input, shape index: {}]   ;;  %s3545_s3 = inlined_call_operand.vmem [shape: f32[2,8,2,64], index: 3, kind: output, shape index: {}]  }
   0x1   :  { %3546 = sst [smem:[#allocation5_spill]] %s3543_s1 }
   0x2   :  { %s3082_s12 = smov 0   ;;  %s3084_s13 = smov 0  }
   0x3   :  { %s3086_s14 = smov 0   ;;  %s3088_s15 = smov 0  }
   0x4   :  { %s3090_s16 = smov 0   ;;  %s3092_s17 = smov 0  }
   0x5   :  { %s3094_s18 = smov 0  }
   0x6 LB: > { %s22_s19 = sadd.s32 1, %s3047_s16  ;;  %s25_s20 = sadd.s32 1, %s3051_s17  ;;  %s3055_s18 = sphi %s3094_s18, %s13_s18   ;;  %s3051_s17 = sphi %s3092_s17, %s3553_s17   ;;  %s3047_s16 = sphi %s3090_s16, %s3552_s16   ;;  %s3043_s15 = sphi %s3088_s15, %s3551_s15   ;;  %s3039_s14 = sphi %s3086_s14, %s3550_s14   ;;  %s3035_s13 = sphi %s3084_s13, %s3549_s13   ;;  %s3031_s12 = sphi %s3082_s12, %s3548_s12  }
   0x7   : > { %p23_p0 = scmp.ge.s32.totalorder %s22_s19, 2  ;;  %s50_s21 = ssub.s32 1, %s3051_s17 }
   0x8   : > { %s52_s22 = ssub.s32 1, %s3047_s16  ;;  %s51_s23 = smul.u32 %s3047_s16, %s50_s21 }
   0x9   : > { %s3555_s19 = smov (%p23_p0, %s22_s19), 0  ;;  %s3557_s20 = smov (!%p23_p0, %s25_s20), %s3051_s17 }
   0xa   : > { %p27_p1 = scmp.ge.s32.totalorder %s3557_s20, 2  ;;  %s53_s24 = smul.u32 %s3051_s17, %s52_s22 }
   0xb   : > { %s57_s25 = ssub.s32 1, %s3555_s19  ;;  %p72_p2 = scmp.ne.s32.totalorder %s3035_s13, %s3031_s12 }
   0xc   : > { %s3559_s20 = smov (%p27_p1, %s3557_s20), 0  ;;  %p73_p3 = scmp.eq.s32.totalorder %s3055_s18, 0 }
   0xd   : > { %s55_s26 = ssub.s32 1, %s3559_s20  ;;  %s58_s27 = smul.u32 %s57_s25, %s3559_s20 }
   0xe   : > { %s54_s28 = sadd.s32 %s53_s24, %s51_s23  ;;  %s56_s29 = smul.u32 %s55_s26, %s3555_s19 }
   0xf   : > { %s60_s30 = ssub.s32 %s3051_s17, %s3559_s20  ;;  %p74_p4 = por %p73_p3, %p72_p2 }
  0x10   : > { %s59_s4 = sadd.s32 %s58_s27, %s56_s29  ;;  %s65_s7 = sadd.s32 1, %s3035_s13 }
  0x11   : > { %s61_s5 = ssub.s32 %s54_s28, %s59_s4  ;;  %p2063_p6 = scmp.ge.s32.totalorder %s3055_s18, 4 }
  0x12   : > { %s62_s6 = sor.u32 %s61_s5, %s60_s30 }
  0x13   : > { %p63_p5 = scmp.eq.s32.totalorder %s62_s6, 0  ;;  %165 = sbr.rel (%p2063_p6) target bundleno = 38 (0x26), region = 20 }
  0x15   : > { %s3139_s8 = scalar_select %p63_p5, %s3035_s13, %s65_s7  }
  0x1a   : > { %168 = sbr.rel (!%p74_p4) target bundleno = 38 (0x26), region = 24  ;;  %s170_s9 = sand.u32 (%p74_p4), 1, %s3035_s13  }
  0x1b   : > { %s2065_s10 = sshll.u32 (%p74_p4), %s54_s28, 2  ;;  %s2064_s11 = sshll.u32 (%p74_p4), %s170_s9, 5 }
  0x1c   : > { %s2066_s21 = sshll.u32 (%p74_p4), %s3051_s17, 5  ;;  %s3547_s1 = sld [smem:[#allocation5_spill]] (%p74_p4) }
  0x1d   : > { %s180_s22 = sadd.s32 (%p74_p4), %s2066_s21, %s2065_s10  ;;  %s172_s27 = scalar_lea.vmem (%p74_p4), [#allocation4], %s2064_s11 }
  0x1e   : > { %s2067_s23 = sshll.u32 (%p74_p4), %s180_s22, 1 }
  0x22   : > { %s182_s26 = scalar_lea.vmem %s3547_s1, %s2067_s23 }
  0x23   : > { %v198_v0 = vld [vmem:[%s182_s26] sm:$0xff]   ;;  %v206_v1 = vld [vmem:[%s182_s26 + $0x10] sm:$0xff]  }
  0x24   : > { %v214_v2 = vld [vmem:[%s182_s26 + $0x20] sm:$0xff]   ;;  %199 = vst [vmem:[%s172_s27] sm:$0xff] %v198_v0   ;;  %207 = vst [vmem:[%s172_s27 + $0x8] sm:$0xff] %v206_v1   ;;  %v222_v3 = vld [vmem:[%s182_s26 + $0x30] sm:$0xff]  }
  0x25   : > { %215 = vst [vmem:[%s172_s27 + $0x10] sm:$0xff] %v214_v2   ;;  %223 = vst [vmem:[%s172_s27 + $0x18] sm:$0xff] %v222_v3  }
  0x26 PF: > { %p2068_p7 = scmp.ge.s32.totalorder %s3055_s18, 1  ;;  %p291_p8 = scmp.lt.s32.totalorder %s3055_s18, 5 }
  0x28   : > { %p292_p9 = pnand %p2068_p7, %p291_p8 }
  0x29   : > { %s298_s28 = sand.u32 (!%p292_p9), 1, %s3031_s12   ;;  %p341_p10 = scmp.lt.s32.totalorder (!%p292_p9), %s3043_s15, 1 }
  0x2a   : > { %295 = sbr.rel (%p292_p9) target bundleno = 1122 (0x462), region = 69  ;;  %s2069_s29 = sshll.u32 (!%p292_p9), %s298_s28, 5 }
  0x2b   : > { %s3152_s30 = ssub.s32 (!%p292_p9), 1, %s3043_s15  ;;  %s348_s6 = ssub.s32 (!%p292_p9), 1, %s3039_s14 }
  0x2c   : > { %s347_s4 = smul.u32 (!%p292_p9), %s3039_s14, %s3152_s30  ;;  %p2075_p12 = scmp.ne.s32.totalorder (!%p292_p9), %s3039_s14, 0 }
  0x2d   : > { %s349_s9 = smul.u32 (!%p292_p9), %s3043_s15, %s348_s6  ;;  %s3173_s6 = scalar_lea.vmem (!%p292_p9), [#allocation4], %s2069_s29 }
  0x2f   : > { %s350_s22 = sadd.s32 (!%p292_p9), %s349_s9, %s347_s4 }
  0x30   : > { %s3164_s23 = sshll.u32 (!%p292_p9), %s350_s22, 2 }
  0x31   : > { %s342_s5 = scalar_select %p341_p10, %s3043_s15, 1 }
  0x32   : > { %p354_p11 = scmp.lt.s32.totalorder %s3164_s23, 7  ;;  %vm370_vm0 = vcmask (!%p2075_p12), 517120   ;;  %v3057_v4 = vmov (!%p2075_p12), 0.0  }
  0x33   : > { %s2233_s7 = sshll.u32 %s342_s5, 8  ;;  %s2073_s12 = sshll.u32 %s342_s5, 3  ;;  %371 = vst.msk [vmem:[#allocation2] sm:$0x3] (!%p2075_p12), %vm370_vm0, %v3057_v4  ;;  %372 = vst.msk [vmem:[#allocation3] sm:$0x3] (!%p2075_p12), %vm370_vm0, %v3057_v4 }
  0x34   : > { %s3162_s21 = scalar_lea.vmem %s3544_s2, %s2233_s7  ;;  %369 = sbr.rel (%p2075_p12) target bundleno = 59 (0x3b), region = 77 }
  0x35   : > { %s355_s24 = scalar_select %p354_p11, %s3164_s23, 7 }
  0x37   : > { %s357_s25 = sadd.s32 %s2073_s12, %s355_s24 }
  0x38   : > { %s2074_s26 = sshll.u32 %s357_s25, 1 }
  0x39   : > { %s3171_s1 = scalar_lea.vmem %s3545_s3, %s2074_s26 }
  0x3b PF: > { %v387_v5 = vld [vmem:[%s3162_s21] sm:$0xff]  ;;  %v388_v6 = vld [vmem:[%s3162_s21 + $0x8] sm:$0xff]  ;;  %v3058_v8 = vmov 0.0|0.0   ;;  %v389_v11 = vld [vmem:[%s3162_s21 + $0x10] sm:$0xff]  ;;  %vm3059_vm1 = vmmov 0   ;;  %v3060_v16 = vmov 0.0  }
  0x3c   : > { %v2080_v7 = vld [vmem:[%s3162_s21 + $0x40] sm:$0xff]  ;;  %2682 = vmatprep.subr.bf16.mxu0 %v3058_v8  ;;  %2694 = vmatprep.subr.bf16.mxu1 %v3058_v8  ;;  %v3181_v9 = vpack.c.bf16 %v388_v6, %v387_v5  ;;  %v2081_v10 = vld [vmem:[%s3162_s21 + $0x48] sm:$0xff]  ;;  %v390_v12 = vld [vmem:[%s3162_s21 + $0x18] sm:$0xff]  ;;  %s382_s14 = smul.u32 3, %s3043_s15  ;;  %s2112_s29 = sshll.u32 %s3043_s15, 1  ;;  %v3061_v18 = vmov 0  }
  0x3d   : > { %v3186_v13 = vpack.c.bf16 %v2081_v10, %v2080_v7  ;;  %v2082_v14 = vld [vmem:[%s3162_s21 + $0x50] sm:$0xff]  ;;  %v2083_v15 = vld [vmem:[%s3162_s21 + $0x58] sm:$0xff]  ;;  %2394 = vmatprep.mubr.msk.f32.mxu0 %vm3059_vm1, %v3060_v16  ;;  %2413 = vmatprep.mubr.msk.f32.mxu1 %vm3059_vm1, %v3060_v16  ;;  %v3197_v17 = vpack.c.bf16 %v390_v12, %v389_v11  ;;  %s3201_s4 = sadd.s32 %s2112_s29, %s3152_s30  ;;  %v391_v20 = vld [vmem:[%s3162_s21 + $0x20] sm:$0xff]  ;;  %vm395_vm4 = vcmask 523264   ;;  %s2077_s11 = smul.u32 6, %s3043_s15  ;;  %vm754_vm6 = vcmask 517120  }
  0x3e   : > { %2684 = vmatpush3.bf16.msra.mxu0 %v3181_v9  ;;  %2935 = vset.pattern.permute.xlu0 %v3061_v18  ;;  %v3205_v19 = vpack.c.bf16 %v2083_v15, %v2082_v14  ;;  %v392_v21 = vld [vmem:[%s3162_s21 + $0x28] sm:$0xff]  ;;  %v2084_v22 = vld [vmem:[%s3162_s21 + $0x60] sm:$0xff]  ;;  %s383_s5 = sadd.s32 %s3164_s23, %s382_s14  ;;  %s758_s7 = sadd.s32 %s3164_s23, %s3201_s4  ;;  %v393_v26 = vld [vmem:[%s3162_s21 + $0x30] sm:$0xff] }
  0x3f   : > { %2696 = vmatpush3.bf16.msra.mxu1 %v3186_v13  ;;  %2685 = vmatprep.subr.bf16.mxu0 %v3058_v8  ;;  %v2085_v23 = vld [vmem:[%s3162_s21 + $0x68] sm:$0xff]  ;;  %v3217_v24 = vpack.c.bf16 %v392_v21, %v391_v20  ;;  %v394_v27 = vld [vmem:[%s3162_s21 + $0x38] sm:$0xff]  ;;  %v2086_v28 = vld [vmem:[%s3162_s21 + $0x70] sm:$0xff]  ;;  %v743_v30 = vstv %s383_s5  ;;  %s753_s22 = scalar_lea.vmem %s3171_s1, %s2077_s11  ;;  %s2154_s12 = sshll.u32 %s3152_s30, 1 }
  0x40   : > { %2697 = vmatprep.subr.bf16.mxu1 %v3058_v8  ;;  %2936 = vset.pattern.permute.xlu1 %v3061_v18  ;;  %v3221_v25 = vpack.c.bf16 %v2085_v23, %v2084_v22  ;;  %v2087_v29 = vld [vmem:[%s3162_s21 + $0x78] sm:$0xff]  ;;  %v1114_v31 = vstv %s758_s7  ;;  %v3229_v32 = vpack.c.bf16 %v394_v27, %v393_v26  ;;  %v3234_v33 = vld [vmem:[%s3542_s0] sm:$0x3]  ;;  %v2091_v36 = vld [vmem:[%s3162_s21 + $0x88] sm:$0xff]  ;;  %s1496_s24 = smul.u32 3, %s3152_s30  ;;  %s3395_s25 = sadd.s32 %s3043_s15, %s2154_s12 }
  0x41   : > { %v3238_v34 = vpack.c.bf16 %v2087_v29, %v2086_v28  ;;  %v2090_v35 = vld [vmem:[%s3162_s21 + $0x80] sm:$0xff]  ;;  %vm744_vm2 = vcmp.lt.s32.totalorder %v743_v30, %v3234_v33  ;;  %vm1115_vm3 = vcmp.lt.s32.totalorder %v1114_v31, %v3234_v33  ;;  %v2101_v38 = vld [vmem:[%s3162_s21 + $0xc8] sm:$0xff]  ;;  %v2092_v44 = vld [vmem:[%s3162_s21 + $0x90] sm:$0xff]  ;;  %s1128_s26 = sadd.s32 %s3164_s23, %s3395_s25  ;;  %s2113_s28 = sshll.u32 %s3201_s4, 1 }
  0x42   : > { %2687 = vmatpush3.bf16.msra.mxu0 %v3197_v17  ;;  %v2100_v37 = vld [vmem:[%s3162_s21 + $0xc0] sm:$0xff]  ;;  %v745_v39 = vsel %vm744_vm2, 1, %v3061_v18  ;;  %v3251_v41 = vpack.c.bf16 %v2091_v36, %v2090_v35  ;;  %v1116_v42 = vsel %vm1115_vm3, 1, %v3061_v18  ;;  %v2093_v45 = vld [vmem:[%s3162_s21 + $0x98] sm:$0xff]  ;;  %v2102_v46 = vld [vmem:[%s3162_s21 + $0xd0] sm:$0xff]  ;;  %s1497_s27 = sadd.s32 %s3164_s23, %s1496_s24  ;;  %s760_s14 = scalar_lea.vmem %s3173_s6, %s2113_s28 [#allocation4] }
  0x43   : > { %2699 = vmatpush3.bf16.msra.mxu1 %v3205_v19  ;;  %2688 = vmatprep.subr.bf16.mxu0 %v3058_v8  ;;  %v3249_v40 = vld [vmem:[#allocation2] sm:$0x3]  ;;  %v3256_v43 = vpack.c.bf16 %v2101_v38, %v2100_v37  ;;  %v2103_v47 = vld [vmem:[%s3162_s21 + $0xd8] sm:$0xff]  ;;  %v3268_v48 = vpack.c.bf16 %v2093_v45, %v2092_v44  ;;  %v2095_v51 = vld [vmem:[%s3162_s21 + $0xa8] sm:$0xff]  ;;  %s1124_s15 = scalar_lea.vmem %s3171_s1, %s2113_s28  ;;  %s2155_s23 = sshll.u32 %s3395_s25, 1 }
  0x44   : > { %2700 = vmatprep.subr.bf16.mxu1 %v3058_v8  ;;  %747 = vperm.xlu0 %2935, %v745_v39   ;;  %v3272_v49 = vpack.c.bf16 %v2103_v47, %v2102_v46  ;;  %v2094_v50 = vld [vmem:[%s3162_s21 + $0xa0] sm:$0xff]  ;;  %v2105_v53 = vld [vmem:[%s3162_s21 + $0xe8] sm:$0xff]  ;;  %v2096_v56 = vld [vmem:[%s3162_s21 + $0xb0] sm:$0xff]  ;;  %s1130_s29 = scalar_lea.vmem %s3173_s6, %s2155_s23 [#allocation4]  ;;  %s1494_s4 = scalar_lea.vmem %s3171_s1, %s2155_s23 }
  0x45   : > { %v2104_v52 = vld [vmem:[%s3162_s21 + $0xe0] sm:$0xff]  ;;  %v3284_v54 = vpack.c.bf16 %v2095_v51, %v2094_v50  ;;  %v2097_v57 = vld [vmem:[%s3162_s21 + $0xb8] sm:$0xff]  ;;  %v2106_v58 = vld [vmem:[%s3162_s21 + $0xf0] sm:$0xff]  ;;  %s2196_s5 = smul.u32 6, %s3152_s30 }
  0x46   : > { %2690 = vmatpush3.bf16.msra.mxu0 %v3217_v24  ;;  %v3288_v55 = vpack.c.bf16 %v2105_v53, %v2104_v52  ;;  %v2107_v59 = vld [vmem:[%s3162_s21 + $0xf8] sm:$0xff]  ;;  %v3296_v60 = vpack.c.bf16 %v2097_v57, %v2096_v56  ;;  %s385_s21 = scalar_lea.vmem %s3173_s6, %s2077_s11 [#allocation4]  ;;  %v381_v30 = vld [vmem:[#allocation3] sm:$0x3]  ;;  %v1853_v56 = vstv %s1497_s27 }
  0x47   : > { %2702 = vmatpush3.bf16.msra.mxu1 %v3221_v25  ;;  %2691 = vmatprep.subr.bf16.mxu0 %v3058_v8  ;;  %v3300_v61 = vpack.c.bf16 %v2107_v59, %v2106_v58  ;;  %v386_v62 = vld [vmem:[%s385_s21] sm:$0x3]  ;;  %v2079_v63 = vld [vmem:[%s385_s21 + $0x8] sm:$0x3]  ;;  %v2089_v10 = vld [vmem:[%s385_s21 + $0x10] sm:$0x3]  ;;  %vm1854_vm8 = vcmp.lt.s32.totalorder %v1853_v56, %v3234_v33  ;;  %s1499_s7 = scalar_lea.vmem %s3173_s6, %s2196_s5 [#allocation4]  ;;  %s1863_s6 = scalar_lea.vmem %s3171_s1, %s2196_s5 }
  0x48   : > { %2703 = vmatprep.subr.bf16.mxu1 %v3058_v8  ;;  %1118 = vperm.xlu0 %2935, %v1116_v42   ;;  %v2099_v12 = vld [vmem:[%s385_s21 + $0x18] sm:$0x3]  ;;  %v1855_v58 = vsel %vm1854_vm8, 1, %v3061_v18  ;;  %v761_v59 = vld [vmem:[%s760_s14] sm:$0x3] }
  0x4a   : > { %2693 = vmatpush3.bf16.msra.mxu0 %v3229_v32 }
  0x4b   : > { %2705 = vmatpush3.bf16.msra.mxu1 %v3238_v34  ;;  %2706 = vmatprep.subr.bf16.mxu0 %v3058_v8 }
  0x4c   : > { %2718 = vmatprep.subr.bf16.mxu1 %v3058_v8 }
  0x4d   : > { %2395 = vmatmul.mubr.msk.f32.vlgmr.msra.gmra.mrb[0].mxu0 %vm395_vm4, %v3249_v40 }
  0x4e   : > { %2414 = vmatmul.mubr.msk.f32.vlgmr.msra.gmra.mrb[0].mxu1 %vm395_vm4, %v3249_v40  ;;  %2708 = vmatpush3.bf16.msra.mxu0 %v3251_v41 }
  0x4f   : > { %2720 = vmatpush3.bf16.msra.mxu1 %v3256_v43  ;;  %2709 = vmatprep.subr.bf16.mxu0 %v3058_v8 }
  0x50   : > { %2721 = vmatprep.subr.bf16.mxu1 %v3058_v8  ;;  %2432 = vmatprep.mubr.msk.f32.mxu0 %vm3059_vm1, %v3060_v16 }
  0x51   : > { %2451 = vmatprep.mubr.msk.f32.mxu1 %vm3059_vm1, %v3060_v16 }
  0x52   : > { %2711 = vmatpush3.bf16.msra.mxu0 %v3268_v48 }
  0x53   : > { %2723 = vmatpush3.bf16.msra.mxu1 %v3272_v49  ;;  %2712 = vmatprep.subr.bf16.mxu0 %v3058_v8 }
  0x54   : > { %2724 = vmatprep.subr.bf16.mxu1 %v3058_v8 }
  0x56   : > { %2714 = vmatpush3.bf16.msra.mxu0 %v3284_v54 }
  0x57   : > { %2726 = vmatpush3.bf16.msra.mxu1 %v3288_v55  ;;  %2715 = vmatprep.subr.bf16.mxu0 %v3058_v8 }
  0x58   : > { %2727 = vmatprep.subr.bf16.mxu1 %v3058_v8 }
  0x5a   : > { %2717 = vmatpush3.bf16.msra.mxu0 %v3296_v60 }
  0x5b   : > { %2729 = vmatpush3.bf16.msra.mxu1 %v3300_v61  ;;  %2730 = vmatprep.subr.bf16.mxu0 %v3058_v8 }
  0x5c   : > { %2742 = vmatprep.subr.bf16.mxu1 %v3058_v8 }
  0x5d   : > { %2433 = vmatmul.mubr.msk.f32.vlgmr.msra.gmra.mrb[2].mxu0 %vm395_vm4, %v3249_v40 }
  0x5e   : > { %2452 = vmatmul.mubr.msk.f32.vlgmr.msra.gmra.mrb[2].mxu1 %vm395_vm4, %v3249_v40  ;;  %2732 = vmatpush3.bf16.msra.mxu0 %v3181_v9 }
  0x5f   : > { %2744 = vmatpush3.bf16.msra.mxu1 %v3186_v13  ;;  %2733 = vmatprep.subr.bf16.mxu0 %v3058_v8 }
  0x60   : > { %2745 = vmatprep.subr.bf16.mxu1 %v3058_v8  ;;  %2470 = vmatprep.mubr.msk.f32.mxu0 %vm3059_vm1, %v3060_v16 }
  0x61   : > { %2489 = vmatprep.mubr.msk.f32.mxu1 %vm3059_vm1, %v3060_v16 }
  0x62   : > { %2735 = vmatpush3.bf16.msra.mxu0 %v3197_v17 }
  0x63   : > { %2747 = vmatpush3.bf16.msra.mxu1 %v3205_v19  ;;  %2736 = vmatprep.subr.bf16.mxu0 %v3058_v8 }
  0x64   : > { %2748 = vmatprep.subr.bf16.mxu1 %v3058_v8 }
  0x66   : > { %2738 = vmatpush3.bf16.msra.mxu0 %v3217_v24 }
  0x67   : > { %2750 = vmatpush3.bf16.msra.mxu1 %v3221_v25  ;;  %2739 = vmatprep.subr.bf16.mxu0 %v3058_v8 }
  0x68   : > { %2751 = vmatprep.subr.bf16.mxu1 %v3058_v8 }
  0x6a   : > { %2741 = vmatpush3.bf16.msra.mxu0 %v3229_v32 }
  0x6b   : > { %2753 = vmatpush3.bf16.msra.mxu1 %v3238_v34  ;;  %2754 = vmatprep.subr.bf16.mxu0 %v3058_v8 }
  0x6c   : > { %2766 = vmatprep.subr.bf16.mxu1 %v3058_v8 }
  0xc3   : > { %v748_v36 = vpop.permute.xlu0 %747 }
  0xc4   : > { %vm749_vm5 = vcmp.eq.s32.totalorder %v748_v36, 1 }
 0x120   : > { %v465_v0 = vpop.f32.mrb[0].mxu0 }
 0x121   : > { %v469_v1 = vadd.f32 %v465_v0, %v386_v62  ;;  %v548_v2 = vpop.f32.mrb[0].mxu1  ;;  %v2396_v3 = vpop.f32.mrb[1].mxu0  ;;  %v2117_v62 = vld [vmem:[%s760_s14 + $0x8] sm:$0x3] }
 0x122   : > { %v552_v4 = vadd.f32 %v2079_v63, %v548_v2  ;;  %v2415_v5 = vpop.f32.mrb[1].mxu1 }
 0x123   : > { %v2109_v6 = vmul.f32 -1.442695, %v469_v1 }
 0x124   : > { %v2110_v7 = vmul.f32 -1.442695, %v552_v4 }
 0x125   : > { %2937 = vpow2.f32 %v2109_v6 }
 0x126   : > { %2939 = vpow2.f32 %v2110_v7  ;;  %v2141_v7 = vld [vmem:[%s760_s14 + $0x18] sm:$0x3] }
 0x12f   : > { %v2938_v11 = vpop.eup %2937 }
 0x130   : > { %v2940_v14 = vpop.eup %2939  ;;  %v722_v15 = vadd.f32 1.0, %v2938_v11  ;;  %v631_v20 = vpop.f32.mrb[2].mxu0 }
 0x131   : > { %v728_v21 = vadd.f32 1.0, %v2940_v14  ;;  %v635_v22 = vadd.f32 %v2089_v10, %v631_v20  ;;  %v714_v23 = vpop.f32.mrb[2].mxu1  ;;  %v2434_v26 = vpop.f32.mrb[3].mxu0 }
 0x132   : > { %2941 = vrcp.f32 %v722_v15  ;;  %v718_v27 = vadd.f32 %v2099_v12, %v714_v23  ;;  %v2453_v28 = vpop.f32.mrb[3].mxu1 }
 0x133   : > { %2943 = vrcp.f32 %v728_v21 }
 0x134   : > { %2945 = vtanh.f32 %v635_v22  ;;  %v2111_v29 = vmul.f32 -1.442695, %v718_v27 }
 0x136   : > { %2947 = vpow2.f32 %v2111_v29 }
 0x13c   : > { %v2942_v31 = vpop.eup %2941 }
 0x13d   : > { %v2944_v35 = vpop.eup %2943 }
 0x13e   : > { %v2946_v37 = vpop.eup %2945  ;;  %v738_v38 = vmul.f32 %v2944_v35, %v381_v30  ;;  %v1119_v35 = vpop.permute.xlu0 %1118 }
 0x13f   : > { %v739_v39 = vmul.f32 %v2946_v37, %v2942_v31  ;;  %vm1120_vm9 = vcmp.eq.s32.totalorder %v1119_v35, 1 }
 0x140   : > { %v2948_v42 = vpop.eup %2947 }
 0x141   : > { %v735_v44 = vadd.f32 1.0, %v2948_v42  ;;  %v740_v45 = vadd.f32 %v739_v39, %v738_v38 }
 0x143   : > { %2949 = vrcp.f32 %v735_v44  ;;  %v3335_v46 = vsel %vm749_vm5, %v740_v45, %v381_v30 }
 0x144   : > { %2951 = vtanh.f32 %v740_v45 }
 0x14d   : > { %v2950_v47 = vpop.eup %2949 }
 0x14e   : > { %v2952_v50 = vpop.eup %2951 }
 0x14f   : > { %v742_v51 = vmul.f32 %v2952_v50, %v2950_v47 }
 0x151   : > { %v3341_v52 = vsel %vm749_vm5, %v742_v51, %v3249_v40  ;;  %v752_v53 = vsel %vm749_vm5, %v742_v51, 0.0  ;;  %v1484_v40 = vstv %s1128_s26 }
 0x152   : > { %755 = vst.msk [vmem:[%s753_s22] sm:$0x3] %vm754_vm6, %v752_v53  ;;  %2471 = vmatmul.mubr.msk.f32.vlgmr.msra.gmra.mrb[4].mxu0 %vm395_vm4, %v3341_v52  ;;  %2490 = vmatmul.mubr.msk.f32.vlgmr.msra.gmra.mrb[4].mxu1 %vm395_vm4, %v3341_v52  ;;  %vm1485_vm7 = vcmp.lt.s32.totalorder %v1484_v40, %v3234_v33  ;;  %v2129_v33 = vld [vmem:[%s760_s14 + $0x10] sm:$0x3] }
 0x153   : > { %2756 = vmatpush3.bf16.msra.mxu0 %v3251_v41  ;;  %2768 = vmatpush3.bf16.msra.mxu1 %v3256_v43  ;;  %v1486_v57 = vsel %vm1485_vm7, 1, %v3061_v18 }
 0x154   : > { %2757 = vmatprep.subr.bf16.mxu0 %v3058_v8  ;;  %2769 = vmatprep.subr.bf16.mxu1 %v3058_v8 }
 0x155   : > { %2508 = vmatprep.mubr.msk.f32.mxu0 %vm3059_vm1, %v3060_v16  ;;  %2527 = vmatprep.mubr.msk.f32.mxu1 %vm3059_vm1, %v3060_v16 }
 0x156   : > { %1488 = vperm.xlu1 %2936, %v1486_v57  }
 0x157   : > { %2759 = vmatpush3.bf16.msra.mxu0 %v3268_v48  ;;  %2771 = vmatpush3.bf16.msra.mxu1 %v3272_v49 }
 0x158   : > { %2760 = vmatprep.subr.bf16.mxu0 %v3058_v8  ;;  %2772 = vmatprep.subr.bf16.mxu1 %v3058_v8 }
 0x15a   : > { %1857 = vperm.xlu1 %2936, %v1855_v58  }
 0x15b   : > { %2762 = vmatpush3.bf16.msra.mxu0 %v3284_v54  ;;  %2774 = vmatpush3.bf16.msra.mxu1 %v3288_v55 }
 0x15c   : > { %2763 = vmatprep.subr.bf16.mxu0 %v3058_v8  ;;  %2775 = vmatprep.subr.bf16.mxu1 %v3058_v8 }
 0x15f   : > { %2765 = vmatpush3.bf16.msra.mxu0 %v3296_v60  ;;  %2777 = vmatpush3.bf16.msra.mxu1 %v3300_v61 }
 0x160   : > { %2778 = vmatprep.subr.bf16.mxu0 %v3058_v8  ;;  %2790 = vmatprep.subr.bf16.mxu1 %v3058_v8 }
 0x162   : > { %2509 = vmatmul.mubr.msk.f32.vlgmr.msra.gmra.mrb[6].mxu0 %vm395_vm4, %v3341_v52  ;;  %2528 = vmatmul.mubr.msk.f32.vlgmr.msra.gmra.mrb[6].mxu1 %vm395_vm4, %v3341_v52 }
 0x163   : > { %2780 = vmatpush3.bf16.msra.mxu0 %v3181_v9  ;;  %2792 = vmatpush3.bf16.msra.mxu1 %v3186_v13 }
 0x164   : > { %2781 = vmatprep.subr.bf16.mxu0 %v3058_v8  ;;  %2793 = vmatprep.subr.bf16.mxu1 %v3058_v8 }
 0x165   : > { %2546 = vmatprep.mubr.msk.f32.mxu0 %vm3059_vm1, %v3060_v16  ;;  %2565 = vmatprep.mubr.msk.f32.mxu1 %vm3059_vm1, %v3060_v16 }
 0x167   : > { %2783 = vmatpush3.bf16.msra.mxu0 %v3197_v17  ;;  %2795 = vmatpush3.bf16.msra.mxu1 %v3205_v19 }
 0x168   : > { %2784 = vmatprep.subr.bf16.mxu0 %v3058_v8  ;;  %2796 = vmatprep.subr.bf16.mxu1 %v3058_v8 }
 0x16b   : > { %2786 = vmatpush3.bf16.msra.mxu0 %v3217_v24  ;;  %2798 = vmatpush3.bf16.msra.mxu1 %v3221_v25 }
 0x16c   : > { %2787 = vmatprep.subr.bf16.mxu0 %v3058_v8  ;;  %2799 = vmatprep.subr.bf16.mxu1 %v3058_v8 }
 0x16f   : > { %2789 = vmatpush3.bf16.msra.mxu0 %v3229_v32  ;;  %2801 = vmatpush3.bf16.msra.mxu1 %v3238_v34 }
 0x170   : > { %2802 = vmatprep.subr.bf16.mxu0 %v3058_v8  ;;  %2814 = vmatprep.subr.bf16.mxu1 %v3058_v8 }
 0x225   : > { %v839_v63 = vpop.f32.mrb[4].mxu0  ;;  %v921_v0 = vpop.f32.mrb[4].mxu1 }
 0x226   : > { %v843_v1 = vadd.f32 %v839_v63, %v761_v59  ;;  %v925_v2 = vadd.f32 %v2117_v62, %v921_v0  ;;  %v2472_v3 = vpop.f32.mrb[5].mxu0  ;;  %v2491_v4 = vpop.f32.mrb[5].mxu1 }
 0x228   : > { %v2151_v5 = vmul.f32 -1.442695, %v843_v1  ;;  %v2152_v6 = vmul.f32 -1.442695, %v925_v2 }
 0x22a   : > { %2953 = vpow2.f32 %v2151_v5 }
 0x22b   : > { %2955 = vpow2.f32 %v2152_v6  ;;  %v1489_v6 = vpop.permute.xlu1 %1488 }
 0x22c   : > { %vm1490_vm10 = vcmp.eq.s32.totalorder %v1489_v6, 1 }
 0x234   : > { %v2954_v10 = vpop.eup %2953 }
 0x235   : > { %v2956_v18 = vpop.eup %2955  ;;  %v1093_v11 = vadd.f32 1.0, %v2954_v10  ;;  %v1003_v12 = vpop.f32.mrb[6].mxu0 }
 0x236   : > { %v1085_v14 = vpop.f32.mrb[6].mxu1  ;;  %v1099_v15 = vadd.f32 1.0, %v2956_v18  ;;  %v1007_v20 = vadd.f32 %v2129_v33, %v1003_v12  ;;  %v2510_v22 = vpop.f32.mrb[7].mxu0 }
 0x237   : > { %v1089_v21 = vadd.f32 %v2141_v7, %v1085_v14  ;;  %v2529_v23 = vpop.f32.mrb[7].mxu1  ;;  %2957 = vrcp.f32 %v1093_v11 }
 0x238   : > { %2959 = vrcp.f32 %v1099_v15 }
 0x239   : > { %v2153_v26 = vmul.f32 -1.442695, %v1089_v21  ;;  %2961 = vtanh.f32 %v1007_v20 }
 0x23b   : > { %2963 = vpow2.f32 %v2153_v26 }
 0x241   : > { %v2958_v27 = vpop.eup %2957 }
 0x242   : > { %v2960_v28 = vpop.eup %2959 }
 0x243   : > { %v2962_v29 = vpop.eup %2961  ;;  %v1109_v30 = vmul.f32 %v2960_v28, %v3335_v46 }
 0x244   : > { %v1110_v36 = vmul.f32 %v2962_v29, %v2958_v27  ;;  %v2218_v27 = vld [vmem:[%s1499_s7 + $0x18] sm:$0x3] }
 0x245   : > { %v2964_v31 = vpop.eup %2963 }
 0x246   : > { %v1106_v37 = vadd.f32 1.0, %v2964_v31  ;;  %v1111_v38 = vadd.f32 %v1110_v36, %v1109_v30 }
 0x248   : > { %2965 = vrcp.f32 %v1106_v37  ;;  %v3410_v39 = vsel %vm1120_vm9, %v1111_v38, %v3335_v46 }
 0x249   : > { %2967 = vtanh.f32 %v1111_v38 }
 0x252   : > { %v2966_v42 = vpop.eup %2965 }
 0x253   : > { %v2968_v44 = vpop.eup %2967 }
 0x254   : > { %v1113_v45 = vmul.f32 %v2968_v44, %v2966_v42 }
 0x256   : > { %v3416_v47 = vsel %vm1120_vm9, %v1113_v45, %v3341_v52  ;;  %v1123_v50 = vsel %vm1120_vm9, %v1113_v45, 0.0 }
 0x257   : > { %2547 = vmatmul.mubr.msk.f32.vlgmr.msra.gmra.mrb[8].mxu0 %vm395_vm4, %v3416_v47  ;;  %1125 = vst.msk [vmem:[%s1124_s15] sm:$0x3] %vm754_vm6, %v1123_v50  ;;  %2566 = vmatmul.mubr.msk.f32.vlgmr.msra.gmra.mrb[8].mxu1 %vm395_vm4, %v3416_v47 }
 0x258   : > { %2804 = vmatpush3.bf16.msra.mxu0 %v3251_v41  ;;  %2816 = vmatpush3.bf16.msra.mxu1 %v3256_v43 }
 0x259   : > { %2805 = vmatprep.subr.bf16.mxu0 %v3058_v8  ;;  %2817 = vmatprep.subr.bf16.mxu1 %v3058_v8 }
 0x25a   : > { %2584 = vmatprep.mubr.msk.f32.mxu0 %vm3059_vm1, %v3060_v16  ;;  %2603 = vmatprep.mubr.msk.f32.mxu1 %vm3059_vm1, %v3060_v16 }
 0x25c   : > { %2807 = vmatpush3.bf16.msra.mxu0 %v3268_v48  ;;  %2819 = vmatpush3.bf16.msra.mxu1 %v3272_v49 }
 0x25d   : > { %2808 = vmatprep.subr.bf16.mxu0 %v3058_v8  ;;  %2820 = vmatprep.subr.bf16.mxu1 %v3058_v8 }
 0x260   : > { %2810 = vmatpush3.bf16.msra.mxu0 %v3284_v54  ;;  %2822 = vmatpush3.bf16.msra.mxu1 %v3288_v55 }
 0x261   : > { %2811 = vmatprep.subr.bf16.mxu0 %v3058_v8  ;;  %2823 = vmatprep.subr.bf16.mxu1 %v3058_v8 }
 0x264   : > { %2813 = vmatpush3.bf16.msra.mxu0 %v3296_v60  ;;  %2825 = vmatpush3.bf16.msra.mxu1 %v3300_v61 }
 0x265   : > { %2826 = vmatprep.subr.bf16.mxu0 %v3058_v8  ;;  %2838 = vmatprep.subr.bf16.mxu1 %v3058_v8 }
 0x267   : > { %2585 = vmatmul.mubr.msk.f32.vlgmr.msra.gmra.mrb[10].mxu0 %vm395_vm4, %v3416_v47  ;;  %2604 = vmatmul.mubr.msk.f32.vlgmr.msra.gmra.mrb[10].mxu1 %vm395_vm4, %v3416_v47 }
 0x268   : > { %2828 = vmatpush3.bf16.msra.mxu0 %v3181_v9  ;;  %2840 = vmatpush3.bf16.msra.mxu1 %v3186_v13  ;;  %v1131_v9 = vld [vmem:[%s1130_s29] sm:$0x3]  ;;  %v2159_v13 = vld [vmem:[%s1130_s29 + $0x8] sm:$0x3] }
 0x269   : > { %2829 = vmatprep.subr.bf16.mxu0 %v3058_v8  ;;  %2841 = vmatprep.subr.bf16.mxu1 %v3058_v8 }
 0x26a   : > { %2622 = vmatprep.mubr.msk.f32.mxu0 %vm3059_vm1, %v3060_v16  ;;  %2641 = vmatprep.mubr.msk.f32.mxu1 %vm3059_vm1, %v3060_v16 }
 0x26c   : > { %2831 = vmatpush3.bf16.msra.mxu0 %v3197_v17  ;;  %2843 = vmatpush3.bf16.msra.mxu1 %v3205_v19 }
 0x26d   : > { %2832 = vmatprep.subr.bf16.mxu0 %v3058_v8  ;;  %2844 = vmatprep.subr.bf16.mxu1 %v3058_v8 }
 0x270   : > { %2834 = vmatpush3.bf16.msra.mxu0 %v3217_v24  ;;  %2846 = vmatpush3.bf16.msra.mxu1 %v3221_v25 }
 0x271   : > { %2835 = vmatprep.subr.bf16.mxu0 %v3058_v8  ;;  %2847 = vmatprep.subr.bf16.mxu1 %v3058_v8 }
 0x274   : > { %2837 = vmatpush3.bf16.msra.mxu0 %v3229_v32  ;;  %2849 = vmatpush3.bf16.msra.mxu1 %v3238_v34  ;;  %v2171_v32 = vld [vmem:[%s1130_s29 + $0x10] sm:$0x3]  ;;  %v2183_v34 = vld [vmem:[%s1130_s29 + $0x18] sm:$0x3] }
 0x275   : > { %2850 = vmatprep.subr.bf16.mxu0 %v3058_v8  ;;  %2862 = vmatprep.subr.bf16.mxu1 %v3058_v8 }
 0x32a   : > { %v1209_v17 = vpop.f32.mrb[8].mxu0  ;;  %v1291_v19 = vpop.f32.mrb[8].mxu1 }
 0x32b   : > { %v1213_v24 = vadd.f32 %v1209_v17, %v1131_v9  ;;  %v1295_v25 = vadd.f32 %v2159_v13, %v1291_v19  ;;  %v2548_v46 = vpop.f32.mrb[9].mxu0  ;;  %v2567_v51 = vpop.f32.mrb[9].mxu1 }
 0x32c   : > { %v1858_v17 = vpop.permute.xlu1 %1857 }
 0x32d   : > { %v2193_v52 = vmul.f32 -1.442695, %v1213_v24  ;;  %v2194_v53 = vmul.f32 -1.442695, %v1295_v25  ;;  %vm1859_vm11 = vcmp.eq.s32.totalorder %v1858_v17, 1 }
 0x32f   : > { %2969 = vpow2.f32 %v2193_v52 }
 0x330   : > { %2971 = vpow2.f32 %v2194_v53 }
 0x339   : > { %v2970_v40 = vpop.eup %2969 }
 0x33a   : > { %v2972_v56 = vpop.eup %2971  ;;  %v1463_v57 = vadd.f32 1.0, %v2970_v40  ;;  %v1373_v58 = vpop.f32.mrb[10].mxu0 }
 0x33b   : > { %v1455_v59 = vpop.f32.mrb[10].mxu1  ;;  %v1469_v62 = vadd.f32 1.0, %v2972_v56  ;;  %v1377_v63 = vadd.f32 %v2171_v32, %v1373_v58  ;;  %v2586_v1 = vpop.f32.mrb[11].mxu0 }
 0x33c   : > { %v1459_v0 = vadd.f32 %v2183_v34, %v1455_v59  ;;  %v2605_v2 = vpop.f32.mrb[11].mxu1  ;;  %2973 = vrcp.f32 %v1463_v57 }
 0x33d   : > { %2975 = vrcp.f32 %v1469_v62 }
 0x33e   : > { %v2195_v3 = vmul.f32 -1.442695, %v1459_v0  ;;  %2977 = vtanh.f32 %v1377_v63 }
 0x340   : > { %2979 = vpow2.f32 %v2195_v3 }
 0x346   : > { %v2974_v4 = vpop.eup %2973 }
 0x347   : > { %v2976_v5 = vpop.eup %2975 }
 0x348   : > { %v2978_v33 = vpop.eup %2977  ;;  %v1479_v7 = vmul.f32 %v2976_v5, %v3410_v39 }
 0x349   : > { %v1480_v18 = vmul.f32 %v2978_v33, %v2974_v4 }
 0x34a   : > { %v2980_v10 = vpop.eup %2979 }
 0x34b   : > { %v1476_v11 = vadd.f32 1.0, %v2980_v10  ;;  %v1481_v12 = vadd.f32 %v1480_v18, %v1479_v7 }
 0x34d   : > { %2981 = vrcp.f32 %v1476_v11  ;;  %v3473_v14 = vsel %vm1490_vm10, %v1481_v12, %v3410_v39 }
 0x34e   : > { %2983 = vtanh.f32 %v1481_v12 }
 0x357   : > { %v2982_v15 = vpop.eup %2981 }
 0x358   : > { %v2984_v20 = vpop.eup %2983 }
 0x359   : > { %v1483_v21 = vmul.f32 %v2984_v20, %v2982_v15 }
 0x35b   : > { %v3479_v22 = vsel %vm1490_vm10, %v1483_v21, %v3416_v47  ;;  %v1493_v23 = vsel %vm1490_vm10, %v1483_v21, 0.0 }
 0x35c   : > { %1495 = vst.msk [vmem:[%s1494_s4] sm:$0x3] %vm754_vm6, %v1493_v23  ;;  %2623 = vmatmul.mubr.msk.f32.vlgmr.msra.gmra.mrb[12].mxu0 %vm395_vm4, %v3479_v22  ;;  %2642 = vmatmul.mubr.msk.f32.vlgmr.msra.gmra.mrb[12].mxu1 %vm395_vm4, %v3479_v22 }
 0x35d   : > { %2852 = vmatpush3.bf16.msra.mxu0 %v3251_v41  ;;  %2864 = vmatpush3.bf16.msra.mxu1 %v3256_v43  ;;  %v2198_v41 = vld [vmem:[%s1499_s7 + $0x8] sm:$0x3] }
 0x35e   : > { %2853 = vmatprep.subr.bf16.mxu0 %v3058_v8  ;;  %2865 = vmatprep.subr.bf16.mxu1 %v3058_v8 }
 0x35f   : > { %2660 = vmatprep.mubr.msk.f32.mxu0 %vm3059_vm1, %v3060_v16  ;;  %2679 = vmatprep.mubr.msk.f32.mxu1 %vm3059_vm1, %v3060_v16  ;;  %v1500_v16 = vld [vmem:[%s1499_s7] sm:$0x3] }
 0x361   : > { %2855 = vmatpush3.bf16.msra.mxu0 %v3268_v48  ;;  %2867 = vmatpush3.bf16.msra.mxu1 %v3272_v49 }
 0x362   : > { %2856 = vmatprep.subr.bf16.mxu0 %v3058_v8  ;;  %2868 = vmatprep.subr.bf16.mxu1 %v3058_v8 }
 0x365   : > { %2858 = vmatpush3.bf16.msra.mxu0 %v3284_v54  ;;  %2870 = vmatpush3.bf16.msra.mxu1 %v3288_v55 }
 0x366   : > { %2859 = vmatprep.subr.bf16.mxu0 %v3058_v8  ;;  %2871 = vmatprep.subr.bf16.mxu1 %v3058_v8 }
 0x369   : > { %2861 = vmatpush3.bf16.msra.mxu0 %v3296_v60  ;;  %2873 = vmatpush3.bf16.msra.mxu1 %v3300_v61  ;;  %v2208_v61 = vld [vmem:[%s1499_s7 + $0x10] sm:$0x3] }
 0x36c   : > { %2661 = vmatmul.mubr.msk.f32.vlgmr.msra.gmra.mrb[14].mxu0 %vm395_vm4, %v3479_v22  ;;  %2680 = vmatmul.mubr.msk.f32.vlgmr.msra.gmra.mrb[14].mxu1 %vm395_vm4, %v3479_v22 }
 0x42f   : > { %v1578_v43 = vpop.f32.mrb[12].mxu0  ;;  %v1660_v48 = vpop.f32.mrb[12].mxu1 }
 0x430   : > { %v1582_v49 = vadd.f32 %v1578_v43, %v1500_v16  ;;  %v1664_v54 = vadd.f32 %v2198_v41, %v1660_v48  ;;  %v2624_v8 = vpop.f32.mrb[13].mxu0  ;;  %v2643_v55 = vpop.f32.mrb[13].mxu1 }
 0x432   : > { %v2228_v60 = vmul.f32 -1.442695, %v1582_v49  ;;  %v2229_v26 = vmul.f32 -1.442695, %v1664_v54 }
 0x434   : > { %2985 = vpow2.f32 %v2228_v60 }
 0x435   : > { %2987 = vpow2.f32 %v2229_v26 }
 0x43e   : > { %v2986_v28 = vpop.eup %2985 }
 0x43f   : > { %v2988_v29 = vpop.eup %2987  ;;  %v1832_v30 = vadd.f32 1.0, %v2986_v28  ;;  %v1742_v31 = vpop.f32.mrb[14].mxu0 }
 0x440   : > { %v1824_v35 = vpop.f32.mrb[14].mxu1  ;;  %v1838_v36 = vadd.f32 1.0, %v2988_v29  ;;  %v1746_v37 = vadd.f32 %v2208_v61, %v1742_v31  ;;  %v2662_v39 = vpop.f32.mrb[15].mxu0 }
 0x441   : > { %v1828_v38 = vadd.f32 %v2218_v27, %v1824_v35  ;;  %v2681_v42 = vpop.f32.mrb[15].mxu1  ;;  %2989 = vrcp.f32 %v1832_v30 }
 0x442   : > { %2991 = vrcp.f32 %v1838_v36 }
 0x443   : > { %v2230_v44 = vmul.f32 -1.442695, %v1828_v38  ;;  %2993 = vtanh.f32 %v1746_v37 }
 0x445   : > { %2995 = vpow2.f32 %v2230_v44 }
 0x44b   : > { %v2990_v45 = vpop.eup %2989 }
 0x44c   : > { %v2992_v47 = vpop.eup %2991 }
 0x44d   : > { %v2994_v50 = vpop.eup %2993  ;;  %v1848_v9 = vmul.f32 %v2992_v47, %v3473_v14 }
 0x44e   : > { %v1849_v19 = vmul.f32 %v2994_v50, %v2990_v45 }
 0x44f   : > { %v2996_v13 = vpop.eup %2995 }
 0x450   : > { %v1845_v24 = vadd.f32 1.0, %v2996_v13  ;;  %v1850_v25 = vadd.f32 %v1849_v19, %v1848_v9 }
 0x452   : > { %2997 = vrcp.f32 %v1845_v24  ;;  %v1861_v46 = vsel %vm1859_vm11, %v1850_v25, %v3473_v14 }
 0x453   : > { %2999 = vtanh.f32 %v1850_v25  ;;  %1866 = vst.msk [vmem:[#allocation3] sm:$0x3] %vm754_vm6, %v1861_v46 }
 0x45c   : > { %v2998_v51 = vpop.eup %2997 }
 0x45d   : > { %v3000_v52 = vpop.eup %2999 }
 0x45e   : > { %v1852_v53 = vmul.f32 %v3000_v52, %v2998_v51 }
 0x460   : > { %v1860_v32 = vsel %vm1859_vm11, %v1852_v53, %v3479_v22  ;;  %v1862_v34 = vsel %vm1859_vm11, %v1852_v53, 0.0 }
 0x461   : > { %1864 = vst.msk [vmem:[%s1863_s6] sm:$0x3] %vm754_vm6, %v1862_v34  ;;  %1865 = vst.msk [vmem:[#allocation2] sm:$0x3] %vm754_vm6, %v1860_v32 }
 0x462 PF: > { %s13_s18 = sadd.s32 1, %s3055_s18   ;;  %s3548_s12 = smov %s3035_s13 }
 0x463   : > { %p10_p13 = scmp.ge.s32.totalorder %s13_s18, 6   ;;  %s3549_s13 = smov %s3139_s8 }
 0x464   : > { %s3550_s14 = smov %s3047_s16  ;;  %s3551_s15 = smov %s3051_s17 }
 0x465   : > { %s3552_s16 = smov %s3555_s19  ;;  %s3553_s17 = smov %s3559_s20 }
 0x466   :  { %12 = sbr.rel (!%p10_p13) target bundleno = 6 (0x6), region = 138 }

</bundles_post_ra>
